<compile_context>
chip_gen: v5e
topology: v5e:2x2
jax: 0.10.0
libtpu: 0.0.40
codegen_flags: <defaults>
</compile_context>

<pallas_src>
import jax
import jax.numpy as jnp
from jax import lax
from jax.experimental import pallas as pl
from jax.experimental.pallas import tpu as pltpu


def _round_up(x, m):
    return ((x + m - 1) // m) * m


def _pick_tile_h(H):
    """Largest row-tile that divides H and still yields >= 2 tiles."""
    for th in (32, 16, 8):
        if H % th == 0 and H // th >= 2:
            return th
    return H  # fall back to whole-image rows (no H tiling)


def _conv_bn_relu_kernel(x_ref, halo_ref, w_ref, scale_ref, bias_ref, o_ref,
                         acc_ref):
    """One grid step = one (batch, H-tile).

    x_ref:     (1, TH, W+2, Cin)    W-padded input rows of this tile (bf16)
    halo_ref:  (1, 2, W+2, Cin)     row above / row below the tile (bf16)
    w_ref:     (3, 3, Cin, Cout)    conv weights, HWIO, channel-padded (bf16)
    scale_ref: (1, Cout)            folded BN scale (f32)
    bias_ref:  (1, Cout)            folded BN bias  (f32)
    o_ref:     (1, TH, W, Cout)     output tile
    acc_ref:   (TH*W, Cout) f32     VMEM scratch accumulator
    """
    TH = o_ref.shape[1]
    W = o_ref.shape[2]
    Cout = o_ref.shape[3]

    # Assemble the (TH+2, W+2, Cin) working slab: halo row, TH tile rows, halo
    # row.  Concatenation is along the outermost (non-tiled) axis -> cheap copy.
    slab = jnp.concatenate(
        [halo_ref[0, 0:1], x_ref[0], halo_ref[0, 1:2]], axis=0)

    acc_ref[...] = jnp.zeros_like(acc_ref)

    # 3x3 conv as 9 shifted matmuls: each tap is a (TH*W, Cin) x (Cin, Cout)
    # bf16 matmul on the MXU, accumulated in f32 in VMEM scratch.
    for kh in range(3):
        for kw in range(3):
            patch = slab[kh:kh + TH, kw:kw + W, :].reshape(TH * W, -1)
            acc_ref[...] += jnp.dot(patch, w_ref[kh, kw],
                                    preferred_element_type=jnp.float32)

    # Folded BatchNorm (inference) + ReLU, fused in-kernel (f32 epilogue).
    y = acc_ref[...] * scale_ref[0] + bias_ref[0]
    o_ref[0] = jnp.maximum(y, 0.0).reshape(TH, W, Cout).astype(o_ref.dtype)


def conv_bn_relu(x_nhwc, w_hwio, scale, bias, *, out_dtype=jnp.bfloat16):
    """x_nhwc: (N,H,W,Cp_in) channel-padded; w_hwio: (3,3,Cp_in,Cp_out);
    scale/bias: (Cp_out,).  Returns (N,H,W,Cp_out) in `out_dtype`."""
    N, H, W, Cin = x_nhwc.shape
    Cout = w_hwio.shape[-1]

    TH = _pick_tile_h(H)
    nH = H // TH
    Wp = W + 2

    x = x_nhwc.astype(jnp.bfloat16)   # bf16 MXU operands
    w = w_hwio.astype(jnp.bfloat16)

    # Pad only the W halo (1 column each side).  The H halo is delivered as a
    # tiny per-tile side array so input blocks never overlap.
    x_w = jnp.pad(x, ((0, 0), (0, 0), (1, 1), (0, 0)))

    zrow = jnp.zeros((N, 1, Wp, Cin), x.dtype)
    if nH > 1:
        # top[n, i] = row (i*TH - 1), bot[n, i] = row (i*TH + TH); zeros at the
        # image borders (matches the zero padding of the convolution).
        top = jnp.concatenate([zrow, x_w[:, TH - 1:H - 1:TH]], axis=1)
        bot = jnp.concatenate([x_w[:, TH:H:TH], zrow], axis=1)
    else:
        top = zrow
        bot = zrow
    halo = jnp.stack([top, bot], axis=2).reshape(N, nH * 2, Wp, Cin)

    scale2d = scale.reshape(1, Cout).astype(jnp.float32)
    bias2d = bias.reshape(1, Cout).astype(jnp.float32)

    out_itemsize = jnp.dtype(out_dtype).itemsize
    flops = 2 * N * H * W * 9 * Cin * Cout
    bytes_accessed = (int(x_w.size) * 2 + int(halo.size) * 2 + int(w.size) * 2
                      + N * H * W * Cout * out_itemsize
                      + 2 * 4 * Cout)

    out = pl.pallas_call(
        _conv_bn_relu_kernel,
        out_shape=jax.ShapeDtypeStruct((N, H, W, Cout), out_dtype),
        grid_spec=pltpu.PrefetchScalarGridSpec(
            num_scalar_prefetch=0,
            grid=(N, nH),
            in_specs=[
                pl.BlockSpec((1, TH, Wp, Cin), lambda n, i: (n, i, 0, 0)),
                pl.BlockSpec((1, 2, Wp, Cin), lambda n, i: (n, i, 0, 0)),
                pl.BlockSpec((3, 3, Cin, Cout), lambda n, i: (0, 0, 0, 0)),
                pl.BlockSpec((1, Cout), lambda n, i: (0, 0)),
                pl.BlockSpec((1, Cout), lambda n, i: (0, 0)),
            ],
            out_specs=pl.BlockSpec((1, TH, W, Cout), lambda n, i: (n, i, 0, 0)),
            scratch_shapes=[pltpu.VMEM((TH * W, Cout), jnp.float32)],
        ),
        compiler_params=pltpu.CompilerParams(
            # Both axes are independent -> shardable across v7x's 2 TensorCores.
            dimension_semantics=("parallel", "parallel"),
            # Explicit scoped-VMEM budget; <= physical on all gens (v7x: 64 MiB).
            vmem_limit_bytes=48 * 1024 * 1024),
        cost_estimate=pl.CostEstimate(
            flops=flops, transcendentals=0, bytes_accessed=bytes_accessed),
    )(x_w, halo, w, scale2d, bias2d)
    return out


def fold_bn(gamma, beta, running_mean, running_var, eps=1e-5):
    scale = gamma / jnp.sqrt(running_var + eps)
    bias = beta - running_mean * scale
    return scale, bias


@jax.jit
def doble_conv(x_nchw, params):
    """Forward of DobleConv. x_nchw: (N, Cin, H, W) float32."""
    # NCHW -> NHWC (channels on the lane axis) for the TPU kernel.
    x = jnp.transpose(x_nchw, (0, 2, 3, 1))
    N, H, W, Cin = x.shape
    Cout = params["w1"].shape[-1]

    # Lane-dense channel padding (multiples of 128).  Padded input channels,
    # weights, BN scale/bias are exact zeros, so results are unchanged.
    Cin_p = _round_up(Cin, 128)
    Cout_p = _round_up(Cout, 128)

    x_p = jnp.pad(x, ((0, 0), (0, 0), (0, 0), (0, Cin_p - Cin)))

    w1 = jnp.pad(params["w1"],
                 ((0, 0), (0, 0), (0, Cin_p - Cin), (0, Cout_p - Cout)))
    w2 = jnp.pad(params["w2"],
                 ((0, 0), (0, 0), (0, Cout_p - Cout), (0, Cout_p - Cout)))

    s1, b1 = fold_bn(params["gamma1"], params["beta1"],
                     params["mean1"], params["var1"])
    s2, b2 = fold_bn(params["gamma2"], params["beta2"],
                     params["mean2"], params["var2"])
    s1 = jnp.pad(s1, (0, Cout_p - Cout))
    b1 = jnp.pad(b1, (0, Cout_p - Cout))
    s2 = jnp.pad(s2, (0, Cout_p - Cout))
    b2 = jnp.pad(b2, (0, Cout_p - Cout))

    # conv1 emits a bf16, already-channel-padded intermediate that conv2
    # consumes directly (no re-padding, half the HBM round trip).
    y = conv_bn_relu(x_p, w1, s1, b1, out_dtype=jnp.bfloat16)
    y = conv_bn_relu(y, w2, s2, b2, out_dtype=jnp.float32)

    # Strip channel padding; NHWC -> NCHW to match PyTorch convention.
    y = y[..., :Cout]
    return jnp.transpose(y, (0, 3, 1, 2))


def _reference(x_nchw, params):
    """Plain-JAX f32 reference (same semantics) for a correctness check."""
    x = jnp.transpose(x_nchw, (0, 2, 3, 1))

    def block(x, w, gamma, beta, mean, var):
        y = lax.conv_general_dilated(
            x, w, window_strides=(1, 1), padding="SAME",
            dimension_numbers=("NHWC", "HWIO", "NHWC"))
        s, b = fold_bn(gamma, beta, mean, var)
        return jnp.maximum(y * s + b, 0.0)

    y = block(x, params["w1"], params["gamma1"], params["beta1"],
              params["mean1"], params["var1"])
    y = block(y, params["w2"], params["gamma2"], params["beta2"],
              params["mean2"], params["var2"])
    return jnp.transpose(y, (0, 3, 1, 2))


def make_params(key, in_channels, out_channels):
    ks = jax.random.split(key, 6)
    # Conv weights (HWIO layout for the kernel); PyTorch stores OIHW — same
    # values, just transposed layout.
    fan1 = in_channels * 9
    fan2 = out_channels * 9
    w1 = jax.random.normal(ks[0], (3, 3, in_channels, out_channels),
                           jnp.float32) * (2.0 / fan1) ** 0.5
    w2 = jax.random.normal(ks[1], (3, 3, out_channels, out_channels),
                           jnp.float32) * (2.0 / fan2) ** 0.5
    params = dict(
        w1=w1, w2=w2,
        gamma1=1.0 + 0.1 * jax.random.normal(ks[2], (out_channels,), jnp.float32),
        beta1=0.1 * jax.random.normal(ks[3], (out_channels,), jnp.float32),
        mean1=jnp.zeros((out_channels,), jnp.float32),
        var1=jnp.ones((out_channels,), jnp.float32),
        gamma2=1.0 + 0.1 * jax.random.normal(ks[4], (out_channels,), jnp.float32),
        beta2=0.1 * jax.random.normal(ks[5], (out_channels,), jnp.float32),
        mean2=jnp.zeros((out_channels,), jnp.float32),
        var2=jnp.ones((out_channels,), jnp.float32),
    )
    return params


if __name__ == "__main__":
    key = jax.random.PRNGKey(0)
    k_x, k_p = jax.random.split(key)

    N, Cin, Cout, H, W = 2, 4, 8, 16, 16
    x = jax.random.normal(k_x, (N, Cin, H, W), jnp.float32)
    params = make_params(k_p, Cin, Cout)

    out = doble_conv(x, params)
    out = jax.block_until_ready(out)

    ref = jax.block_until_ready(_reference(x, params))
    assert out.shape == (N, Cout, H, W), out.shape
    # bf16 MXU operands + bf16 intermediate vs f32 reference -> relaxed tol.
    if not jnp.allclose(out, ref, atol=5e-2, rtol=5e-2):
        err = float(jnp.max(jnp.abs(out - ref)))
        raise AssertionError(f"Pallas kernel mismatch, max abs err = {err}")

    print("KERNEL_OK")
</pallas_src>

<mosaic_0001>
module attributes {stable_mosaic.version = 11 : i64} {
  func.func @_conv_bn_relu_kernel(%arg0: i32, %arg1: i32, %arg2: memref<1x8x18x128xbf16, #tpu.memory_space<vmem>>, %arg3: memref<1x2x18x128xbf16, #tpu.memory_space<vmem>>, %arg4: memref<3x3x128x128xbf16, #tpu.memory_space<vmem>>, %arg5: memref<1x128xf32, #tpu.memory_space<vmem>>, %arg6: memref<1x128xf32, #tpu.memory_space<vmem>>, %arg7: memref<1x8x16x128xbf16, #tpu.memory_space<vmem>>, %arg8: memref<128x128xf32, #tpu.memory_space<vmem>>) attributes {dimension_semantics = [#tpu.dimension_semantics<parallel>, #tpu.dimension_semantics<parallel>], iteration_bounds = array<i64: 2, 2>, scalar_prefetch = 0 : i64, scratch_operands = 1 : i64, tpu.core_type = #tpu.core_type<tc>, window_params = [{transform_indices = @transform_0, window_bounds = array<i64: 1, 8, 18, 128>}, {transform_indices = @transform_1, window_bounds = array<i64: 1, 2, 18, 128>}, {pipeline_mode = #tpu.pipeline_mode<synchronous>, transform_indices = @transform_2, window_bounds = array<i64: 3, 3, 128, 128>}, {pipeline_mode = #tpu.pipeline_mode<synchronous>, transform_indices = @transform_3, window_bounds = array<i64: 1, 128>}, {pipeline_mode = #tpu.pipeline_mode<synchronous>, transform_indices = @transform_4, window_bounds = array<i64: 1, 128>}, {transform_indices = @transform_5, window_bounds = array<i64: 1, 8, 16, 128>}]} {
    %c0 = arith.constant 0 : index
    %c0_0 = arith.constant 0 : index
    %c0_1 = arith.constant 0 : index
    %c0_2 = arith.constant 0 : index
    %0 = vector.load %arg3[%c0, %c0_0, %c0_1, %c0_2] : memref<1x2x18x128xbf16, #tpu.memory_space<vmem>>, vector<1x1x18x128xbf16>
    %1 = vector.shape_cast %0 : vector<1x1x18x128xbf16> to vector<1x18x128xbf16>
    %c0_3 = arith.constant 0 : index
    %c0_4 = arith.constant 0 : index
    %c0_5 = arith.constant 0 : index
    %c0_6 = arith.constant 0 : index
    %2 = vector.load %arg2[%c0_3, %c0_4, %c0_5, %c0_6] : memref<1x8x18x128xbf16, #tpu.memory_space<vmem>>, vector<1x8x18x128xbf16>
    %3 = vector.shape_cast %2 : vector<1x8x18x128xbf16> to vector<8x18x128xbf16>
    %c0_7 = arith.constant 0 : index
    %c1 = arith.constant 1 : index
    %c0_8 = arith.constant 0 : index
    %c0_9 = arith.constant 0 : index
    %4 = vector.load %arg3[%c0_7, %c1, %c0_8, %c0_9] : memref<1x2x18x128xbf16, #tpu.memory_space<vmem>>, vector<1x1x18x128xbf16>
    %5 = vector.shape_cast %4 : vector<1x1x18x128xbf16> to vector<1x18x128xbf16>
    %6 = tpu.concatenate %1, %3, %5 in 0 : vector<1x18x128xbf16>, vector<8x18x128xbf16>, vector<1x18x128xbf16> -> vector<10x18x128xbf16>
    %cst = arith.constant 0.000000e+00 : f32
    %7 = vector.broadcast %cst : f32 to vector<128x128xf32>
    %c0_10 = arith.constant 0 : index
    %c0_11 = arith.constant 0 : index
    %8 = vector.load %arg8[%c0_10, %c0_11] : memref<128x128xf32, #tpu.memory_space<vmem>>, vector<128x128xf32>
    tpu.vector_store %arg8[%c0_10, %c0_11], %7 {strides = array<i32>} : memref<128x128xf32, #tpu.memory_space<vmem>>, vector<128x128xf32>,
    %9 = vector.extract_strided_slice %6 {offsets = [0, 0, 0], sizes = [8, 16, 128], strides = [1, 1, 1]} : vector<10x18x128xbf16> to vector<8x16x128xbf16>
    %10 = vector.shape_cast %9 : vector<8x16x128xbf16> to vector<128x128xbf16>
    %c0_12 = arith.constant 0 : index
    %c0_13 = arith.constant 0 : index
    %11 = vector.load %arg8[%c0_12, %c0_13] : memref<128x128xf32, #tpu.memory_space<vmem>>, vector<128x128xf32>
    %c0_14 = arith.constant 0 : index
    %c0_15 = arith.constant 0 : index
    %c0_16 = arith.constant 0 : index
    %c0_17 = arith.constant 0 : index
    %12 = vector.load %arg4[%c0_14, %c0_15, %c0_16, %c0_17] : memref<3x3x128x128xbf16, #tpu.memory_space<vmem>>, vector<1x1x128x128xbf16>
    %13 = vector.shape_cast %12 : vector<1x1x128x128xbf16> to vector<128x128xbf16>
    %cst_18 = arith.constant dense<0.000000e+00> : vector<128x128xf32>
    %14 = tpu.matmul %10, %13, %cst_18 {dimension_numbers = #tpu.dot_dimension_numbers<[1], [0], [0], [1], [0, 0, 1, 1], [], []>} : vector<128x128xbf16>, vector<128x128xbf16>, vector<128x128xf32> -> vector<128x128xf32>
    %15 = arith.addf %11, %14 : vector<128x128xf32>
    %c0_19 = arith.constant 0 : index
    %c0_20 = arith.constant 0 : index
    %16 = vector.load %arg8[%c0_19, %c0_20] : memref<128x128xf32, #tpu.memory_space<vmem>>, vector<128x128xf32>
    tpu.vector_store %arg8[%c0_19, %c0_20], %15 {strides = array<i32>} : memref<128x128xf32, #tpu.memory_space<vmem>>, vector<128x128xf32>,
    %17 = vector.extract_strided_slice %6 {offsets = [0, 1, 0], sizes = [8, 16, 128], strides = [1, 1, 1]} : vector<10x18x128xbf16> to vector<8x16x128xbf16>
    %18 = vector.shape_cast %17 : vector<8x16x128xbf16> to vector<128x128xbf16>
    %c0_21 = arith.constant 0 : index
    %c0_22 = arith.constant 0 : index
    %19 = vector.load %arg8[%c0_21, %c0_22] : memref<128x128xf32, #tpu.memory_space<vmem>>, vector<128x128xf32>
    %c0_23 = arith.constant 0 : index
    %c1_24 = arith.constant 1 : index
    %c0_25 = arith.constant 0 : index
    %c0_26 = arith.constant 0 : index
    %20 = vector.load %arg4[%c0_23, %c1_24, %c0_25, %c0_26] : memref<3x3x128x128xbf16, #tpu.memory_space<vmem>>, vector<1x1x128x128xbf16>
    %21 = vector.shape_cast %20 : vector<1x1x128x128xbf16> to vector<128x128xbf16>
    %cst_27 = arith.constant dense<0.000000e+00> : vector<128x128xf32>
    %22 = tpu.matmul %18, %21, %cst_27 {dimension_numbers = #tpu.dot_dimension_numbers<[1], [0], [0], [1], [0, 0, 1, 1], [], []>} : vector<128x128xbf16>, vector<128x128xbf16>, vector<128x128xf32> -> vector<128x128xf32>
    %23 = arith.addf %19, %22 : vector<128x128xf32>
    %c0_28 = arith.constant 0 : index
    %c0_29 = arith.constant 0 : index
    %24 = vector.load %arg8[%c0_28, %c0_29] : memref<128x128xf32, #tpu.memory_space<vmem>>, vector<128x128xf32>
    tpu.vector_store %arg8[%c0_28, %c0_29], %23 {strides = array<i32>} : memref<128x128xf32, #tpu.memory_space<vmem>>, vector<128x128xf32>,
    %25 = vector.extract_strided_slice %6 {offsets = [0, 2, 0], sizes = [8, 16, 128], strides = [1, 1, 1]} : vector<10x18x128xbf16> to vector<8x16x128xbf16>
    %26 = vector.shape_cast %25 : vector<8x16x128xbf16> to vector<128x128xbf16>
    %c0_30 = arith.constant 0 : index
    %c0_31 = arith.constant 0 : index
    %27 = vector.load %arg8[%c0_30, %c0_31] : memref<128x128xf32, #tpu.memory_space<vmem>>, vector<128x128xf32>
    %c0_32 = arith.constant 0 : index
    %c2 = arith.constant 2 : index
    %c0_33 = arith.constant 0 : index
    %c0_34 = arith.constant 0 : index
    %28 = vector.load %arg4[%c0_32, %c2, %c0_33, %c0_34] : memref<3x3x128x128xbf16, #tpu.memory_space<vmem>>, vector<1x1x128x128xbf16>
    %29 = vector.shape_cast %28 : vector<1x1x128x128xbf16> to vector<128x128xbf16>
    %cst_35 = arith.constant dense<0.000000e+00> : vector<128x128xf32>
    %30 = tpu.matmul %26, %29, %cst_35 {dimension_numbers = #tpu.dot_dimension_numbers<[1], [0], [0], [1], [0, 0, 1, 1], [], []>} : vector<128x128xbf16>, vector<128x128xbf16>, vector<128x128xf32> -> vector<128x128xf32>
    %31 = arith.addf %27, %30 : vector<128x128xf32>
    %c0_36 = arith.constant 0 : index
    %c0_37 = arith.constant 0 : index
    %32 = vector.load %arg8[%c0_36, %c0_37] : memref<128x128xf32, #tpu.memory_space<vmem>>, vector<128x128xf32>
    tpu.vector_store %arg8[%c0_36, %c0_37], %31 {strides = array<i32>} : memref<128x128xf32, #tpu.memory_space<vmem>>, vector<128x128xf32>,
    %33 = vector.extract_strided_slice %6 {offsets = [1, 0, 0], sizes = [8, 16, 128], strides = [1, 1, 1]} : vector<10x18x128xbf16> to vector<8x16x128xbf16>
    %34 = vector.shape_cast %33 : vector<8x16x128xbf16> to vector<128x128xbf16>
    %c0_38 = arith.constant 0 : index
    %c0_39 = arith.constant 0 : index
    %35 = vector.load %arg8[%c0_38, %c0_39] : memref<128x128xf32, #tpu.memory_space<vmem>>, vector<128x128xf32>
    %c1_40 = arith.constant 1 : index
    %c0_41 = arith.constant 0 : index
    %c0_42 = arith.constant 0 : index
    %c0_43 = arith.constant 0 : index
    %36 = vector.load %arg4[%c1_40, %c0_41, %c0_42, %c0_43] : memref<3x3x128x128xbf16, #tpu.memory_space<vmem>>, vector<1x1x128x128xbf16>
    %37 = vector.shape_cast %36 : vector<1x1x128x128xbf16> to vector<128x128xbf16>
    %cst_44 = arith.constant dense<0.000000e+00> : vector<128x128xf32>
    %38 = tpu.matmul %34, %37, %cst_44 {dimension_numbers = #tpu.dot_dimension_numbers<[1], [0], [0], [1], [0, 0, 1, 1], [], []>} : vector<128x128xbf16>, vector<128x128xbf16>, vector<128x128xf32> -> vector<128x128xf32>
    %39 = arith.addf %35, %38 : vector<128x128xf32>
    %c0_45 = arith.constant 0 : index
    %c0_46 = arith.constant 0 : index
    %40 = vector.load %arg8[%c0_45, %c0_46] : memref<128x128xf32, #tpu.memory_space<vmem>>, vector<128x128xf32>
    tpu.vector_store %arg8[%c0_45, %c0_46], %39 {strides = array<i32>} : memref<128x128xf32, #tpu.memory_space<vmem>>, vector<128x128xf32>,
    %41 = vector.extract_strided_slice %6 {offsets = [1, 1, 0], sizes = [8, 16, 128], strides = [1, 1, 1]} : vector<10x18x128xbf16> to vector<8x16x128xbf16>
    %42 = vector.shape_cast %41 : vector<8x16x128xbf16> to vector<128x128xbf16>
    %c0_47 = arith.constant 0 : index
    %c0_48 = arith.constant 0 : index
    %43 = vector.load %arg8[%c0_47, %c0_48] : memref<128x128xf32, #tpu.memory_space<vmem>>, vector<128x128xf32>
    %c1_49 = arith.constant 1 : index
    %c1_50 = arith.constant 1 : index
    %c0_51 = arith.constant 0 : index
    %c0_52 = arith.constant 0 : index
    %44 = vector.load %arg4[%c1_49, %c1_50, %c0_51, %c0_52] : memref<3x3x128x128xbf16, #tpu.memory_space<vmem>>, vector<1x1x128x128xbf16>
    %45 = vector.shape_cast %44 : vector<1x1x128x128xbf16> to vector<128x128xbf16>
    %cst_53 = arith.constant dense<0.000000e+00> : vector<128x128xf32>
    %46 = tpu.matmul %42, %45, %cst_53 {dimension_numbers = #tpu.dot_dimension_numbers<[1], [0], [0], [1], [0, 0, 1, 1], [], []>} : vector<128x128xbf16>, vector<128x128xbf16>, vector<128x128xf32> -> vector<128x128xf32>
    %47 = arith.addf %43, %46 : vector<128x128xf32>
    %c0_54 = arith.constant 0 : index
    %c0_55 = arith.constant 0 : index
    %48 = vector.load %arg8[%c0_54, %c0_55] : memref<128x128xf32, #tpu.memory_space<vmem>>, vector<128x128xf32>
    tpu.vector_store %arg8[%c0_54, %c0_55], %47 {strides = array<i32>} : memref<128x128xf32, #tpu.memory_space<vmem>>, vector<128x128xf32>,
    %49 = vector.extract_strided_slice %6 {offsets = [1, 2, 0], sizes = [8, 16, 128], strides = [1, 1, 1]} : vector<10x18x128xbf16> to vector<8x16x128xbf16>
    %50 = vector.shape_cast %49 : vector<8x16x128xbf16> to vector<128x128xbf16>
    %c0_56 = arith.constant 0 : index
    %c0_57 = arith.constant 0 : index
    %51 = vector.load %arg8[%c0_56, %c0_57] : memref<128x128xf32, #tpu.memory_space<vmem>>, vector<128x128xf32>
    %c1_58 = arith.constant 1 : index
    %c2_59 = arith.constant 2 : index
    %c0_60 = arith.constant 0 : index
    %c0_61 = arith.constant 0 : index
    %52 = vector.load %arg4[%c1_58, %c2_59, %c0_60, %c0_61] : memref<3x3x128x128xbf16, #tpu.memory_space<vmem>>, vector<1x1x128x128xbf16>
    %53 = vector.shape_cast %52 : vector<1x1x128x128xbf16> to vector<128x128xbf16>
    %cst_62 = arith.constant dense<0.000000e+00> : vector<128x128xf32>
    %54 = tpu.matmul %50, %53, %cst_62 {dimension_numbers = #tpu.dot_dimension_numbers<[1], [0], [0], [1], [0, 0, 1, 1], [], []>} : vector<128x128xbf16>, vector<128x128xbf16>, vector<128x128xf32> -> vector<128x128xf32>
    %55 = arith.addf %51, %54 : vector<128x128xf32>
    %c0_63 = arith.constant 0 : index
    %c0_64 = arith.constant 0 : index
    %56 = vector.load %arg8[%c0_63, %c0_64] : memref<128x128xf32, #tpu.memory_space<vmem>>, vector<128x128xf32>
    tpu.vector_store %arg8[%c0_63, %c0_64], %55 {strides = array<i32>} : memref<128x128xf32, #tpu.memory_space<vmem>>, vector<128x128xf32>,
    %57 = vector.extract_strided_slice %6 {offsets = [2, 0, 0], sizes = [8, 16, 128], strides = [1, 1, 1]} : vector<10x18x128xbf16> to vector<8x16x128xbf16>
    %58 = vector.shape_cast %57 : vector<8x16x128xbf16> to vector<128x128xbf16>
    %c0_65 = arith.constant 0 : index
    %c0_66 = arith.constant 0 : index
    %59 = vector.load %arg8[%c0_65, %c0_66] : memref<128x128xf32, #tpu.memory_space<vmem>>, vector<128x128xf32>
    %c2_67 = arith.constant 2 : index
    %c0_68 = arith.constant 0 : index
    %c0_69 = arith.constant 0 : index
    %c0_70 = arith.constant 0 : index
    %60 = vector.load %arg4[%c2_67, %c0_68, %c0_69, %c0_70] : memref<3x3x128x128xbf16, #tpu.memory_space<vmem>>, vector<1x1x128x128xbf16>
    %61 = vector.shape_cast %60 : vector<1x1x128x128xbf16> to vector<128x128xbf16>
    %cst_71 = arith.constant dense<0.000000e+00> : vector<128x128xf32>
    %62 = tpu.matmul %58, %61, %cst_71 {dimension_numbers = #tpu.dot_dimension_numbers<[1], [0], [0], [1], [0, 0, 1, 1], [], []>} : vector<128x128xbf16>, vector<128x128xbf16>, vector<128x128xf32> -> vector<128x128xf32>
    %63 = arith.addf %59, %62 : vector<128x128xf32>
    %c0_72 = arith.constant 0 : index
    %c0_73 = arith.constant 0 : index
    %64 = vector.load %arg8[%c0_72, %c0_73] : memref<128x128xf32, #tpu.memory_space<vmem>>, vector<128x128xf32>
    tpu.vector_store %arg8[%c0_72, %c0_73], %63 {strides = array<i32>} : memref<128x128xf32, #tpu.memory_space<vmem>>, vector<128x128xf32>,
    %65 = vector.extract_strided_slice %6 {offsets = [2, 1, 0], sizes = [8, 16, 128], strides = [1, 1, 1]} : vector<10x18x128xbf16> to vector<8x16x128xbf16>
    %66 = vector.shape_cast %65 : vector<8x16x128xbf16> to vector<128x128xbf16>
    %c0_74 = arith.constant 0 : index
    %c0_75 = arith.constant 0 : index
    %67 = vector.load %arg8[%c0_74, %c0_75] : memref<128x128xf32, #tpu.memory_space<vmem>>, vector<128x128xf32>
    %c2_76 = arith.constant 2 : index
    %c1_77 = arith.constant 1 : index
    %c0_78 = arith.constant 0 : index
    %c0_79 = arith.constant 0 : index
    %68 = vector.load %arg4[%c2_76, %c1_77, %c0_78, %c0_79] : memref<3x3x128x128xbf16, #tpu.memory_space<vmem>>, vector<1x1x128x128xbf16>
    %69 = vector.shape_cast %68 : vector<1x1x128x128xbf16> to vector<128x128xbf16>
    %cst_80 = arith.constant dense<0.000000e+00> : vector<128x128xf32>
    %70 = tpu.matmul %66, %69, %cst_80 {dimension_numbers = #tpu.dot_dimension_numbers<[1], [0], [0], [1], [0, 0, 1, 1], [], []>} : vector<128x128xbf16>, vector<128x128xbf16>, vector<128x128xf32> -> vector<128x128xf32>
    %71 = arith.addf %67, %70 : vector<128x128xf32>
    %c0_81 = arith.constant 0 : index
    %c0_82 = arith.constant 0 : index
    %72 = vector.load %arg8[%c0_81, %c0_82] : memref<128x128xf32, #tpu.memory_space<vmem>>, vector<128x128xf32>
    tpu.vector_store %arg8[%c0_81, %c0_82], %71 {strides = array<i32>} : memref<128x128xf32, #tpu.memory_space<vmem>>, vector<128x128xf32>,
    %73 = vector.extract_strided_slice %6 {offsets = [2, 2, 0], sizes = [8, 16, 128], strides = [1, 1, 1]} : vector<10x18x128xbf16> to vector<8x16x128xbf16>
    %74 = vector.shape_cast %73 : vector<8x16x128xbf16> to vector<128x128xbf16>
    %c0_83 = arith.constant 0 : index
    %c0_84 = arith.constant 0 : index
    %75 = vector.load %arg8[%c0_83, %c0_84] : memref<128x128xf32, #tpu.memory_space<vmem>>, vector<128x128xf32>
    %c2_85 = arith.constant 2 : index
    %c2_86 = arith.constant 2 : index
    %c0_87 = arith.constant 0 : index
    %c0_88 = arith.constant 0 : index
    %76 = vector.load %arg4[%c2_85, %c2_86, %c0_87, %c0_88] : memref<3x3x128x128xbf16, #tpu.memory_space<vmem>>, vector<1x1x128x128xbf16>
    %77 = vector.shape_cast %76 : vector<1x1x128x128xbf16> to vector<128x128xbf16>
    %cst_89 = arith.constant dense<0.000000e+00> : vector<128x128xf32>
    %78 = tpu.matmul %74, %77, %cst_89 {dimension_numbers = #tpu.dot_dimension_numbers<[1], [0], [0], [1], [0, 0, 1, 1], [], []>} : vector<128x128xbf16>, vector<128x128xbf16>, vector<128x128xf32> -> vector<128x128xf32>
    %79 = arith.addf %75, %78 : vector<128x128xf32>
    %c0_90 = arith.constant 0 : index
    %c0_91 = arith.constant 0 : index
    %80 = vector.load %arg8[%c0_90, %c0_91] : memref<128x128xf32, #tpu.memory_space<vmem>>, vector<128x128xf32>
    tpu.vector_store %arg8[%c0_90, %c0_91], %79 {strides = array<i32>} : memref<128x128xf32, #tpu.memory_space<vmem>>, vector<128x128xf32>,
    %c0_92 = arith.constant 0 : index
    %c0_93 = arith.constant 0 : index
    %81 = vector.load %arg8[%c0_92, %c0_93] : memref<128x128xf32, #tpu.memory_space<vmem>>, vector<128x128xf32>
    %c0_94 = arith.constant 0 : index
    %c0_95 = arith.constant 0 : index
    %82 = vector.load %arg5[%c0_94, %c0_95] : memref<1x128xf32, #tpu.memory_space<vmem>>, vector<1x128xf32>
    %83 = vector.shape_cast %82 : vector<1x128xf32> to vector<128xf32>
    %84 = vector.shape_cast %83 : vector<128xf32> to vector<1x128xf32>
    %85 = vector.broadcast %84 : vector<1x128xf32> to vector<128x128xf32>
    %86 = arith.mulf %81, %85 : vector<128x128xf32>
    %c0_96 = arith.constant 0 : index
    %c0_97 = arith.constant 0 : index
    %87 = vector.load %arg6[%c0_96, %c0_97] : memref<1x128xf32, #tpu.memory_space<vmem>>, vector<1x128xf32>
    %88 = vector.shape_cast %87 : vector<1x128xf32> to vector<128xf32>
    %89 = vector.shape_cast %88 : vector<128xf32> to vector<1x128xf32>
    %90 = vector.broadcast %89 : vector<1x128xf32> to vector<128x128xf32>
    %91 = arith.addf %86, %90 : vector<128x128xf32>
    %cst_98 = arith.constant 0.000000e+00 : f32
    %92 = vector.broadcast %cst_98 : f32 to vector<128x128xf32>
    %93 = arith.maximumf %91, %92 : vector<128x128xf32>
    %94 = vector.shape_cast %93 : vector<128x128xf32> to vector<8x16x128xf32>
    %95 = arith.truncf %94 : vector<8x16x128xf32> to vector<8x16x128xbf16>
    %c0_99 = arith.constant 0 : index
    %c0_100 = arith.constant 0 : index
    %c0_101 = arith.constant 0 : index
    %c0_102 = arith.constant 0 : index
    %96 = vector.load %arg7[%c0_99, %c0_100, %c0_101, %c0_102] : memref<1x8x16x128xbf16, #tpu.memory_space<vmem>>, vector<1x8x16x128xbf16>
    %97 = vector.shape_cast %96 : vector<1x8x16x128xbf16> to vector<8x16x128xbf16>
    %98 = vector.shape_cast %95 : vector<8x16x128xbf16> to vector<1x8x16x128xbf16>
    tpu.vector_store %arg7[%c0_99, %c0_100, %c0_101, %c0_102], %98 {strides = array<i32>} : memref<1x8x16x128xbf16, #tpu.memory_space<vmem>>, vector<1x8x16x128xbf16>,
    return
  }
  func.func @transform_0(%arg0: i32, %arg1: i32) -> (i32, i32, i32, i32) {
    %c0_i32 = arith.constant 0 : i32
    %c0_i32_0 = arith.constant 0 : i32
    %c0_i32_1 = arith.constant 0 : i32
    return %arg0, %arg1, %c0_i32, %c0_i32_0 : i32, i32, i32, i32
  }
  func.func @transform_1(%arg0: i32, %arg1: i32) -> (i32, i32, i32, i32) {
    %c0_i32 = arith.constant 0 : i32
    %c0_i32_0 = arith.constant 0 : i32
    %c0_i32_1 = arith.constant 0 : i32
    return %arg0, %arg1, %c0_i32, %c0_i32_0 : i32, i32, i32, i32
  }
  func.func @transform_2(%arg0: i32, %arg1: i32) -> (i32, i32, i32, i32) {
    %c0_i32 = arith.constant 0 : i32
    %c0_i32_0 = arith.constant 0 : i32
    %c0_i32_1 = arith.constant 0 : i32
    %c0_i32_2 = arith.constant 0 : i32
    %c0_i32_3 = arith.constant 0 : i32
    return %c0_i32, %c0_i32_0, %c0_i32_1, %c0_i32_2 : i32, i32, i32, i32
  }
  func.func @transform_3(%arg0: i32, %arg1: i32) -> (i32, i32) {
    %c0_i32 = arith.constant 0 : i32
    %c0_i32_0 = arith.constant 0 : i32
    %c0_i32_1 = arith.constant 0 : i32
    return %c0_i32, %c0_i32_0 : i32, i32
  }
  func.func @transform_4(%arg0: i32, %arg1: i32) -> (i32, i32) {
    %c0_i32 = arith.constant 0 : i32
    %c0_i32_0 = arith.constant 0 : i32
    %c0_i32_1 = arith.constant 0 : i32
    return %c0_i32, %c0_i32_0 : i32, i32
  }
  func.func @transform_5(%arg0: i32, %arg1: i32) -> (i32, i32, i32, i32) {
    %c0_i32 = arith.constant 0 : i32
    %c0_i32_0 = arith.constant 0 : i32
    %c0_i32_1 = arith.constant 0 : i32
    return %arg0, %arg1, %c0_i32, %c0_i32_0 : i32, i32, i32, i32
  }
}

module attributes {stable_mosaic.version = 11 : i64} {
  func.func @_conv_bn_relu_kernel(%arg0: i32, %arg1: i32, %arg2: memref<1x8x18x128xbf16, #tpu.memory_space<vmem>>, %arg3: memref<1x2x18x128xbf16, #tpu.memory_space<vmem>>, %arg4: memref<3x3x128x128xbf16, #tpu.memory_space<vmem>>, %arg5: memref<1x128xf32, #tpu.memory_space<vmem>>, %arg6: memref<1x128xf32, #tpu.memory_space<vmem>>, %arg7: memref<1x8x16x128xf32, #tpu.memory_space<vmem>>, %arg8: memref<128x128xf32, #tpu.memory_space<vmem>>) attributes {dimension_semantics = [#tpu.dimension_semantics<parallel>, #tpu.dimension_semantics<parallel>], iteration_bounds = array<i64: 2, 2>, scalar_prefetch = 0 : i64, scratch_operands = 1 : i64, tpu.core_type = #tpu.core_type<tc>, window_params = [{transform_indices = @transform_0, window_bounds = array<i64: 1, 8, 18, 128>}, {transform_indices = @transform_1, window_bounds = array<i64: 1, 2, 18, 128>}, {pipeline_mode = #tpu.pipeline_mode<synchronous>, transform_indices = @transform_2, window_bounds = array<i64: 3, 3, 128, 128>}, {pipeline_mode = #tpu.pipeline_mode<synchronous>, transform_indices = @transform_3, window_bounds = array<i64: 1, 128>}, {pipeline_mode = #tpu.pipeline_mode<synchronous>, transform_indices = @transform_4, window_bounds = array<i64: 1, 128>}, {transform_indices = @transform_5, window_bounds = array<i64: 1, 8, 16, 128>}]} {
    %c0 = arith.constant 0 : index
    %c0_0 = arith.constant 0 : index
    %c0_1 = arith.constant 0 : index
    %c0_2 = arith.constant 0 : index
    %0 = vector.load %arg3[%c0, %c0_0, %c0_1, %c0_2] : memref<1x2x18x128xbf16, #tpu.memory_space<vmem>>, vector<1x1x18x128xbf16>
    %1 = vector.shape_cast %0 : vector<1x1x18x128xbf16> to vector<1x18x128xbf16>
    %c0_3 = arith.constant 0 : index
    %c0_4 = arith.constant 0 : index
    %c0_5 = arith.constant 0 : index
    %c0_6 = arith.constant 0 : index
    %2 = vector.load %arg2[%c0_3, %c0_4, %c0_5, %c0_6] : memref<1x8x18x128xbf16, #tpu.memory_space<vmem>>, vector<1x8x18x128xbf16>
    %3 = vector.shape_cast %2 : vector<1x8x18x128xbf16> to vector<8x18x128xbf16>
    %c0_7 = arith.constant 0 : index
    %c1 = arith.constant 1 : index
    %c0_8 = arith.constant 0 : index
    %c0_9 = arith.constant 0 : index
    %4 = vector.load %arg3[%c0_7, %c1, %c0_8, %c0_9] : memref<1x2x18x128xbf16, #tpu.memory_space<vmem>>, vector<1x1x18x128xbf16>
    %5 = vector.shape_cast %4 : vector<1x1x18x128xbf16> to vector<1x18x128xbf16>
    %6 = tpu.concatenate %1, %3, %5 in 0 : vector<1x18x128xbf16>, vector<8x18x128xbf16>, vector<1x18x128xbf16> -> vector<10x18x128xbf16>
    %cst = arith.constant 0.000000e+00 : f32
    %7 = vector.broadcast %cst : f32 to vector<128x128xf32>
    %c0_10 = arith.constant 0 : index
    %c0_11 = arith.constant 0 : index
    %8 = vector.load %arg8[%c0_10, %c0_11] : memref<128x128xf32, #tpu.memory_space<vmem>>, vector<128x128xf32>
    tpu.vector_store %arg8[%c0_10, %c0_11], %7 {strides = array<i32>} : memref<128x128xf32, #tpu.memory_space<vmem>>, vector<128x128xf32>,
    %9 = vector.extract_strided_slice %6 {offsets = [0, 0, 0], sizes = [8, 16, 128], strides = [1, 1, 1]} : vector<10x18x128xbf16> to vector<8x16x128xbf16>
    %10 = vector.shape_cast %9 : vector<8x16x128xbf16> to vector<128x128xbf16>
    %c0_12 = arith.constant 0 : index
    %c0_13 = arith.constant 0 : index
    %11 = vector.load %arg8[%c0_12, %c0_13] : memref<128x128xf32, #tpu.memory_space<vmem>>, vector<128x128xf32>
    %c0_14 = arith.constant 0 : index
    %c0_15 = arith.constant 0 : index
    %c0_16 = arith.constant 0 : index
    %c0_17 = arith.constant 0 : index
    %12 = vector.load %arg4[%c0_14, %c0_15, %c0_16, %c0_17] : memref<3x3x128x128xbf16, #tpu.memory_space<vmem>>, vector<1x1x128x128xbf16>
    %13 = vector.shape_cast %12 : vector<1x1x128x128xbf16> to vector<128x128xbf16>
    %cst_18 = arith.constant dense<0.000000e+00> : vector<128x128xf32>
    %14 = tpu.matmul %10, %13, %cst_18 {dimension_numbers = #tpu.dot_dimension_numbers<[1], [0], [0], [1], [0, 0, 1, 1], [], []>} : vector<128x128xbf16>, vector<128x128xbf16>, vector<128x128xf32> -> vector<128x128xf32>
    %15 = arith.addf %11, %14 : vector<128x128xf32>
    %c0_19 = arith.constant 0 : index
    %c0_20 = arith.constant 0 : index
    %16 = vector.load %arg8[%c0_19, %c0_20] : memref<128x128xf32, #tpu.memory_space<vmem>>, vector<128x128xf32>
    tpu.vector_store %arg8[%c0_19, %c0_20], %15 {strides = array<i32>} : memref<128x128xf32, #tpu.memory_space<vmem>>, vector<128x128xf32>,
    %17 = vector.extract_strided_slice %6 {offsets = [0, 1, 0], sizes = [8, 16, 128], strides = [1, 1, 1]} : vector<10x18x128xbf16> to vector<8x16x128xbf16>
    %18 = vector.shape_cast %17 : vector<8x16x128xbf16> to vector<128x128xbf16>
    %c0_21 = arith.constant 0 : index
    %c0_22 = arith.constant 0 : index
    %19 = vector.load %arg8[%c0_21, %c0_22] : memref<128x128xf32, #tpu.memory_space<vmem>>, vector<128x128xf32>
    %c0_23 = arith.constant 0 : index
    %c1_24 = arith.constant 1 : index
    %c0_25 = arith.constant 0 : index
    %c0_26 = arith.constant 0 : index
    %20 = vector.load %arg4[%c0_23, %c1_24, %c0_25, %c0_26] : memref<3x3x128x128xbf16, #tpu.memory_space<vmem>>, vector<1x1x128x128xbf16>
    %21 = vector.shape_cast %20 : vector<1x1x128x128xbf16> to vector<128x128xbf16>
    %cst_27 = arith.constant dense<0.000000e+00> : vector<128x128xf32>
    %22 = tpu.matmul %18, %21, %cst_27 {dimension_numbers = #tpu.dot_dimension_numbers<[1], [0], [0], [1], [0, 0, 1, 1], [], []>} : vector<128x128xbf16>, vector<128x128xbf16>, vector<128x128xf32> -> vector<128x128xf32>
    %23 = arith.addf %19, %22 : vector<128x128xf32>
    %c0_28 = arith.constant 0 : index
    %c0_29 = arith.constant 0 : index
    %24 = vector.load %arg8[%c0_28, %c0_29] : memref<128x128xf32, #tpu.memory_space<vmem>>, vector<128x128xf32>
    tpu.vector_store %arg8[%c0_28, %c0_29], %23 {strides = array<i32>} : memref<128x128xf32, #tpu.memory_space<vmem>>, vector<128x128xf32>,
    %25 = vector.extract_strided_slice %6 {offsets = [0, 2, 0], sizes = [8, 16, 128], strides = [1, 1, 1]} : vector<10x18x128xbf16> to vector<8x16x128xbf16>
    %26 = vector.shape_cast %25 : vector<8x16x128xbf16> to vector<128x128xbf16>
    %c0_30 = arith.constant 0 : index
    %c0_31 = arith.constant 0 : index
    %27 = vector.load %arg8[%c0_30, %c0_31] : memref<128x128xf32, #tpu.memory_space<vmem>>, vector<128x128xf32>
    %c0_32 = arith.constant 0 : index
    %c2 = arith.constant 2 : index
    %c0_33 = arith.constant 0 : index
    %c0_34 = arith.constant 0 : index
    %28 = vector.load %arg4[%c0_32, %c2, %c0_33, %c0_34] : memref<3x3x128x128xbf16, #tpu.memory_space<vmem>>, vector<1x1x128x128xbf16>
    %29 = vector.shape_cast %28 : vector<1x1x128x128xbf16> to vector<128x128xbf16>
    %cst_35 = arith.constant dense<0.000000e+00> : vector<128x128xf32>
    %30 = tpu.matmul %26, %29, %cst_35 {dimension_numbers = #tpu.dot_dimension_numbers<[1], [0], [0], [1], [0, 0, 1, 1], [], []>} : vector<128x128xbf16>, vector<128x128xbf16>, vector<128x128xf32> -> vector<128x128xf32>
    %31 = arith.addf %27, %30 : vector<128x128xf32>
    %c0_36 = arith.constant 0 : index
    %c0_37 = arith.constant 0 : index
    %32 = vector.load %arg8[%c0_36, %c0_37] : memref<128x128xf32, #tpu.memory_space<vmem>>, vector<128x128xf32>
    tpu.vector_store %arg8[%c0_36, %c0_37], %31 {strides = array<i32>} : memref<128x128xf32, #tpu.memory_space<vmem>>, vector<128x128xf32>,
    %33 = vector.extract_strided_slice %6 {offsets = [1, 0, 0], sizes = [8, 16, 128], strides = [1, 1, 1]} : vector<10x18x128xbf16> to vector<8x16x128xbf16>
    %34 = vector.shape_cast %33 : vector<8x16x128xbf16> to vector<128x128xbf16>
    %c0_38 = arith.constant 0 : index
    %c0_39 = arith.constant 0 : index
    %35 = vector.load %arg8[%c0_38, %c0_39] : memref<128x128xf32, #tpu.memory_space<vmem>>, vector<128x128xf32>
    %c1_40 = arith.constant 1 : index
    %c0_41 = arith.constant 0 : index
    %c0_42 = arith.constant 0 : index
    %c0_43 = arith.constant 0 : index
    %36 = vector.load %arg4[%c1_40, %c0_41, %c0_42, %c0_43] : memref<3x3x128x128xbf16, #tpu.memory_space<vmem>>, vector<1x1x128x128xbf16>
    %37 = vector.shape_cast %36 : vector<1x1x128x128xbf16> to vector<128x128xbf16>
    %cst_44 = arith.constant dense<0.000000e+00> : vector<128x128xf32>
    %38 = tpu.matmul %34, %37, %cst_44 {dimension_numbers = #tpu.dot_dimension_numbers<[1], [0], [0], [1], [0, 0, 1, 1], [], []>} : vector<128x128xbf16>, vector<128x128xbf16>, vector<128x128xf32> -> vector<128x128xf32>
    %39 = arith.addf %35, %38 : vector<128x128xf32>
    %c0_45 = arith.constant 0 : index
    %c0_46 = arith.constant 0 : index
    %40 = vector.load %arg8[%c0_45, %c0_46] : memref<128x128xf32, #tpu.memory_space<vmem>>, vector<128x128xf32>
    tpu.vector_store %arg8[%c0_45, %c0_46], %39 {strides = array<i32>} : memref<128x128xf32, #tpu.memory_space<vmem>>, vector<128x128xf32>,
    %41 = vector.extract_strided_slice %6 {offsets = [1, 1, 0], sizes = [8, 16, 128], strides = [1, 1, 1]} : vector<10x18x128xbf16> to vector<8x16x128xbf16>
    %42 = vector.shape_cast %41 : vector<8x16x128xbf16> to vector<128x128xbf16>
    %c0_47 = arith.constant 0 : index
    %c0_48 = arith.constant 0 : index
    %43 = vector.load %arg8[%c0_47, %c0_48] : memref<128x128xf32, #tpu.memory_space<vmem>>, vector<128x128xf32>
    %c1_49 = arith.constant 1 : index
    %c1_50 = arith.constant 1 : index
    %c0_51 = arith.constant 0 : index
    %c0_52 = arith.constant 0 : index
    %44 = vector.load %arg4[%c1_49, %c1_50, %c0_51, %c0_52] : memref<3x3x128x128xbf16, #tpu.memory_space<vmem>>, vector<1x1x128x128xbf16>
    %45 = vector.shape_cast %44 : vector<1x1x128x128xbf16> to vector<128x128xbf16>
    %cst_53 = arith.constant dense<0.000000e+00> : vector<128x128xf32>
    %46 = tpu.matmul %42, %45, %cst_53 {dimension_numbers = #tpu.dot_dimension_numbers<[1], [0], [0], [1], [0, 0, 1, 1], [], []>} : vector<128x128xbf16>, vector<128x128xbf16>, vector<128x128xf32> -> vector<128x128xf32>
    %47 = arith.addf %43, %46 : vector<128x128xf32>
    %c0_54 = arith.constant 0 : index
    %c0_55 = arith.constant 0 : index
    %48 = vector.load %arg8[%c0_54, %c0_55] : memref<128x128xf32, #tpu.memory_space<vmem>>, vector<128x128xf32>
    tpu.vector_store %arg8[%c0_54, %c0_55], %47 {strides = array<i32>} : memref<128x128xf32, #tpu.memory_space<vmem>>, vector<128x128xf32>,
    %49 = vector.extract_strided_slice %6 {offsets = [1, 2, 0], sizes = [8, 16, 128], strides = [1, 1, 1]} : vector<10x18x128xbf16> to vector<8x16x128xbf16>
    %50 = vector.shape_cast %49 : vector<8x16x128xbf16> to vector<128x128xbf16>
    %c0_56 = arith.constant 0 : index
    %c0_57 = arith.constant 0 : index
    %51 = vector.load %arg8[%c0_56, %c0_57] : memref<128x128xf32, #tpu.memory_space<vmem>>, vector<128x128xf32>
    %c1_58 = arith.constant 1 : index
    %c2_59 = arith.constant 2 : index
    %c0_60 = arith.constant 0 : index
    %c0_61 = arith.constant 0 : index
    %52 = vector.load %arg4[%c1_58, %c2_59, %c0_60, %c0_61] : memref<3x3x128x128xbf16, #tpu.memory_space<vmem>>, vector<1x1x128x128xbf16>
    %53 = vector.shape_cast %52 : vector<1x1x128x128xbf16> to vector<128x128xbf16>
    %cst_62 = arith.constant dense<0.000000e+00> : vector<128x128xf32>
    %54 = tpu.matmul %50, %53, %cst_62 {dimension_numbers = #tpu.dot_dimension_numbers<[1], [0], [0], [1], [0, 0, 1, 1], [], []>} : vector<128x128xbf16>, vector<128x128xbf16>, vector<128x128xf32> -> vector<128x128xf32>
    %55 = arith.addf %51, %54 : vector<128x128xf32>
    %c0_63 = arith.constant 0 : index
    %c0_64 = arith.constant 0 : index
    %56 = vector.load %arg8[%c0_63, %c0_64] : memref<128x128xf32, #tpu.memory_space<vmem>>, vector<128x128xf32>
    tpu.vector_store %arg8[%c0_63, %c0_64], %55 {strides = array<i32>} : memref<128x128xf32, #tpu.memory_space<vmem>>, vector<128x128xf32>,
    %57 = vector.extract_strided_slice %6 {offsets = [2, 0, 0], sizes = [8, 16, 128], strides = [1, 1, 1]} : vector<10x18x128xbf16> to vector<8x16x128xbf16>
    %58 = vector.shape_cast %57 : vector<8x16x128xbf16> to vector<128x128xbf16>
    %c0_65 = arith.constant 0 : index
    %c0_66 = arith.constant 0 : index
    %59 = vector.load %arg8[%c0_65, %c0_66] : memref<128x128xf32, #tpu.memory_space<vmem>>, vector<128x128xf32>
    %c2_67 = arith.constant 2 : index
    %c0_68 = arith.constant 0 : index
    %c0_69 = arith.constant 0 : index
    %c0_70 = arith.constant 0 : index
    %60 = vector.load %arg4[%c2_67, %c0_68, %c0_69, %c0_70] : memref<3x3x128x128xbf16, #tpu.memory_space<vmem>>, vector<1x1x128x128xbf16>
    %61 = vector.shape_cast %60 : vector<1x1x128x128xbf16> to vector<128x128xbf16>
    %cst_71 = arith.constant dense<0.000000e+00> : vector<128x128xf32>
    %62 = tpu.matmul %58, %61, %cst_71 {dimension_numbers = #tpu.dot_dimension_numbers<[1], [0], [0], [1], [0, 0, 1, 1], [], []>} : vector<128x128xbf16>, vector<128x128xbf16>, vector<128x128xf32> -> vector<128x128xf32>
    %63 = arith.addf %59, %62 : vector<128x128xf32>
    %c0_72 = arith.constant 0 : index
    %c0_73 = arith.constant 0 : index
    %64 = vector.load %arg8[%c0_72, %c0_73] : memref<128x128xf32, #tpu.memory_space<vmem>>, vector<128x128xf32>
    tpu.vector_store %arg8[%c0_72, %c0_73], %63 {strides = array<i32>} : memref<128x128xf32, #tpu.memory_space<vmem>>, vector<128x128xf32>,
    %65 = vector.extract_strided_slice %6 {offsets = [2, 1, 0], sizes = [8, 16, 128], strides = [1, 1, 1]} : vector<10x18x128xbf16> to vector<8x16x128xbf16>
    %66 = vector.shape_cast %65 : vector<8x16x128xbf16> to vector<128x128xbf16>
    %c0_74 = arith.constant 0 : index
    %c0_75 = arith.constant 0 : index
    %67 = vector.load %arg8[%c0_74, %c0_75] : memref<128x128xf32, #tpu.memory_space<vmem>>, vector<128x128xf32>
    %c2_76 = arith.constant 2 : index
    %c1_77 = arith.constant 1 : index
    %c0_78 = arith.constant 0 : index
    %c0_79 = arith.constant 0 : index
    %68 = vector.load %arg4[%c2_76, %c1_77, %c0_78, %c0_79] : memref<3x3x128x128xbf16, #tpu.memory_space<vmem>>, vector<1x1x128x128xbf16>
    %69 = vector.shape_cast %68 : vector<1x1x128x128xbf16> to vector<128x128xbf16>
    %cst_80 = arith.constant dense<0.000000e+00> : vector<128x128xf32>
    %70 = tpu.matmul %66, %69, %cst_80 {dimension_numbers = #tpu.dot_dimension_numbers<[1], [0], [0], [1], [0, 0, 1, 1], [], []>} : vector<128x128xbf16>, vector<128x128xbf16>, vector<128x128xf32> -> vector<128x128xf32>
    %71 = arith.addf %67, %70 : vector<128x128xf32>
    %c0_81 = arith.constant 0 : index
    %c0_82 = arith.constant 0 : index
    %72 = vector.load %arg8[%c0_81, %c0_82] : memref<128x128xf32, #tpu.memory_space<vmem>>, vector<128x128xf32>
    tpu.vector_store %arg8[%c0_81, %c0_82], %71 {strides = array<i32>} : memref<128x128xf32, #tpu.memory_space<vmem>>, vector<128x128xf32>,
    %73 = vector.extract_strided_slice %6 {offsets = [2, 2, 0], sizes = [8, 16, 128], strides = [1, 1, 1]} : vector<10x18x128xbf16> to vector<8x16x128xbf16>
    %74 = vector.shape_cast %73 : vector<8x16x128xbf16> to vector<128x128xbf16>
    %c0_83 = arith.constant 0 : index
    %c0_84 = arith.constant 0 : index
    %75 = vector.load %arg8[%c0_83, %c0_84] : memref<128x128xf32, #tpu.memory_space<vmem>>, vector<128x128xf32>
    %c2_85 = arith.constant 2 : index
    %c2_86 = arith.constant 2 : index
    %c0_87 = arith.constant 0 : index
    %c0_88 = arith.constant 0 : index
    %76 = vector.load %arg4[%c2_85, %c2_86, %c0_87, %c0_88] : memref<3x3x128x128xbf16, #tpu.memory_space<vmem>>, vector<1x1x128x128xbf16>
    %77 = vector.shape_cast %76 : vector<1x1x128x128xbf16> to vector<128x128xbf16>
    %cst_89 = arith.constant dense<0.000000e+00> : vector<128x128xf32>
    %78 = tpu.matmul %74, %77, %cst_89 {dimension_numbers = #tpu.dot_dimension_numbers<[1], [0], [0], [1], [0, 0, 1, 1], [], []>} : vector<128x128xbf16>, vector<128x128xbf16>, vector<128x128xf32> -> vector<128x128xf32>
    %79 = arith.addf %75, %78 : vector<128x128xf32>
    %c0_90 = arith.constant 0 : index
    %c0_91 = arith.constant 0 : index
    %80 = vector.load %arg8[%c0_90, %c0_91] : memref<128x128xf32, #tpu.memory_space<vmem>>, vector<128x128xf32>
    tpu.vector_store %arg8[%c0_90, %c0_91], %79 {strides = array<i32>} : memref<128x128xf32, #tpu.memory_space<vmem>>, vector<128x128xf32>,
    %c0_92 = arith.constant 0 : index
    %c0_93 = arith.constant 0 : index
    %81 = vector.load %arg8[%c0_92, %c0_93] : memref<128x128xf32, #tpu.memory_space<vmem>>, vector<128x128xf32>
    %c0_94 = arith.constant 0 : index
    %c0_95 = arith.constant 0 : index
    %82 = vector.load %arg5[%c0_94, %c0_95] : memref<1x128xf32, #tpu.memory_space<vmem>>, vector<1x128xf32>
    %83 = vector.shape_cast %82 : vector<1x128xf32> to vector<128xf32>
    %84 = vector.shape_cast %83 : vector<128xf32> to vector<1x128xf32>
    %85 = vector.broadcast %84 : vector<1x128xf32> to vector<128x128xf32>
    %86 = arith.mulf %81, %85 : vector<128x128xf32>
    %c0_96 = arith.constant 0 : index
    %c0_97 = arith.constant 0 : index
    %87 = vector.load %arg6[%c0_96, %c0_97] : memref<1x128xf32, #tpu.memory_space<vmem>>, vector<1x128xf32>
    %88 = vector.shape_cast %87 : vector<1x128xf32> to vector<128xf32>
    %89 = vector.shape_cast %88 : vector<128xf32> to vector<1x128xf32>
    %90 = vector.broadcast %89 : vector<1x128xf32> to vector<128x128xf32>
    %91 = arith.addf %86, %90 : vector<128x128xf32>
    %cst_98 = arith.constant 0.000000e+00 : f32
    %92 = vector.broadcast %cst_98 : f32 to vector<128x128xf32>
    %93 = arith.maximumf %91, %92 : vector<128x128xf32>
    %94 = vector.shape_cast %93 : vector<128x128xf32> to vector<8x16x128xf32>
    %c0_99 = arith.constant 0 : index
    %c0_100 = arith.constant 0 : index
    %c0_101 = arith.constant 0 : index
    %c0_102 = arith.constant 0 : index
    %95 = vector.load %arg7[%c0_99, %c0_100, %c0_101, %c0_102] : memref<1x8x16x128xf32, #tpu.memory_space<vmem>>, vector<1x8x16x128xf32>
    %96 = vector.shape_cast %95 : vector<1x8x16x128xf32> to vector<8x16x128xf32>
    %97 = vector.shape_cast %94 : vector<8x16x128xf32> to vector<1x8x16x128xf32>
    tpu.vector_store %arg7[%c0_99, %c0_100, %c0_101, %c0_102], %97 {strides = array<i32>} : memref<1x8x16x128xf32, #tpu.memory_space<vmem>>, vector<1x8x16x128xf32>,
    return
  }
  func.func @transform_0(%arg0: i32, %arg1: i32) -> (i32, i32, i32, i32) {
    %c0_i32 = arith.constant 0 : i32
    %c0_i32_0 = arith.constant 0 : i32
    %c0_i32_1 = arith.constant 0 : i32
    return %arg0, %arg1, %c0_i32, %c0_i32_0 : i32, i32, i32, i32
  }
  func.func @transform_1(%arg0: i32, %arg1: i32) -> (i32, i32, i32, i32) {
    %c0_i32 = arith.constant 0 : i32
    %c0_i32_0 = arith.constant 0 : i32
    %c0_i32_1 = arith.constant 0 : i32
    return %arg0, %arg1, %c0_i32, %c0_i32_0 : i32, i32, i32, i32
  }
  func.func @transform_2(%arg0: i32, %arg1: i32) -> (i32, i32, i32, i32) {
    %c0_i32 = arith.constant 0 : i32
    %c0_i32_0 = arith.constant 0 : i32
    %c0_i32_1 = arith.constant 0 : i32
    %c0_i32_2 = arith.constant 0 : i32
    %c0_i32_3 = arith.constant 0 : i32
    return %c0_i32, %c0_i32_0, %c0_i32_1, %c0_i32_2 : i32, i32, i32, i32
  }
  func.func @transform_3(%arg0: i32, %arg1: i32) -> (i32, i32) {
    %c0_i32 = arith.constant 0 : i32
    %c0_i32_0 = arith.constant 0 : i32
    %c0_i32_1 = arith.constant 0 : i32
    return %c0_i32, %c0_i32_0 : i32, i32
  }
  func.func @transform_4(%arg0: i32, %arg1: i32) -> (i32, i32) {
    %c0_i32 = arith.constant 0 : i32
    %c0_i32_0 = arith.constant 0 : i32
    %c0_i32_1 = arith.constant 0 : i32
    return %c0_i32, %c0_i32_0 : i32, i32
  }
  func.func @transform_5(%arg0: i32, %arg1: i32) -> (i32, i32, i32, i32) {
    %c0_i32 = arith.constant 0 : i32
    %c0_i32_0 = arith.constant 0 : i32
    %c0_i32_1 = arith.constant 0 : i32
    return %arg0, %arg1, %c0_i32, %c0_i32_0 : i32, i32, i32, i32
  }
}

</mosaic_0001>

<bundles_post_ra>
// kernel: doble_conv.2
= control target key start
LH: loop header
LB: loop body
LE: loop exit
PB: predicated region body
PF: predicated region fallthrough
CT: control target
= control target key end

     0   :  { %s3257_s18 = smov 0   ;;  %s3259_s19 = smov 0   ;;  %s4056_s0 = inlined_call_operand.vmem [shape: bf16[2,16,18,128], index: 0, kind: input, shape index: {}]   ;;  %s4057_s1 = inlined_call_operand.vmem [shape: bf16[2,4,18,128], index: 1, kind: input, shape index: {}]   ;;  %s4058_s2 = inlined_call_operand.vmem [shape: bf16[3,3,128,128], index: 2, kind: input, shape index: {}]   ;;  %s4059_s3 = inlined_call_operand.vmem [shape: f32[1,128], index: 3, kind: input, shape index: {}]   ;;  %s4060_s4 = inlined_call_operand.vmem [shape: f32[1,128], index: 4, kind: input, shape index: {}]   ;;  %s4061_s5 = inlined_call_operand.vmem [shape: bf16[2,16,16,128], index: 5, kind: output, shape index: {}]  }
   0x1   :  { %s3261_s20 = smov 0   ;;  %s3263_s21 = smov 0  }
   0x2   :  { %s3265_s22 = smov 0  }
   0x3 LB: > { %s24_s23 = sadd.s32 1, %s3217_s20  ;;  %s27_s24 = sadd.s32 1, %s3221_s21  ;;  %s3225_s22 = sphi %s3265_s22, %s15_s22   ;;  %s3221_s21 = sphi %s3263_s21, %s4069_s21   ;;  %s3217_s20 = sphi %s3261_s20, %s4068_s20   ;;  %s3213_s19 = sphi %s3259_s19, %s4067_s19   ;;  %s3209_s18 = sphi %s3257_s18, %s4066_s18  }
   0x4   : > { %p25_p0 = scmp.ge.s32.totalorder %s24_s23, 2  ;;  %p2506_p1 = scmp.ge.s32.totalorder %s3225_s22, 1 }
   0x5   : > { %p227_p2 = scmp.lt.s32.totalorder %s3225_s22, 5 }
   0x6   : > { %s4071_s23 = smov (%p25_p0, %s24_s23), 0  ;;  %s4073_s24 = smov (!%p25_p0, %s27_s24), %s3221_s21 }
   0x7   : > { %p228_p3 = pnand %p2506_p1, %p227_p2  ;;  %p29_p4 = scmp.ge.s32.totalorder %s4073_s24, 2 }
   0x8   : > { %s2507_s29 = sshll.u32 (!%p228_p3), %s3209_s18, 3  ;;  %p276_p5 = scmp.lt.s32.totalorder (!%p228_p3), %s3213_s19, 1 }
   0x9   : > { %s4075_s24 = smov (%p29_p4, %s4073_s24), 0  ;;  %231 = sbr.rel (%p228_p3) target bundleno = 473 (0x1d9), region = 40 }
   0xa   : > { %s2509_s7 = sshll.u32 (!%p228_p3), %s3209_s18, 1  ;;  %p278_p6 = scmp.lt.s32.totalorder (!%p228_p3), %s2507_s29, 15 }
   0xb   : > { %p289_p7 = scmp.lt.s32.totalorder (!%p228_p3), %s2509_s7, 3 }
   0xe   : > { %v3003_v0 = vld [vmem:[%s4058_s2 + $0x38] sm:$0xff]  ;;  %v3002_v1 = vld [vmem:[%s4058_s2 + $0x30] sm:$0xff]  ;;  %v3001_v2 = vld [vmem:[%s4058_s2 + $0x28] sm:$0xff]  ;;  %s4077_s19 = smov (!%p276_p5, %s3213_s19), 1  ;;  %s4079_s29 = smov (!%p278_p6, %s2507_s29), 15  ;;  %vm961_vm2 = vcmask 1042432  }
   0xf   : > { %3115 = vmatpush.bf16.msra.mxu1 %v3003_v0  ;;  %3116 = vmatpush.bf16.msra.mxu2 %v3003_v0  ;;  %v3000_v3 = vld [vmem:[%s4058_s2 + $0x20] sm:$0xff]  ;;  %s4081_s7 = smov (!%p289_p7, %s2509_s7), 3  ;;  %v2999_v4 = vld [vmem:[%s4058_s2 + $0x18] sm:$0xff]  ;;  %s3140_s12 = smul.u32 48, %s4077_s19  ;;  %v2998_v5 = vld [vmem:[%s4058_s2 + $0x10] sm:$0xff]  ;;  %vm962_vm3 = vcmask 1046532  }
  0x10   : > { %3117 = vmatpush.bf16.msra.mxu3 %v3003_v0  ;;  %483 = vmatpush.bf16.msra.mxu0 %v3003_v0  ;;  %s3139_s13 = smul.u32 3, %s4079_s29  ;;  %v2997_v6 = vld [vmem:[%s4058_s2 + $0x8] sm:$0xff]  ;;  %v2996_v7 = vld [vmem:[%s4058_s2] sm:$0xff]  ;;  %v3019_v8 = vld [vmem:[%s4058_s2 + $0xb8] sm:$0xff]  ;;  %vm564_vm0 = vsmask.f32 3328 }
  0x11   : > { %s3142_s14 = smul.u32 12, %s4077_s19  ;;  %v3011_v9 = vld [vmem:[%s4058_s2 + $0x78] sm:$0xff]  ;;  %v3018_v16 = vld [vmem:[%s4058_s2 + $0xb0] sm:$0xff]  ;;  %v3017_v24 = vld [vmem:[%s4058_s2 + $0xa8] sm:$0xff]  ;;  %vm565_vm1 = vsmask.f32 7440 }
  0x12   : > { %s3141_s15 = smul.u32 3, %s4081_s7  ;;  %s282_s18 = sadd.s32 %s3140_s12, %s3139_s13  ;;  %v3027_v14 = vld [vmem:[%s4058_s2 + $0xf8] sm:$0xff]  ;;  %v3010_v17 = vld [vmem:[%s4058_s2 + $0x70] sm:$0xff]  ;;  %v3009_v25 = vld [vmem:[%s4058_s2 + $0x68] sm:$0xff] }
  0x13   : > { %3118 = vmatpush.bf16.msra.mxu1 %v3002_v1  ;;  %3119 = vmatpush.bf16.msra.mxu2 %v3002_v1  ;;  %s2508_s28 = sshll.u32 %s282_s18, 2  ;;  %v3035_v15 = vld [vmem:[%s4058_s2 + $0x138] sm:$0xff]  ;;  %v3026_v19 = vld [vmem:[%s4058_s2 + $0xf0] sm:$0xff]  ;;  %v3025_v34 = vld [vmem:[%s4058_s2 + $0xe8] sm:$0xff]  ;;  %s2512_s16 = sshll.u32 %s4079_s29, 1 }
  0x14   : > { %3120 = vmatpush.bf16.msra.mxu3 %v3002_v1  ;;  %484 = vmatpush.bf16.msra.mxu0 %v3002_v1  ;;  %s293_s25 = sadd.s32 %s3142_s14, %s3141_s15  ;;  %s3329_s10 = scalar_lea.vmem %s4056_s0, %s2508_s28  ;;  %v3034_v21 = vld [vmem:[%s4058_s2 + $0x130] sm:$0xff]  ;;  %v3033_v35 = vld [vmem:[%s4058_s2 + $0x128] sm:$0xff]  ;;  %v3016_v36 = vld [vmem:[%s4058_s2 + $0xa0] sm:$0xff] }
  0x15   : > { %s2510_s30 = sshll.u32 %s293_s25, 2  ;;  %v3343_v10 = vld [vmem:[%s3329_s10 + $0xc] sm:$0xff]  ;;  %v3346_v11 = vld [vmem:[%s3329_s10 + $0x24] sm:$0xff]  ;;  %v3349_v12 = vld [vmem:[%s3329_s10 + $0x3c] sm:$0xff]  ;;  %s2513_s17 = sshll.u32 %s4077_s19, 5 }
  0x16   : > { %s3334_s13 = scalar_lea.vmem %s4057_s1, %s2510_s30  ;;  %v3380_v22 = vld [vmem:[%s3329_s10] sm:$0xf]  ;;  %v3383_v23 = vld [vmem:[%s3329_s10 + $0x4] sm:$0xf]  ;;  %v3425_v49 = vld [vmem:[%s3329_s10 + $0x8] sm:$0x1]  ;;  %s304_s18 = sadd.s32 %s2513_s17, %s2512_s16 }
  0x17   : > { %3121 = vmatpush.bf16.msra.mxu1 %v3001_v2  ;;  %3122 = vmatpush.bf16.msra.mxu2 %v3001_v2  ;;  %v2986_v13 = vld [vmem:[%s3334_s13] sm:$0xff]  ;;  %v592_v30 = vshrl.u32 %v3380_v22, 16  ;;  %v595_v31 = vshll.u32 %v3380_v22, 16  ;;  %v601_v32 = vshll.u32 %v3383_v23, 16  ;;  %v605_v33 = vshrl.u32 %v3383_v23, 16  ;;  %v3015_v50 = vld [vmem:[%s4058_s2 + $0x98] sm:$0xff]  ;;  %vm3472_vm4 = vmor %vm564_vm0, %vm565_vm1 }
  0x18   : > { %3123 = vmatpush.bf16.msra.mxu3 %v3001_v2  ;;  %485 = vmatpush.bf16.msra.mxu0 %v3001_v2  ;;  %v3367_v18 = vld [vmem:[%s3334_s13] sm:$0xf]  ;;  %v3374_v20 = vld [vmem:[%s3334_s13 + $0x4] sm:$0xf]  ;;  %v3414_v42 = vld [vmem:[%s3334_s13 + $0x8] sm:$0x1] }
  0x19   : > { %v568_v26 = vshrl.u32 %v3367_v18, 16  ;;  %v571_v27 = vshll.u32 %v3367_v18, 16  ;;  %v577_v28 = vshll.u32 %v3374_v20, 16  ;;  %v581_v29 = vshrl.u32 %v3374_v20, 16  ;;  %v3008_v37 = vld [vmem:[%s4058_s2 + $0x60] sm:$0xff]  ;;  %v3007_v51 = vld [vmem:[%s4058_s2 + $0x58] sm:$0xff]  ;;  %vm3485_vm5 = vmor %vm961_vm2, %vm962_vm3 }
  0x1a   : > { %v594_v43 = vrot.slane %v592_v30, 4  ;;  %v597_v44 = vrot.slane %v595_v31, 5  ;;  %v3416_v45 = vrot.slane %v601_v32, 5  ;;  %v607_v46 = vrot.slane %v605_v33, 4  ;;  %v3024_v47 = vld [vmem:[%s4058_s2 + $0xe0] sm:$0xff]  ;;  %v3434_v53 = vld [vmem:[%s3329_s10 + $0x18] sm:$0xff] }
  0x1b   : > { %3124 = vmatpush.bf16.msra.mxu1 %v3000_v3  ;;  %3125 = vmatpush.bf16.msra.mxu2 %v3000_v3  ;;  %v570_v38 = vrot.slane %v568_v26, 4  ;;  %v573_v39 = vrot.slane %v571_v27, 5  ;;  %v3411_v40 = vrot.slane %v577_v28, 5  ;;  %v583_v41 = vrot.slane %v581_v29, 4  ;;  %v3032_v48 = vld [vmem:[%s4058_s2 + $0x120] sm:$0xff]  ;;  %v3437_v54 = vld [vmem:[%s3329_s10 + $0x30] sm:$0xff] }
  0x1c   : > { %3126 = vmatpush.bf16.msra.mxu3 %v3000_v3  ;;  %486 = vmatpush.bf16.msra.mxu0 %v3000_v3  ;;  %v587_v56 = vshll.u32 %v3414_v42, 16  ;;  %v966_v57 = vrot.slane %v3374_v20, 5  ;;  %v3443_v58 = vld [vmem:[%s3329_s10 + $0x48] sm:$0xff]  ;;  %v3446_v59 = vld [vmem:[%s3329_s10] sm:$0xff]  ;;  %v598_v60 = vor.u32 %v597_v44, %v594_v43  ;;  %v608_v61 = vor.u32 %v607_v46, %v3416_v45  ;;  %v3023_v63 = vld [vmem:[%s4058_s2 + $0xd8] sm:$0xff]  ;;  %s2514_s25 = sshll.u32 %s304_s18, 2 }
  0x1d   : > { %v574_v52 = vor.u32 %v573_v39, %v570_v38  ;;  %v584_v55 = vor.u32 %v583_v41, %v3411_v40  ;;  %v611_v62 = vshll.u32 %v3425_v49, 16  ;;  %v3031_v0 = vld [vmem:[%s4058_s2 + $0x118] sm:$0xff]  ;;  %v3014_v1 = vld [vmem:[%s4058_s2 + $0x90] sm:$0xff]  ;;  %v3005_v20 = vld [vmem:[%s4058_s2 + $0x48] sm:$0xff]  ;;  %s3990_s26 = scalar_lea.vmem %s4061_s5, %s2514_s25 }
  0x1e   : > { %v3006_v2 = vld [vmem:[%s4058_s2 + $0x50] sm:$0xff]  ;;  %v3021_v31 = vld [vmem:[%s4058_s2 + $0xc8] sm:$0xff]  ;;  %v3004_v38 = vld [vmem:[%s4058_s2 + $0x40] sm:$0xff] }
  0x1f   : > { %3127 = vmatpush.bf16.msra.mxu1 %v2999_v4  ;;  %3128 = vmatpush.bf16.msra.mxu2 %v2999_v4  ;;  %v575_v3 = vrot.slane %v574_v52, 4  ;;  %v3029_v32 = vld [vmem:[%s4058_s2 + $0x108] sm:$0xff]  ;;  %v3051_v43 = vld [vmem:[%s4058_s2 + $0x1b8] sm:$0xff] }
  0x20   : > { %3129 = vmatpush.bf16.msra.mxu3 %v2999_v4  ;;  %487 = vmatpush.bf16.msra.mxu0 %v2999_v4  ;;  %v585_v4 = vrot.slane %v584_v55, 4  ;;  %v3043_v44 = vld [vmem:[%s4058_s2 + $0x178] sm:$0xff] }
  0x23   : > { %3130 = vmatpush.bf16.msra.mxu1 %v2998_v5  ;;  %3131 = vmatpush.bf16.msra.mxu2 %v2998_v5 }
  0x24   : > { %3132 = vmatpush.bf16.msra.mxu3 %v2998_v5  ;;  %488 = vmatpush.bf16.msra.mxu0 %v2998_v5  ;;  %v589_v5 = vrot.slane %v587_v56, 5  ;;  %v3059_v56 = vld [vmem:[%s4058_s2 + $0x1f8] sm:$0xff] }
  0x26   : > { %v590_v26 = vsel %vm3472_vm4, %v585_v4, %v589_v5  ;;  %v2631_v5 = vrot.slane %v3380_v22, 9 }
  0x27   : > { %3133 = vmatpush.bf16.msra.mxu1 %v2997_v6  ;;  %3134 = vmatpush.bf16.msra.mxu2 %v2997_v6 }
  0x28   : > { %3135 = vmatpush.bf16.msra.mxu3 %v2997_v6  ;;  %489 = vmatpush.bf16.msra.mxu0 %v2997_v6  ;;  %v2630_v6 = vrot.slane %v3367_v18, 9  ;;  %v3013_v18 = vld [vmem:[%s4058_s2 + $0x88] sm:$0xff] }
  0x2a   : > { %v967_v27 = vsel %vm3485_vm5, %v2630_v6, %v966_v57 }
  0x2b   : > { %3136 = vmatpush.bf16.msra.mxu1 %v2996_v7  ;;  %3137 = vmatpush.bf16.msra.mxu2 %v2996_v7  ;;  %v1053_v41 = vunpack.c.l.b16 %v967_v27 }
  0x2c   : > { %3138 = vmatpush.bf16.msra.mxu3 %v2996_v7  ;;  %490 = vmatpush.bf16.msra.mxu0 %v2996_v7  ;;  %v968_v7 = vrot.slane %v966_v57, 4  ;;  %v3067_v57 = vld [vmem:[%s4058_s2 + $0x238] sm:$0xff] }
  0x2e   : > { %501 = vmatmul.bf16.vlgmr.msra.gmra.mxu1 %v3343_v10  ;;  %511 = vmatmul.bf16.vlgmr.msra.gmra.mxu2 %v3346_v11 }
  0x2f   : > { %1133 = vmatpush.bf16.msrb.mxu2 %v3019_v8  ;;  %872 = vmatpush.bf16.msrb.mxu1 %v3011_v9  ;;  %v3022_v8 = vld [vmem:[%s4058_s2 + $0xd0] sm:$0xff] }
  0x30   : > { %521 = vmatmul.bf16.vlgmr.msra.gmra.mxu3 %v3349_v12  ;;  %491 = vmatmul.bf16.vlgmr.msra.gmra.mxu0 %v2986_v13  ;;  %v969_v13 = vrot.slane %v3414_v42, 5 }
  0x31   : > { %1301 = vmatpush.bf16.msrb.mxu3 %v3027_v14  ;;  %1491 = vmatpush.bf16.msrb.mxu0 %v3035_v15  ;;  %v599_v14 = vrot.slane %v598_v60, 4  ;;  %v609_v15 = vrot.slane %v608_v61, 4  ;;  %v973_v60 = vrot.slane %v3383_v23, 5  ;;  %v3548_v61 = vld [vmem:[%s3329_s10 + $0x14] sm:$0x1] }
  0x32   : > { %v970_v28 = vsel %vm3485_vm5, %v968_v7, %v969_v13  ;;  %v635_v4 = vshll.u32 %v3548_v61, 16  ;;  %v3042_v23 = vld [vmem:[%s4058_s2 + $0x170] sm:$0xff]  ;;  %v976_v7 = vrot.slane %v3425_v49, 5 }
  0x33   : > { %1134 = vmatpush.bf16.msrb.mxu2 %v3018_v16  ;;  %873 = vmatpush.bf16.msrb.mxu1 %v3010_v17  ;;  %v613_v16 = vrot.slane %v611_v62, 5  ;;  %v3030_v17 = vld [vmem:[%s4058_s2 + $0x110] sm:$0xff]  ;;  %v604_v29 = vsel %vm3472_vm4, %v599_v14, %v3416_v45  ;;  %v1054_v42 = vunpack.c.l.b16 %v970_v28  ;;  %v975_v6 = vrot.slane %v973_v60, 4  ;;  %v3567_v14 = vld [vmem:[%s3329_s10 + $0x18] sm:$0xf] }
  0x34   : > { %v794_v45 = vunpack.c.l.b16 %v604_v29  ;;  %v3066_v13 = vld [vmem:[%s4058_s2 + $0x230] sm:$0xff]  ;;  %v640_v27 = vshrl.u32 %v3567_v14, 16  ;;  %v643_v28 = vshll.u32 %v3567_v14, 16 }
  0x35   : > { %1302 = vmatpush.bf16.msrb.mxu3 %v3026_v19  ;;  %1492 = vmatpush.bf16.msrb.mxu0 %v3034_v21  ;;  %v3493_v21 = vld [vmem:[%s3329_s10 + $0xc] sm:$0xf]  ;;  %v614_v30 = vsel %vm3472_vm4, %v609_v15, %v613_v16  ;;  %v3570_v15 = vld [vmem:[%s3329_s10 + $0x1c] sm:$0xf]  ;;  %v637_v16 = vrot.slane %v635_v4, 5 }
  0x36   : > { %v616_v33 = vshrl.u32 %v3493_v21, 16  ;;  %v795_v46 = vunpack.c.l.b16 %v614_v30  ;;  %v649_v29 = vshll.u32 %v3570_v15, 16  ;;  %v653_v30 = vshrl.u32 %v3570_v15, 16 }
  0x37   : > { %1135 = vmatpush.bf16.msrb.mxu2 %v3017_v24  ;;  %874 = vmatpush.bf16.msrb.mxu1 %v3009_v25  ;;  %v3496_v24 = vld [vmem:[%s3329_s10 + $0x10] sm:$0xf]  ;;  %v580_v25 = vsel %vm3472_vm4, %v575_v3, %v3411_v40  ;;  %v793_v40 = vunpack.c.l.b16 %v590_v26  ;;  %v3065_v26 = vld [vmem:[%s4058_s2 + $0x228] sm:$0xff] }
  0x38   : > { %v792_v39 = vunpack.c.l.b16 %v580_v25  ;;  %v3057_v25 = vld [vmem:[%s4058_s2 + $0x1e8] sm:$0xff] }
  0x39   : > { %1303 = vmatpush.bf16.msrb.mxu3 %v3025_v34  ;;  %1493 = vmatpush.bf16.msrb.mxu0 %v3033_v35  ;;  %v619_v34 = vshll.u32 %v3493_v21, 16  ;;  %v625_v35 = vshll.u32 %v3496_v24, 16 }
  0x3a   : > { %v808_v62 = vpack.c.b16 %v793_v40, %v792_v39 }
  0x3b   : > { %1136 = vmatpush.bf16.msrb.mxu2 %v3016_v36  ;;  %875 = vmatpush.bf16.msrb.mxu1 %v3008_v37  ;;  %v629_v36 = vshrl.u32 %v3496_v24, 16  ;;  %v3012_v37 = vld [vmem:[%s4058_s2 + $0x80] sm:$0xff]  ;;  %v627_v52 = vrot.slane %v625_v35, 5  ;;  %v642_v35 = vrot.slane %v640_v27, 4 }
  0x3d   : > { %1304 = vmatpush.bf16.msrb.mxu3 %v3024_v47  ;;  %1494 = vmatpush.bf16.msrb.mxu0 %v3032_v48  ;;  %v3020_v47 = vld [vmem:[%s4058_s2 + $0xc0] sm:$0xff]  ;;  %v631_v55 = vrot.slane %v629_v36, 4  ;;  %v645_v36 = vrot.slane %v643_v28, 5 }
  0x3e   : > { %506 = vmatmul.bf16.gmra.mxu1 %v3434_v53  ;;  %516 = vmatmul.bf16.gmra.mxu2 %v3437_v54  ;;  %v3028_v48 = vld [vmem:[%s4058_s2 + $0x100] sm:$0xff] }
  0x3f   : > { %1137 = vmatpush.bf16.msrb.mxu2 %v3015_v50  ;;  %876 = vmatpush.bf16.msrb.mxu1 %v3007_v51  ;;  %v618_v50 = vrot.slane %v616_v33, 4  ;;  %v621_v51 = vrot.slane %v619_v34, 5  ;;  %v632_v3 = vor.u32 %v631_v55, %v627_v52 }
  0x40   : > { %526 = vmatmul.bf16.gmra.mxu3 %v3443_v58  ;;  %496 = vmatmul.bf16.gmra.mxu0 %v3446_v59 }
  0x41   : > { %1305 = vmatpush.bf16.msrb.mxu3 %v3023_v63  ;;  %1495 = vmatpush.bf16.msrb.mxu0 %v3031_v0  ;;  %v1069_v63 = vpack.c.b16 %v1054_v42, %v1053_v41  ;;  %v809_v0 = vpack.c.b16 %v795_v46, %v794_v45  ;;  %v633_v49 = vrot.slane %v632_v3, 4  ;;  %v3597_v41 = vld [vmem:[%s3329_s10 + $0x20] sm:$0x1]  ;;  %v980_v42 = vrot.slane %v3496_v24, 5 }
  0x42   : > { %v659_v46 = vshll.u32 %v3597_v41, 16 }
  0x43   : > { %1138 = vmatpush.bf16.msrb.mxu2 %v3014_v1  ;;  %877 = vmatpush.bf16.msrb.mxu1 %v3006_v2  ;;  %v3050_v1 = vld [vmem:[%s4058_s2 + $0x1b0] sm:$0xff]  ;;  %v622_v2 = vor.u32 %v621_v51, %v618_v50  ;;  %v982_v50 = vrot.slane %v980_v42, 4  ;;  %v983_v51 = vrot.slane %v3548_v61, 5  ;;  %v3623_v61 = vld [vmem:[%s3329_s10 + $0x28] sm:$0xf] }
  0x44   : > { %v661_v55 = vrot.slane %v659_v46, 5 }
  0x45   : > { %1306 = vmatpush.bf16.msrb.mxu3 %v3022_v8  ;;  %1496 = vmatpush.bf16.msrb.mxu0 %v3030_v17  ;;  %v3058_v8 = vld [vmem:[%s4058_s2 + $0x1f0] sm:$0xff]  ;;  %v623_v22 = vrot.slane %v622_v2, 4  ;;  %v3049_v17 = vld [vmem:[%s4058_s2 + $0x1a8] sm:$0xff] }
  0x47   : > { %1139 = vmatpush.bf16.msrb.mxu2 %v3013_v18  ;;  %878 = vmatpush.bf16.msrb.mxu1 %v3005_v20  ;;  %v3041_v18 = vld [vmem:[%s4058_s2 + $0x168] sm:$0xff]  ;;  %v977_v20 = vsel %vm3485_vm5, %v975_v6, %v976_v7 }
  0x48   : > { %v1056_v34 = vunpack.c.l.b16 %v977_v20  ;;  %v987_v20 = vrot.slane %v3570_v15, 5 }
  0x49   : > { %1307 = vmatpush.bf16.msrb.mxu3 %v3021_v31  ;;  %1497 = vmatpush.bf16.msrb.mxu0 %v3029_v32  ;;  %v628_v31 = vsel %vm3472_vm4, %v623_v22, %v627_v52  ;;  %v638_v32 = vsel %vm3472_vm4, %v633_v49, %v637_v16 }
  0x4a   : > { %v796_v39 = vunpack.c.l.b16 %v628_v31  ;;  %v797_v40 = vunpack.c.l.b16 %v638_v32  ;;  %v990_v31 = vrot.slane %v3597_v41, 5 }
  0x4b   : > { %1140 = vmatpush.bf16.msrb.mxu2 %v3012_v37  ;;  %879 = vmatpush.bf16.msrb.mxu1 %v3004_v38  ;;  %v651_v37 = vrot.slane %v649_v29, 5  ;;  %v655_v38 = vrot.slane %v653_v30, 4  ;;  %v2633_v29 = vrot.slane %v3567_v14, 9  ;;  %v989_v30 = vrot.slane %v987_v20, 4  ;;  %v3039_v14 = vld [vmem:[%s4058_s2 + $0x158] sm:$0xff] }
  0x4d   : > { %1308 = vmatpush.bf16.msrb.mxu3 %v3020_v47  ;;  %1498 = vmatpush.bf16.msrb.mxu0 %v3028_v48  ;;  %v656_v45 = vor.u32 %v655_v38, %v651_v37  ;;  %v3603_v47 = vpack.c.b16 %v797_v40, %v796_v39  ;;  %v2632_v48 = vrot.slane %v3493_v21, 9  ;;  %v3056_v21 = vld [vmem:[%s4058_s2 + $0x1e0] sm:$0xff]  ;;  %v3671_v38 = vld [vmem:[%s3329_s10 + $0x34] sm:$0xf]  ;;  %v988_v39 = vsel %vm3485_vm5, %v2633_v29, %v987_v20 }
  0x4e   : > { %880 = vmatmul.bf16.vlgmr.msrb.gmra.mxu1 %v808_v62  ;;  %1141 = vmatmul.bf16.vlgmr.msrb.gmra.mxu2 %v1069_v63  ;;  %v3064_v62 = vld [vmem:[%s4058_s2 + $0x220] sm:$0xff]  ;;  %v991_v40 = vsel %vm3485_vm5, %v989_v30, %v990_v31  ;;  %v697_v46 = vshll.u32 %v3671_v38, 16 }
  0x4f   : > { %1833 = vmatpush.bf16.msra.mxu2 %v3051_v43  ;;  %1665 = vmatpush.bf16.msra.mxu1 %v3043_v44  ;;  %v646_v44 = vor.u32 %v645_v36, %v642_v35  ;;  %v657_v24 = vrot.slane %v656_v45, 4  ;;  %v981_v63 = vsel %vm3485_vm5, %v2632_v48, %v980_v42  ;;  %v3055_v35 = vld [vmem:[%s4058_s2 + $0x1d8] sm:$0xff]  ;;  %v701_v48 = vshrl.u32 %v3671_v38, 16 }
  0x50   : > { %1309 = vmatmul.bf16.vlgmr.msrb.gmra.mxu3 %v3446_v59  ;;  %1499 = vmatmul.bf16.vlgmr.msrb.gmra.mxu0 %v809_v0  ;;  %v974_v59 = vsel %vm3485_vm5, %v2631_v5, %v973_v60  ;;  %v3620_v60 = vld [vmem:[%s3329_s10 + $0x24] sm:$0xf]  ;;  %v677_v5 = vshrl.u32 %v3623_v61, 16  ;;  %v1057_v6 = vunpack.c.l.b16 %v981_v63  ;;  %v3063_v36 = vld [vmem:[%s4058_s2 + $0x218] sm:$0xff] }
  0x51   : > { %2023 = vmatpush.bf16.msra.mxu3 %v3059_v56  ;;  %2197 = vmatpush.bf16.msra.mxu0 %v3067_v57  ;;  %v1055_v33 = vunpack.c.l.b16 %v974_v59  ;;  %v647_v52 = vrot.slane %v646_v44, 4  ;;  %v3048_v56 = vld [vmem:[%s4058_s2 + $0x1a0] sm:$0xff]  ;;  %v662_v2 = vsel %vm3472_vm4, %v657_v24, %v661_v55  ;;  %v664_v3 = vshrl.u32 %v3620_v60, 16  ;;  %v3687_v63 = vld [vmem:[%s3329_s10 + $0x38] sm:$0x1] }
  0x52   : > { %v3040_v57 = vld [vmem:[%s4058_s2 + $0x160] sm:$0xff]  ;;  %v667_v4 = vshll.u32 %v3620_v60, 16 }
  0x53   : > { %1834 = vmatpush.bf16.msra.mxu2 %v3050_v1  ;;  %1666 = vmatpush.bf16.msra.mxu1 %v3042_v23  ;;  %v3600_v43 = vpack.c.b16 %v1056_v34, %v1055_v33  ;;  %v652_v1 = vsel %vm3472_vm4, %v647_v52, %v651_v37  ;;  %v673_v23 = vshll.u32 %v3623_v61, 16  ;;  %v666_v22 = vrot.slane %v664_v3, 4  ;;  %v3047_v34 = vld [vmem:[%s4058_s2 + $0x198] sm:$0xff]  ;;  %v3668_v37 = vld [vmem:[%s3329_s10 + $0x30] sm:$0xf] }
  0x54   : > { %v669_v49 = vrot.slane %v667_v4, 5  ;;  %v688_v44 = vshrl.u32 %v3668_v37, 16  ;;  %v691_v45 = vshll.u32 %v3668_v37, 16  ;;  %v707_v4 = vshll.u32 %v3687_v63, 16 }
  0x55   : > { %2024 = vmatpush.bf16.msra.mxu3 %v3058_v8  ;;  %2198 = vmatpush.bf16.msra.mxu0 %v3066_v13  ;;  %v798_v8 = vunpack.c.l.b16 %v652_v1  ;;  %v799_v13 = vunpack.c.l.b16 %v662_v2  ;;  %v675_v16 = vrot.slane %v673_v23, 5  ;;  %v2634_v23 = vrot.slane %v3620_v60, 9  ;;  %v3054_v60 = vld [vmem:[%s4058_s2 + $0x1d0] sm:$0xff] }
  0x56   : > { %v690_v55 = vrot.slane %v688_v44, 4 }
  0x57   : > { %1835 = vmatpush.bf16.msra.mxu2 %v3049_v17  ;;  %1667 = vmatpush.bf16.msra.mxu1 %v3041_v18  ;;  %v679_v17 = vrot.slane %v677_v5, 4  ;;  %v3641_v18 = vld [vmem:[%s3329_s10 + $0x2c] sm:$0x1] }
  0x58   : > { %v683_v28 = vshll.u32 %v3641_v18, 16 }
  0x59   : > { %2025 = vmatpush.bf16.msra.mxu3 %v3057_v25  ;;  %2199 = vmatpush.bf16.msra.mxu0 %v3065_v26  ;;  %v3646_v25 = vpack.c.b16 %v799_v13, %v798_v8  ;;  %v670_v26 = vor.u32 %v669_v49, %v666_v22  ;;  %v680_v27 = vor.u32 %v679_v17, %v675_v16  ;;  %v3046_v8 = vld [vmem:[%s4058_s2 + $0x190] sm:$0xff] }
  0x5a   : > { %v685_v33 = vrot.slane %v683_v28, 5  ;;  %v3038_v13 = vld [vmem:[%s4058_s2 + $0x150] sm:$0xff] }
  0x5b   : > { %1836 = vmatpush.bf16.msra.mxu2 %v3048_v56  ;;  %1668 = vmatpush.bf16.msra.mxu1 %v3040_v57  ;;  %v671_v15 = vrot.slane %v670_v26, 4  ;;  %v681_v32 = vrot.slane %v680_v27, 4  ;;  %v693_v56 = vrot.slane %v691_v45, 5  ;;  %v703_v57 = vrot.slane %v701_v48, 4 }
  0x5c   : > { %v2635_v48 = vrot.slane %v3668_v37, 9  ;;  %v3053_v37 = vld [vmem:[%s4058_s2 + $0x1c8] sm:$0xff] }
  0x5d   : > { %2026 = vmatpush.bf16.msra.mxu3 %v3056_v21  ;;  %2200 = vmatpush.bf16.msra.mxu0 %v3064_v62  ;;  %v676_v41 = vsel %vm3472_vm4, %v671_v15, %v675_v16  ;;  %v686_v42 = vsel %vm3472_vm4, %v681_v32, %v685_v33  ;;  %v699_v21 = vrot.slane %v697_v46, 5  ;;  %v994_v62 = vrot.slane %v3623_v61, 5  ;;  %v3699_v61 = vld [vmem:[%s3329_s10 + $0x3c] sm:$0xf] }
  0x5e   : > { %885 = vmatmul.bf16.gmra.mxu1 %v809_v0  ;;  %1146 = vmatmul.bf16.gmra.mxu2 %v3600_v43  ;;  %v984_v0 = vsel %vm3485_vm5, %v982_v50, %v983_v51  ;;  %v1059_v50 = vunpack.c.l.b16 %v988_v39  ;;  %v1060_v51 = vunpack.c.l.b16 %v991_v40  ;;  %v800_v52 = vunpack.c.l.b16 %v676_v41  ;;  %v3731_v39 = vld [vmem:[%s3329_s10 + $0x44] sm:$0x1] }
  0x5f   : > { %v1058_v7 = vunpack.c.l.b16 %v984_v0  ;;  %1837 = vmatpush.bf16.msra.mxu2 %v3047_v34  ;;  %1669 = vmatpush.bf16.msra.mxu1 %v3039_v14  ;;  %v801_v24 = vunpack.c.l.b16 %v686_v42  ;;  %v694_v2 = vor.u32 %v693_v56, %v690_v55  ;;  %v704_v3 = vor.u32 %v703_v57, %v699_v21  ;;  %v3045_v55 = vld [vmem:[%s4058_s2 + $0x188] sm:$0xff] }
  0x60   : > { %1314 = vmatmul.bf16.gmra.mxu3 %v3343_v10  ;;  %1504 = vmatmul.bf16.gmra.mxu0 %v3603_v47  ;;  %v3689_v0 = vpack.c.b16 %v1060_v51, %v1059_v50  ;;  %v996_v5 = vrot.slane %v994_v62, 4  ;;  %v709_v16 = vrot.slane %v707_v4, 5  ;;  %v995_v17 = vsel %vm3485_vm5, %v2634_v23, %v994_v62  ;;  %v3752_v56 = vld [vmem:[%s3329_s10 + $0x48] sm:$0xf] }
  0x61   : > { %v3643_v59 = vpack.c.b16 %v1058_v7, %v1057_v6  ;;  %2027 = vmatpush.bf16.msra.mxu3 %v3055_v35  ;;  %2201 = vmatpush.bf16.msra.mxu0 %v3063_v36  ;;  %v3691_v1 = vpack.c.b16 %v801_v24, %v800_v52  ;;  %v997_v6 = vrot.slane %v3641_v18, 5  ;;  %v3702_v7 = vld [vmem:[%s3329_s10 + $0x40] sm:$0xf]  ;;  %v695_v22 = vrot.slane %v694_v2, 4 }
  0x62   : > { %v705_v49 = vrot.slane %v704_v3, 4  ;;  %v712_v20 = vshrl.u32 %v3699_v61, 16  ;;  %v715_v26 = vshll.u32 %v3699_v61, 16  ;;  %v721_v27 = vshll.u32 %v3702_v7, 16  ;;  %v3037_v3 = vld [vmem:[%s4058_s2 + $0x148] sm:$0xff] }
  0x63   : > { %v998_v18 = vsel %vm3485_vm5, %v996_v5, %v997_v6  ;;  %1838 = vmatpush.bf16.msra.mxu2 %v3046_v8  ;;  %v725_v28 = vshrl.u32 %v3702_v7, 16  ;;  %1670 = vmatpush.bf16.msra.mxu1 %v3038_v13  ;;  %v700_v29 = vsel %vm3472_vm4, %v695_v22, %v699_v21  ;;  %v1061_v31 = vunpack.c.l.b16 %v995_v17  ;;  %v3755_v21 = vld [vmem:[%s3329_s10 + $0x4c] sm:$0xf] }
  0x64   : > { %v710_v30 = vsel %vm3472_vm4, %v705_v49, %v709_v16  ;;  %v1062_v15 = vunpack.c.l.b16 %v998_v18  ;;  %v714_v32 = vrot.slane %v712_v20, 4  ;;  %v717_v33 = vrot.slane %v715_v26, 5  ;;  %v3061_v8 = vld [vmem:[%s4058_s2 + $0x208] sm:$0xff]  ;;  %v3776_v20 = vld [vmem:[%s3329_s10 + $0x50] sm:$0x1] }
  0x65   : > { %2028 = vmatpush.bf16.msra.mxu3 %v3054_v60  ;;  %v723_v34 = vrot.slane %v721_v27, 5  ;;  %v727_v35 = vrot.slane %v725_v28, 4  ;;  %v802_v14 = vunpack.c.l.b16 %v700_v29  ;;  %v803_v36 = vunpack.c.l.b16 %v710_v30 }
  0x66   : > { %v1001_v40 = vrot.slane %v3671_v38, 5  ;;  %v3734_v41 = vpack.c.b16 %v1062_v15, %v1061_v31  ;;  %v718_v42 = vor.u32 %v717_v33, %v714_v32  ;;  %v731_v45 = vshll.u32 %v3731_v39, 16 }
  0x67   : > { %v728_v44 = vor.u32 %v727_v35, %v723_v34  ;;  %v3737_v46 = vpack.c.b16 %v803_v36, %v802_v14  ;;  %v1004_v51 = vrot.slane %v3687_v63, 5  ;;  %1839 = vmatpush.bf16.msra.mxu2 %v3045_v55  ;;  %v736_v4 = vshrl.u32 %v3752_v56, 16  ;;  %1671 = vmatpush.bf16.msra.mxu1 %v3037_v3  ;;  %v3044_v14 = vld [vmem:[%s4058_s2 + $0x180] sm:$0xff] }
  0x68   : > { %v1003_v50 = vrot.slane %v1001_v40, 4  ;;  %v719_v38 = vrot.slane %v718_v42, 4  ;;  %v733_v24 = vrot.slane %v731_v45, 5  ;;  %v1002_v57 = vsel %vm3485_vm5, %v2635_v48, %v1001_v40  ;;  %v3052_v36 = vld [vmem:[%s4058_s2 + $0x1c0] sm:$0xff]  ;;  %v3800_v40 = vld [vmem:[%s3329_s10 + $0x58] sm:$0xf] }
  0x69   : > { %v729_v52 = vrot.slane %v728_v44, 4  ;;  %2029 = vmatpush.bf16.msra.mxu3 %v3053_v37  ;;  %v739_v23 = vshll.u32 %v3752_v56, 16  ;;  %v745_v5 = vshll.u32 %v3755_v21, 16  ;;  %v749_v6 = vshrl.u32 %v3755_v21, 16 }
  0x6a   : > { %v1005_v62 = vsel %vm3485_vm5, %v1003_v50, %v1004_v51  ;;  %v724_v63 = vsel %vm3472_vm4, %v719_v38, %v723_v34  ;;  %v1063_v60 = vunpack.c.l.b16 %v1002_v57  ;;  %v738_v16 = vrot.slane %v736_v4, 4  ;;  %v3821_v4 = vld [vmem:[%s3329_s10 + $0x5c] sm:$0x1] }
  0x6b   : > { %v734_v2 = vsel %vm3472_vm4, %v729_v52, %v733_v24  ;;  %v1064_v13 = vunpack.c.l.b16 %v1005_v62  ;;  %v804_v22 = vunpack.c.l.b16 %v724_v63  ;;  %v747_v17 = vrot.slane %v745_v5, 5  ;;  %1840 = vmatpush.bf16.msra.mxu2 %v3044_v14  ;;  %v3060_v52 = vld [vmem:[%s4058_s2 + $0x200] sm:$0xff] }
  0x6c   : > { %v805_v49 = vunpack.c.l.b16 %v734_v2  ;;  %v751_v18 = vrot.slane %v749_v6, 4  ;;  %v1008_v27 = vrot.slane %v3702_v7, 5  ;;  %v755_v31 = vshll.u32 %v3776_v20, 16 }
  0x6d   : > { %v3778_v26 = vpack.c.b16 %v1064_v13, %v1063_v60  ;;  %v2636_v15 = vrot.slane %v3699_v61, 9  ;;  %v1011_v7 = vrot.slane %v3731_v39, 5  ;;  %v3797_v61 = vld [vmem:[%s3329_s10 + $0x54] sm:$0xf]  ;;  %2030 = vmatpush.bf16.msra.mxu3 %v3052_v36  ;;  %v1392_v51 = vshll.u32 %v3800_v40, 16 }
  0x6e   : > { %890 = vmatmul.bf16.gmra.mxu1 %v3603_v47  ;;  %1151 = vmatmul.bf16.gmra.mxu2 %v3643_v59  ;;  %v3781_v28 = vpack.c.b16 %v805_v49, %v804_v22  ;;  %v752_v30 = vor.u32 %v751_v18, %v747_v17  ;;  %v1010_v32 = vrot.slane %v1008_v27, 4  ;;  %v757_v35 = vrot.slane %v755_v31, 5 }
  0x6f   : > { %v1009_v39 = vsel %vm3485_vm5, %v2636_v15, %v1008_v27  ;;  %v1383_v48 = vshrl.u32 %v3797_v61, 16  ;;  %v1386_v50 = vshll.u32 %v3797_v61, 16  ;;  %v1396_v38 = vshrl.u32 %v3800_v40, 16 }
  0x70   : > { %1319 = vmatmul.bf16.gmra.mxu3 %v3434_v53  ;;  %1509 = vmatmul.bf16.gmra.mxu0 %v3646_v25  ;;  %v753_v34 = vrot.slane %v752_v30, 4  ;;  %v1012_v42 = vsel %vm3485_vm5, %v1010_v32, %v1011_v7  ;;  %v1065_v24 = vunpack.c.l.b16 %v1009_v39  ;;  %v1394_v2 = vrot.slane %v1392_v51, 5 }
  0x71   : > { %v1066_v55 = vunpack.c.l.b16 %v1012_v42  ;;  %v1385_v62 = vrot.slane %v1383_v48, 4  ;;  %v1388_v63 = vrot.slane %v1386_v50, 5  ;;  %v1398_v3 = vrot.slane %v1396_v38, 4 }
  0x72   : > { %v758_v45 = vsel %vm3472_vm4, %v753_v34, %v757_v35  ;;  %v1402_v49 = vshll.u32 %v3821_v4, 16 }
  0x73   : > { %v807_v57 = vunpack.c.l.b16 %v758_v45  ;;  %v1389_v13 = vor.u32 %v1388_v63, %v1385_v62  ;;  %v1399_v22 = vor.u32 %v1398_v3, %v1394_v2 }
  0x74   : > { %v1404_v27 = vrot.slane %v1402_v49, 5 }
  0x75   : > { %v1390_v18 = vrot.slane %v1389_v13, 4 }
  0x7e   : > { %895 = vmatmul.bf16.gmra.mxu1 %v3646_v25  ;;  %1156 = vmatmul.bf16.gmra.mxu2 %v3689_v0 }
  0x80   : > { %1324 = vmatmul.bf16.gmra.mxu3 %v3346_v11  ;;  %1514 = vmatmul.bf16.gmra.mxu0 %v3691_v1  ;;  %v3062_v11 = vld [vmem:[%s4058_s2 + $0x210] sm:$0xff] }
  0x81   : > { %2202 = vmatpush.bf16.msra.mxu0 %v3062_v11  ;;  %v741_v11 = vrot.slane %v739_v23, 5  ;;  %v3823_v23 = vpack.c.b16 %v1066_v55, %v1065_v24 }
  0x83   : > { %v742_v29 = vor.u32 %v741_v11, %v738_v16  ;;  %v2637_v16 = vrot.slane %v3752_v56, 9 }
  0x85   : > { %2203 = vmatpush.bf16.msra.mxu0 %v3061_v8  ;;  %v743_v33 = vrot.slane %v742_v29, 4  ;;  %v1015_v8 = vrot.slane %v3755_v21, 5  ;;  %v1400_v21 = vrot.slane %v1399_v22, 4 }
  0x87   : > { %v748_v44 = vsel %vm3472_vm4, %v743_v33, %v747_v17  ;;  %v1017_v11 = vrot.slane %v1015_v8, 4  ;;  %v1018_v17 = vrot.slane %v3776_v20, 5  ;;  %v1016_v15 = vsel %vm3485_vm5, %v2637_v16, %v1015_v8 }
  0x88   : > { %v806_v37 = vunpack.c.l.b16 %v748_v44  ;;  %v1395_v20 = vsel %vm3472_vm4, %v1390_v18, %v1394_v2  ;;  %v1405_v7 = vsel %vm3472_vm4, %v1400_v21, %v1404_v27  ;;  %v1067_v33 = vunpack.c.l.b16 %v1016_v15  ;;  %v3860_v44 = vld [vmem:[%s3329_s10 + $0x54] sm:$0xff] }
  0x89   : > { %2204 = vmatpush.bf16.msra.mxu0 %v3060_v52  ;;  %v1019_v32 = vsel %vm3485_vm5, %v1017_v11, %v1018_v17  ;;  %v1439_v35 = vunpack.c.l.b16 %v1395_v20  ;;  %v1440_v14 = vunpack.c.l.b16 %v1405_v7 }
  0x8a   : > { %v3827_v6 = vpack.c.b16 %v807_v57, %v806_v37  ;;  %v1068_v34 = vunpack.c.l.b16 %v1019_v32 }
  0x8b   : > { %v3862_v45 = vpack.c.b16 %v1440_v14, %v1439_v35 }
  0x8c   : > { %v3855_v39 = vpack.c.b16 %v1068_v34, %v1067_v33 }
  0x8e   : > { %900 = vmatmul.bf16.gmra.mxu1 %v3691_v1  ;;  %1161 = vmatmul.bf16.gmra.mxu2 %v3734_v41 }
  0x90   : > { %1329 = vmatmul.bf16.gmra.mxu3 %v3437_v54  ;;  %1519 = vmatmul.bf16.gmra.mxu0 %v3737_v46 }
  0x9e   : > { %905 = vmatmul.bf16.gmra.mxu1 %v3737_v46  ;;  %1166 = vmatmul.bf16.gmra.mxu2 %v3778_v26 }
  0xa0   : > { %1334 = vmatmul.bf16.gmra.mxu3 %v3349_v12  ;;  %1524 = vmatmul.bf16.gmra.mxu0 %v3781_v28  ;;  %v3036_v12 = vld [vmem:[%s4058_s2 + $0x140] sm:$0xff] }
  0xa1   : > { %1672 = vmatpush.bf16.msra.mxu1 %v3036_v12 }
  0xab   : > { %v3825_v5 = vpop.f32.mrf.mxu1 }
  0xad   : > { %v492_v60 = vpop.f32.mrf.mxu0 }
  0xae   : > { %910 = vmatmul.bf16.gmra.mxu1 %v3781_v28  ;;  %1171 = vmatmul.bf16.gmra.mxu2 %v3823_v23 }
  0xb0   : > { %1339 = vmatmul.bf16.gmra.mxu3 %v3443_v58  ;;  %1529 = vmatmul.bf16.gmra.mxu0 %v3827_v6 }
  0xb1   : > { %v3837_v29 = vpop.f32.mrf.mxu2 }
  0xb3   : > { %v3839_v30 = vpop.f32.mrf.mxu3  ;;  %v3841_v31 = vpop.f32.mrf.mxu1 }
  0xb5   : > { %v494_v56 = vpop.f32.mrf.mxu0 }
  0xb9   : > { %v3851_v36 = vpop.f32.mrf.mxu2 }
  0xbb   : > { %v3853_v12 = vpop.f32.mrf.mxu3  ;;  %v3857_v42 = vpop.f32.mrf.mxu1 }
  0xbd   : > { %v497_v48 = vpop.f32.mrf.mxu0 }
  0xbe   : > { %915 = vmatmul.bf16.gmra.mxu1 %v3827_v6  ;;  %1176 = vmatmul.bf16.gmra.mxu2 %v3855_v39 }
  0xc0   : > { %1344 = vmatmul.bf16.gmra.mxu3 %v3860_v44  ;;  %1534 = vmatmul.bf16.gmra.mxu0 %v3862_v45 }
  0xc1   : > { %v3868_v50 = vpop.f32.mrf.mxu2 }
  0xc3   : > { %v3870_v51 = vpop.f32.mrf.mxu3  ;;  %v3872_v38 = vpop.f32.mrf.mxu1 }
  0xc5   : > { %v499_v52 = vpop.f32.mrf.mxu0 }
  0xc9   : > { %v3874_v24 = vpop.f32.mrf.mxu2 }
  0xcb   : > { %v3876_v55 = vpop.f32.mrf.mxu3  ;;  %v881_v37 = vpop.f32.mrf.mxu1 }
  0xcc   : > { %v921_v57 = vadd.f32 %v881_v37, %v492_v60 }
  0xcd   : > { %v1500_v62 = vpop.f32.mrf.mxu0 }
  0xce   : > { %1673 = vmatmul.bf16.vlgmr.msra.gmra.mxu1 %v3600_v43  ;;  %1841 = vmatmul.bf16.vlgmr.msra.gmra.mxu2 %v3343_v10 }
  0xd0   : > { %2031 = vmatmul.bf16.vlgmr.msra.gmra.mxu3 %v3603_v47  ;;  %2205 = vmatmul.bf16.vlgmr.msra.gmra.mxu0 %v3643_v59 }
  0xd1   : > { %v1142_v63 = vpop.f32.mrf.mxu2 }
  0xd2   : > { %v1182_v2 = vadd.f32 %v1142_v63, %v921_v57  ;;  %v3185_v57 = vld [vmem:[%s3329_s10 + $0x24] sm:$0xff] }
  0xd3   : > { %v1310_v3 = vpop.f32.mrf.mxu3  ;;  %v883_v8 = vpop.f32.mrf.mxu1 }
  0xd4   : > { %v1350_v13 = vadd.f32 %v1310_v3, %v1182_v2  ;;  %v922_v22 = vadd.f32 %v883_v8, %v494_v56 }
  0xd5   : > { %v1502_v49 = vpop.f32.mrf.mxu0 }
  0xd6   : > { %v3882_v16 = vadd.f32 %v1500_v62, %v1350_v13 }
  0xd9   : > { %v1144_v11 = vpop.f32.mrf.mxu2 }
  0xda   : > { %v1183_v60 = vadd.f32 %v1144_v11, %v922_v22 }
  0xdb   : > { %v1312_v17 = vpop.f32.mrf.mxu3  ;;  %v886_v18 = vpop.f32.mrf.mxu1 }
  0xdc   : > { %v1351_v43 = vadd.f32 %v1312_v17, %v1183_v60  ;;  %v923_v21 = vadd.f32 %v886_v18, %v497_v48 }
  0xdd   : > { %v1505_v10 = vpop.f32.mrf.mxu0 }
  0xde   : > { %1678 = vmatmul.bf16.gmra.mxu1 %v3643_v59  ;;  %1846 = vmatmul.bf16.gmra.mxu2 %v3434_v53  ;;  %v3886_v47 = vadd.f32 %v1502_v49, %v1351_v43 }
  0xe0   : > { %2036 = vmatmul.bf16.gmra.mxu3 %v3646_v25  ;;  %2210 = vmatmul.bf16.gmra.mxu0 %v3689_v0 }
  0xe1   : > { %v1147_v27 = vpop.f32.mrf.mxu2 }
  0xe2   : > { %v1184_v15 = vadd.f32 %v1147_v27, %v923_v21 }
  0xe3   : > { %v1315_v32 = vpop.f32.mrf.mxu3  ;;  %v888_v56 = vpop.f32.mrf.mxu1 }
  0xe4   : > { %v1352_v20 = vadd.f32 %v1315_v32, %v1184_v15  ;;  %v924_v7 = vadd.f32 %v888_v56, %v499_v52 }
  0xe5   : > { %v1507_v33 = vpop.f32.mrf.mxu0 }
  0xe6   : > { %v3890_v34 = vadd.f32 %v1505_v10, %v1352_v20 }
  0xe9   : > { %v1149_v35 = vpop.f32.mrf.mxu2 }
  0xea   : > { %v1185_v59 = vadd.f32 %v1149_v35, %v924_v7 }
  0xeb   : > { %v1317_v14 = vpop.f32.mrf.mxu3  ;;  %v891_v53 = vpop.f32.mrf.mxu1 }
  0xec   : > { %v1353_v48 = vadd.f32 %v1317_v14, %v1185_v59  ;;  %v925_v37 = vadd.f32 %v891_v53, %v3825_v5 }
  0xed   : > { %v1510_v25 = vpop.f32.mrf.mxu0 }
  0xee   : > { %1683 = vmatmul.bf16.gmra.mxu1 %v3689_v0  ;;  %1851 = vmatmul.bf16.gmra.mxu2 %v3185_v57  ;;  %v3895_v62 = vadd.f32 %v1507_v33, %v1353_v48 }
  0xf0   : > { %2041 = vmatmul.bf16.gmra.mxu3 %v3691_v1  ;;  %2215 = vmatmul.bf16.gmra.mxu0 %v3734_v41 }
  0xf1   : > { %v1152_v52 = vpop.f32.mrf.mxu2 }
  0xf2   : > { %v1186_v63 = vadd.f32 %v1152_v52, %v925_v37 }
  0xf3   : > { %v1320_v2 = vpop.f32.mrf.mxu3  ;;  %v893_v3 = vpop.f32.mrf.mxu1 }
  0xf4   : > { %v1354_v8 = vadd.f32 %v1320_v2, %v1186_v63  ;;  %v926_v13 = vadd.f32 %v893_v3, %v3841_v31 }
  0xf5   : > { %v1512_v22 = vpop.f32.mrf.mxu0 }
  0xf6   : > { %v3900_v5 = vadd.f32 %v1510_v25, %v1354_v8 }
  0xf9   : > { %v1154_v49 = vpop.f32.mrf.mxu2 }
  0xfa   : > { %v1187_v0 = vadd.f32 %v1154_v49, %v926_v13 }
  0xfb   : > { %v1322_v11 = vpop.f32.mrf.mxu3  ;;  %v896_v60 = vpop.f32.mrf.mxu1 }
  0xfc   : > { %v1355_v17 = vadd.f32 %v1322_v11, %v1187_v0  ;;  %v927_v18 = vadd.f32 %v896_v60, %v3857_v42  ;;  %v1578_v0 = vrot.slane %v3821_v4, 5  ;;  %v2515_v11 = vld [vmem:[%s3334_s13 + $0xc] sm:$0xf]  ;;  %v2516_v60 = vld [vmem:[%s3334_s13 + $0x10] sm:$0xf] }
  0xfd   : > { %v1515_v1 = vpop.f32.mrf.mxu0 }
  0xfe   : > { %1688 = vmatmul.bf16.gmra.mxu1 %v3734_v41  ;;  %1856 = vmatmul.bf16.gmra.mxu2 %v3437_v54  ;;  %v3905_v43 = vadd.f32 %v1512_v22, %v1355_v17  ;;  %v2786_v22 = vrot.slane %v3797_v61, 9 }
 0x100   : > { %2046 = vmatmul.bf16.gmra.mxu3 %v3737_v46  ;;  %2220 = vmatmul.bf16.gmra.mxu0 %v3778_v26  ;;  %v3186_v46 = vld [vmem:[%s3329_s10 + $0x3c] sm:$0xff] }
 0x101   : > { %v1157_v31 = vpop.f32.mrf.mxu2 }
 0x102   : > { %v1188_v21 = vadd.f32 %v1157_v31, %v927_v18  ;;  %v1918_v31 = vshll.u32 %v2515_v11, 16 }
 0x103   : > { %v1325_v10 = vpop.f32.mrf.mxu3  ;;  %v898_v27 = vpop.f32.mrf.mxu1 }
 0x104   : > { %v1356_v15 = vadd.f32 %v1325_v10, %v1188_v21  ;;  %v928_v32 = vadd.f32 %v898_v27, %v3872_v38  ;;  %v1928_v21 = vshrl.u32 %v2516_v60, 16 }
 0x105   : > { %v1517_v42 = vpop.f32.mrf.mxu0 }
 0x106   : > { %v3910_v56 = vadd.f32 %v1515_v1, %v1356_v15  ;;  %v1915_v1 = vshrl.u32 %v2515_v11, 16 }
 0x109   : > { %v1159_v41 = vpop.f32.mrf.mxu2 }
 0x10a   : > { %v1189_v20 = vadd.f32 %v1159_v41, %v928_v32  ;;  %v1920_v41 = vrot.slane %v1918_v31, 5 }
 0x10b   : > { %v1327_v54 = vpop.f32.mrf.mxu3  ;;  %v901_v7 = vpop.f32.mrf.mxu1 }
 0x10c   : > { %v1357_v33 = vadd.f32 %v1327_v54, %v1189_v20  ;;  %v929_v38 = vadd.f32 %v901_v7, %v3837_v29  ;;  %v1930_v54 = vrot.slane %v1928_v21, 4 }
 0x10d   : > { %v1520_v35 = vpop.f32.mrf.mxu0 }
 0x10e   : > { %1693 = vmatmul.bf16.gmra.mxu1 %v3778_v26  ;;  %1861 = vmatmul.bf16.gmra.mxu2 %v3186_v46  ;;  %v3914_v59 = vadd.f32 %v1517_v42, %v1357_v33  ;;  %v1917_v42 = vrot.slane %v1915_v1, 4  ;;  %v2517_v33 = vld [vmem:[%s3334_s13 + $0x14] sm:$0x1] }
 0x110   : > { %2051 = vmatmul.bf16.gmra.mxu3 %v3781_v28  ;;  %2225 = vmatmul.bf16.gmra.mxu0 %v3823_v23  ;;  %v1575_v28 = vrot.slane %v3800_v40, 5 }
 0x111   : > { %v1162_v14 = vpop.f32.mrf.mxu2 }
 0x112   : > { %v1190_v53 = vadd.f32 %v1162_v14, %v929_v38  ;;  %v1577_v49 = vrot.slane %v1575_v28, 4 }
 0x113   : > { %v1330_v48 = vpop.f32.mrf.mxu3  ;;  %v903_v37 = vpop.f32.mrf.mxu1 }
 0x114   : > { %v1358_v25 = vadd.f32 %v1330_v48, %v1190_v53  ;;  %v930_v26 = vadd.f32 %v903_v37, %v3851_v36  ;;  %v1579_v61 = vsel %vm3485_vm5, %v1577_v49, %v1578_v0  ;;  %v1921_v48 = vor.u32 %v1920_v41, %v1917_v42 }
 0x115   : > { %v1522_v57 = vpop.f32.mrf.mxu0  ;;  %v1614_v15 = vunpack.c.l.b16 %v1579_v61 }
 0x116   : > { %v3919_v52 = vadd.f32 %v1520_v35, %v1358_v25  ;;  %v1934_v25 = vshll.u32 %v2517_v33, 16 }
 0x119   : > { %v1164_v63 = vpop.f32.mrf.mxu2 }
 0x11a   : > { %v1191_v2 = vadd.f32 %v1164_v63, %v930_v26  ;;  %v2107_v63 = vrot.slane %v2516_v60, 5 }
 0x11b   : > { %v1332_v3 = vpop.f32.mrf.mxu3  ;;  %v906_v8 = vpop.f32.mrf.mxu1 }
 0x11c   : > { %v1359_v13 = vadd.f32 %v1332_v3, %v1191_v2  ;;  %v931_v40 = vadd.f32 %v906_v8, %v3868_v50 }
 0x11d   : > { %v1525_v29 = vpop.f32.mrf.mxu0 }
 0x11e   : > { %1698 = vmatmul.bf16.gmra.mxu1 %v3823_v23  ;;  %1866 = vmatmul.bf16.gmra.mxu2 %v3443_v58  ;;  %v3927_v36 = vadd.f32 %v1522_v57, %v1359_v13  ;;  %v1576_v58 = vsel %vm3485_vm5, %v2786_v22, %v1575_v28  ;;  %v1936_v28 = vrot.slane %v1934_v25, 5  ;;  %v2935_v13 = vrot.slane %v2515_v11, 9 }
 0x11f   : > { %v1613_v50 = vunpack.c.l.b16 %v1576_v58  ;;  %v2110_v22 = vrot.slane %v2517_v33, 5 }
 0x120   : > { %2056 = vmatmul.bf16.gmra.mxu3 %v3827_v6  ;;  %2230 = vmatmul.bf16.gmra.mxu0 %v3855_v39  ;;  %v1924_v6 = vshll.u32 %v2516_v60, 16 }
 0x121   : > { %v1167_v17 = vpop.f32.mrf.mxu2  ;;  %v1615_v53 = vpack.c.b16 %v1614_v15, %v1613_v50 }
 0x122   : > { %v1192_v18 = vadd.f32 %v1167_v17, %v931_v40  ;;  %v1926_v20 = vrot.slane %v1924_v6, 5 }
 0x123   : > { %v1335_v23 = vpop.f32.mrf.mxu3  ;;  %v908_v4 = vpop.f32.mrf.mxu1 }
 0x124   : > { %v1360_v10 = vadd.f32 %v1335_v23, %v1192_v18  ;;  %v932_v7 = vadd.f32 %v908_v4, %v3874_v24  ;;  %v1931_v37 = vor.u32 %v1930_v54, %v1926_v20  ;;  %v1922_v24 = vrot.slane %v1921_v48, 4 }
 0x125   : > { %v1527_v27 = vpop.f32.mrf.mxu0  ;;  %v2108_v18 = vsel %vm3485_vm5, %v2935_v13, %v2107_v63 }
 0x126   : > { %v3938_v32 = vadd.f32 %v1525_v29, %v1360_v10  ;;  %v1932_v3 = vrot.slane %v1931_v37, 4  ;;  %v2109_v29 = vrot.slane %v2107_v63, 4  ;;  %v2145_v61 = vunpack.c.l.b16 %v2108_v18  ;;  %v2995_v10 = vld [vmem:[%s3334_s13 + $0xc] sm:$0xff] }
 0x129   : > { %v1169_v35 = vpop.f32.mrf.mxu2 }
 0x12a   : > { %v1193_v46 = vadd.f32 %v1169_v35, %v932_v7 }
 0x12b   : > { %v1337_v38 = vpop.f32.mrf.mxu3  ;;  %v911_v14 = vpop.f32.mrf.mxu1 }
 0x12c   : > { %v1361_v57 = vadd.f32 %v1337_v38, %v1193_v46  ;;  %v933_v8 = vadd.f32 %v911_v14, %v3839_v30  ;;  %v2111_v30 = vsel %vm3485_vm5, %v2109_v29, %v2110_v22 }
 0x12d   : > { %v1530_v26 = vpop.f32.mrf.mxu0  ;;  %v2146_v4 = vunpack.c.l.b16 %v2111_v30 }
 0x12e   : > { %1703 = vmatmul.bf16.gmra.mxu1 %v3855_v39  ;;  %1871 = vmatmul.bf16.gmra.mxu2 %v3860_v44  ;;  %v3944_v2 = vadd.f32 %v1527_v27, %v1361_v57  ;;  %v1927_v39 = vsel %vm3472_vm4, %v1922_v24, %v1926_v20 }
 0x12f   : > { %v1971_v23 = vunpack.c.l.b16 %v1927_v39  ;;  %v2147_v50 = vpack.c.b16 %v2146_v4, %v2145_v61  ;;  %v3979_v39 = vld [vmem:[%s4060_s4] ss:$0 sm:$0xff] }
 0x130   : > { %2061 = vmatmul.bf16.gmra.mxu3 %v3862_v45  ;;  %2235 = vmatmul.bf16.gmra.mxu0 %v1615_v53  ;;  %v1937_v45 = vsel %vm3472_vm4, %v1932_v3, %v1936_v28 }
 0x131   : > { %v1172_v49 = vpop.f32.mrf.mxu2  ;;  %v1972_v58 = vunpack.c.l.b16 %v1937_v45 }
 0x132   : > { %v1194_v0 = vadd.f32 %v1172_v49, %v933_v8 }
 0x133   : > { %v1340_v40 = vpop.f32.mrf.mxu3  ;;  %v913_v60 = vpop.f32.mrf.mxu1  ;;  %v1973_v27 = vpack.c.b16 %v1972_v58, %v1971_v23 }
 0x134   : > { %v1362_v44 = vadd.f32 %v1340_v40, %v1194_v0  ;;  %v934_v1 = vadd.f32 %v913_v60, %v3853_v12 }
 0x135   : > { %v1532_v17 = vpop.f32.mrf.mxu0 }
 0x136   : > { %v3956_v11 = vadd.f32 %v1530_v26, %v1362_v44 }
 0x139   : > { %v1174_v31 = vpop.f32.mrf.mxu2 }
 0x13a   : > { %v1195_v6 = vadd.f32 %v1174_v31, %v934_v1 }
 0x13b   : > { %v1342_v21 = vpop.f32.mrf.mxu3  ;;  %v916_v9 = vpop.f32.mrf.mxu1 }
 0x13c   : > { %v1363_v15 = vadd.f32 %v1342_v21, %v1195_v6  ;;  %v935_v41 = vadd.f32 %v916_v9, %v3870_v51 }
 0x13d   : > { %v1535_v42 = vpop.f32.mrf.mxu0 }
 0x13e   : > { %1708 = vmatmul.bf16.gmra.mxu1 %v1615_v53  ;;  %1876 = vmatmul.bf16.gmra.mxu2 %v2995_v10  ;;  %v3960_v19 = vadd.f32 %v1532_v17, %v1363_v15 }
 0x140   : > { %2066 = vmatmul.bf16.gmra.mxu3 %v1973_v27  ;;  %2240 = vmatmul.bf16.gmra.mxu0 %v2147_v50 }
 0x141   : > { %v1177_v20 = vpop.f32.mrf.mxu2 }
 0x142   : > { %v1196_v54 = vadd.f32 %v1177_v20, %v935_v41 }
 0x143   : > { %v1345_v12 = vpop.f32.mrf.mxu3  ;;  %v918_v7 = vpop.f32.mrf.mxu1 }
 0x144   : > { %v1364_v33 = vadd.f32 %v1345_v12, %v1196_v54  ;;  %v936_v38 = vadd.f32 %v918_v7, %v3876_v55  ;;  %v3972_v55 = vld [vmem:[%s4059_s3] ss:$0 sm:$0xff] }
 0x145   : > { %v1537_v35 = vpop.f32.mrf.mxu0 }
 0x146   : > { %v3963_v46 = vadd.f32 %v1535_v42, %v1364_v33 }
 0x149   : > { %v1179_v14 = vpop.f32.mrf.mxu2 }
 0x14a   : > { %v1197_v48 = vadd.f32 %v1179_v14, %v936_v38 }
 0x14b   : > { %v1347_v53 = vpop.f32.mrf.mxu3  ;;  %v1674_v37 = vpop.f32.mrf.mxu1 }
 0x14c   : > { %v1365_v25 = vadd.f32 %v1347_v53, %v1197_v48  ;;  %v1714_v51 = vadd.f32 %v1674_v37, %v3882_v16 }
 0x14d   : > { %v2206_v57 = vpop.f32.mrf.mxu0 }
 0x14e   : > { %v3966_v26 = vadd.f32 %v1537_v35, %v1365_v25 }
 0x151   : > { %v1842_v63 = vpop.f32.mrf.mxu2 }
 0x152   : > { %v1882_v24 = vadd.f32 %v1842_v63, %v1714_v51 }
 0x153   : > { %v2032_v3 = vpop.f32.mrf.mxu3  ;;  %v1676_v28 = vpop.f32.mrf.mxu1 }
 0x154   : > { %v2072_v8 = vadd.f32 %v2032_v3, %v1882_v24  ;;  %v1715_v22 = vadd.f32 %v1676_v28, %v3886_v47 }
 0x155   : > { %v2208_v13 = vpop.f32.mrf.mxu0 }
 0x156   : > { %v2246_v29 = vadd.f32 %v2206_v57, %v2072_v8 }
 0x158   : > { %v2298_v60 = vmul.f32 %v3972_v55, %v2246_v29 }
 0x159   : > { %v1844_v49 = vpop.f32.mrf.mxu2 }
 0x15a   : > { %v1883_v0 = vadd.f32 %v1844_v49, %v1715_v22  ;;  %v2318_v18 = vadd.f32 %v3979_v39, %v2298_v60 }
 0x15b   : > { %v2034_v40 = vpop.f32.mrf.mxu3  ;;  %v1679_v16 = vpop.f32.mrf.mxu1 }
 0x15c   : > { %v2073_v44 = vadd.f32 %v2034_v40, %v1883_v0  ;;  %v1716_v30 = vadd.f32 %v1679_v16, %v3890_v34  ;;  %v2334_v31 = vmax.f32 %v2318_v18, 0.0 }
 0x15d   : > { %v2211_v17 = vpop.f32.mrf.mxu0 }
 0x15e   : > { %v2247_v45 = vadd.f32 %v2208_v13, %v2073_v44 }
 0x160   : > { %v2299_v47 = vmul.f32 %v3972_v55, %v2247_v45 }
 0x161   : > { %v1847_v23 = vpop.f32.mrf.mxu2 }
 0x162   : > { %v2319_v58 = vadd.f32 %v3979_v39, %v2299_v47  ;;  %v1884_v61 = vadd.f32 %v1847_v23, %v1716_v30 }
 0x163   : > { %v2037_v4 = vpop.f32.mrf.mxu3  ;;  %v1681_v1 = vpop.f32.mrf.mxu1 }
 0x164   : > { %v2335_v6 = vmax.f32 %v2319_v58, 0.0  ;;  %v2074_v21 = vadd.f32 %v2037_v4, %v1884_v61  ;;  %v1717_v27 = vadd.f32 %v1681_v1, %v3895_v62 }
 0x165   : > { %v2213_v10 = vpop.f32.mrf.mxu0 }
 0x166   : > { %v3071_v9 = vpack.c.bf16 %v2335_v6, %v2334_v31  ;;  %v2248_v34 = vadd.f32 %v2211_v17, %v2074_v21 }
 0x168   : > { %3072 = vst [vmem:[%s3990_s26] sm:$0xff] %v3071_v9   ;;  %v2300_v20 = vmul.f32 %v3972_v55, %v2248_v34 }
 0x169   : > { %v1849_v50 = vpop.f32.mrf.mxu2 }
 0x16a   : > { %v1885_v15 = vadd.f32 %v1849_v50, %v1717_v27  ;;  %v2320_v33 = vadd.f32 %v3979_v39, %v2300_v20 }
 0x16b   : > { %v2039_v42 = vpop.f32.mrf.mxu3  ;;  %v1684_v41 = vpop.f32.mrf.mxu1 }
 0x16c   : > { %v2075_v54 = vadd.f32 %v2039_v42, %v1885_v15  ;;  %v1718_v38 = vadd.f32 %v1684_v41, %v3900_v5  ;;  %v2336_v25 = vmax.f32 %v2320_v33, 0.0 }
 0x16d   : > { %v2216_v12 = vpop.f32.mrf.mxu0 }
 0x16e   : > { %v2249_v7 = vadd.f32 %v2213_v10, %v2075_v54 }
 0x170   : > { %v2301_v35 = vmul.f32 %v3972_v55, %v2249_v7 }
 0x171   : > { %v1852_v14 = vpop.f32.mrf.mxu2 }
 0x172   : > { %v2321_v48 = vadd.f32 %v3979_v39, %v2301_v35  ;;  %v1886_v62 = vadd.f32 %v1852_v14, %v1718_v38 }
 0x173   : > { %v2042_v53 = vpop.f32.mrf.mxu3  ;;  %v1686_v37 = vpop.f32.mrf.mxu1 }
 0x174   : > { %v2337_v57 = vmax.f32 %v2321_v48, 0.0  ;;  %v2076_v51 = vadd.f32 %v2042_v53, %v1886_v62  ;;  %v1719_v28 = vadd.f32 %v1686_v37, %v3905_v43 }
 0x175   : > { %v2218_v63 = vpop.f32.mrf.mxu0 }
 0x176   : > { %v3076_v24 = vpack.c.bf16 %v2337_v57, %v2336_v25  ;;  %v2250_v3 = vadd.f32 %v2216_v12, %v2076_v51 }
 0x178   : > { %3108 = vst [vmem:[%s3990_s26 + $0x8] sm:$0xff] %v3076_v24   ;;  %v2302_v5 = vmul.f32 %v3972_v55, %v2250_v3 }
 0x179   : > { %v1854_v8 = vpop.f32.mrf.mxu2 }
 0x17a   : > { %v1887_v13 = vadd.f32 %v1854_v8, %v1719_v28  ;;  %v2322_v16 = vadd.f32 %v3979_v39, %v2302_v5 }
 0x17b   : > { %v2044_v29 = vpop.f32.mrf.mxu3  ;;  %v1689_v22 = vpop.f32.mrf.mxu1 }
 0x17c   : > { %v2077_v49 = vadd.f32 %v2044_v29, %v1887_v13  ;;  %v1720_v44 = vadd.f32 %v1689_v22, %v3910_v56  ;;  %v2338_v30 = vmax.f32 %v2322_v16, 0.0 }
 0x17d   : > { %v2221_v0 = vpop.f32.mrf.mxu0 }
 0x17e   : > { %v2251_v40 = vadd.f32 %v2218_v63, %v2077_v49 }
 0x180   : > { %v2303_v60 = vmul.f32 %v3972_v55, %v2251_v40 }
 0x181   : > { %v1857_v17 = vpop.f32.mrf.mxu2 }
 0x182   : > { %v2323_v45 = vadd.f32 %v3979_v39, %v2303_v60  ;;  %v1888_v43 = vadd.f32 %v1857_v17, %v1720_v44 }
 0x183   : > { %v2047_v18 = vpop.f32.mrf.mxu3  ;;  %v1691_v47 = vpop.f32.mrf.mxu1 }
 0x184   : > { %v2339_v23 = vmax.f32 %v2323_v45, 0.0  ;;  %v2078_v58 = vadd.f32 %v2047_v18, %v1888_v43  ;;  %v1721_v31 = vadd.f32 %v1691_v47, %v3914_v59 }
 0x185   : > { %v2223_v61 = vpop.f32.mrf.mxu0 }
 0x186   : > { %v3081_v4 = vpack.c.bf16 %v2339_v23, %v2338_v30  ;;  %v2252_v1 = vadd.f32 %v2221_v0, %v2078_v58 }
 0x188   : > { %3109 = vst [vmem:[%s3990_s26 + $0x10] sm:$0xff] %v3081_v4   ;;  %v2304_v56 = vmul.f32 %v3972_v55, %v2252_v1 }
 0x189   : > { %v1859_v6 = vpop.f32.mrf.mxu2 }
 0x18a   : > { %v1889_v21 = vadd.f32 %v1859_v6, %v1721_v31  ;;  %v2324_v15 = vadd.f32 %v3979_v39, %v2304_v56 }
 0x18b   : > { %v2049_v10 = vpop.f32.mrf.mxu3  ;;  %v1694_v9 = vpop.f32.mrf.mxu1 }
 0x18c   : > { %v2079_v34 = vadd.f32 %v2049_v10, %v1889_v21  ;;  %v1722_v41 = vadd.f32 %v1694_v9, %v3919_v52  ;;  %v2340_v33 = vmax.f32 %v2324_v15, 0.0 }
 0x18d   : > { %v2226_v27 = vpop.f32.mrf.mxu0 }
 0x18e   : > { %v2253_v50 = vadd.f32 %v2223_v61, %v2079_v34 }
 0x190   : > { %v2305_v42 = vmul.f32 %v3972_v55, %v2253_v50 }
 0x191   : > { %v1862_v20 = vpop.f32.mrf.mxu2 }
 0x192   : > { %v2325_v54 = vadd.f32 %v3979_v39, %v2305_v42  ;;  %v1890_v59 = vadd.f32 %v1862_v20, %v1722_v41 }
 0x193   : > { %v2052_v12 = vpop.f32.mrf.mxu3  ;;  %v1696_v7 = vpop.f32.mrf.mxu1 }
 0x194   : > { %v2341_v35 = vmax.f32 %v2325_v54, 0.0  ;;  %v2080_v38 = vadd.f32 %v2052_v12, %v1890_v59  ;;  %v1723_v53 = vadd.f32 %v1696_v7, %v3927_v36 }
 0x195   : > { %v2228_v14 = vpop.f32.mrf.mxu0 }
 0x196   : > { %v3086_v48 = vpack.c.bf16 %v2341_v35, %v2340_v33  ;;  %v2254_v62 = vadd.f32 %v2226_v27, %v2080_v38 }
 0x198   : > { %3110 = vst [vmem:[%s3990_s26 + $0x18] sm:$0xff] %v3086_v48   ;;  %v2306_v52 = vmul.f32 %v3972_v55, %v2254_v62 }
 0x199   : > { %v1864_v37 = vpop.f32.mrf.mxu2 }
 0x19a   : > { %v1891_v25 = vadd.f32 %v1864_v37, %v1723_v53  ;;  %v2326_v28 = vadd.f32 %v3979_v39, %v2306_v52 }
 0x19b   : > { %v2054_v57 = vpop.f32.mrf.mxu3  ;;  %v1699_v51 = vpop.f32.mrf.mxu1 }
 0x19c   : > { %v2081_v63 = vadd.f32 %v2054_v57, %v1891_v25  ;;  %v1724_v13 = vadd.f32 %v1699_v51, %v3938_v32  ;;  %v2342_v0 = vmax.f32 %v2326_v28, 0.0 }
 0x19d   : > { %v2231_v24 = vpop.f32.mrf.mxu0 }
 0x19e   : > { %v2255_v3 = vadd.f32 %v2228_v14, %v2081_v63 }
 0x1a0   : > { %v2307_v8 = vmul.f32 %v3972_v55, %v2255_v3 }
 0x1a1   : > { %v1867_v29 = vpop.f32.mrf.mxu2 }
 0x1a2   : > { %v2327_v22 = vadd.f32 %v3979_v39, %v2307_v8  ;;  %v1892_v36 = vadd.f32 %v1867_v29, %v1724_v13 }
 0x1a3   : > { %v2057_v5 = vpop.f32.mrf.mxu3  ;;  %v1701_v49 = vpop.f32.mrf.mxu1 }
 0x1a4   : > { %v2343_v40 = vmax.f32 %v2327_v22, 0.0  ;;  %v2082_v16 = vadd.f32 %v2057_v5, %v1892_v36  ;;  %v1725_v45 = vadd.f32 %v1701_v49, %v3944_v2 }
 0x1a5   : > { %v2233_v60 = vpop.f32.mrf.mxu0 }
 0x1a6   : > { %v3091_v44 = vpack.c.bf16 %v2343_v40, %v2342_v0  ;;  %v2256_v17 = vadd.f32 %v2231_v24, %v2082_v16 }
 0x1a8   : > { %3111 = vst [vmem:[%s3990_s26 + $0x20] sm:$0xff] %v3091_v44   ;;  %v2308_v32 = vmul.f32 %v3972_v55, %v2256_v17 }
 0x1a9   : > { %v1869_v43 = vpop.f32.mrf.mxu2 }
 0x1aa   : > { %v1893_v18 = vadd.f32 %v1869_v43, %v1725_v45  ;;  %v2328_v4 = vadd.f32 %v3979_v39, %v2308_v32 }
 0x1ab   : > { %v2059_v47 = vpop.f32.mrf.mxu3  ;;  %v1704_v30 = vpop.f32.mrf.mxu1 }
 0x1ac   : > { %v2083_v23 = vadd.f32 %v2059_v47, %v1893_v18  ;;  %v1726_v31 = vadd.f32 %v1704_v30, %v3956_v11  ;;  %v2344_v56 = vmax.f32 %v2328_v4, 0.0 }
 0x1ad   : > { %v2236_v61 = vpop.f32.mrf.mxu0 }
 0x1ae   : > { %v2257_v58 = vadd.f32 %v2233_v60, %v2083_v23 }
 0x1b0   : > { %v2309_v1 = vmul.f32 %v3972_v55, %v2257_v58 }
 0x1b1   : > { %v1872_v6 = vpop.f32.mrf.mxu2 }
 0x1b2   : > { %v2329_v21 = vadd.f32 %v3979_v39, %v2309_v1  ;;  %v1894_v2 = vadd.f32 %v1872_v6, %v1726_v31 }
 0x1b3   : > { %v2062_v10 = vpop.f32.mrf.mxu3  ;;  %v1706_v9 = vpop.f32.mrf.mxu1 }
 0x1b4   : > { %v2345_v34 = vmax.f32 %v2329_v21, 0.0  ;;  %v2084_v27 = vadd.f32 %v2062_v10, %v1894_v2  ;;  %v1727_v42 = vadd.f32 %v1706_v9, %v3960_v19 }
 0x1b5   : > { %v2238_v41 = vpop.f32.mrf.mxu0 }
 0x1b6   : > { %v3096_v50 = vpack.c.bf16 %v2345_v34, %v2344_v56  ;;  %v2258_v15 = vadd.f32 %v2236_v61, %v2084_v27 }
 0x1b8   : > { %3112 = vst [vmem:[%s3990_s26 + $0x28] sm:$0xff] %v3096_v50   ;;  %v2310_v11 = vmul.f32 %v3972_v55, %v2258_v15 }
 0x1b9   : > { %v1874_v20 = vpop.f32.mrf.mxu2 }
 0x1ba   : > { %v1895_v54 = vadd.f32 %v1874_v20, %v1727_v42  ;;  %v2330_v35 = vadd.f32 %v3979_v39, %v2310_v11 }
 0x1bb   : > { %v2064_v59 = vpop.f32.mrf.mxu3  ;;  %v1709_v12 = vpop.f32.mrf.mxu1 }
 0x1bc   : > { %v2085_v7 = vadd.f32 %v2064_v59, %v1895_v54  ;;  %v1728_v14 = vadd.f32 %v1709_v12, %v3963_v46  ;;  %v2346_v25 = vmax.f32 %v2330_v35, 0.0 }
 0x1bd   : > { %v2241_v37 = vpop.f32.mrf.mxu0 }
 0x1be   : > { %v2259_v33 = vadd.f32 %v2238_v41, %v2085_v7 }
 0x1c0   : > { %v2311_v38 = vmul.f32 %v3972_v55, %v2259_v33 }
 0x1c1   : > { %v1877_v48 = vpop.f32.mrf.mxu2 }
 0x1c2   : > { %v2331_v62 = vadd.f32 %v3979_v39, %v2311_v38  ;;  %v1896_v19 = vadd.f32 %v1877_v48, %v1728_v14 }
 0x1c3   : > { %v2067_v53 = vpop.f32.mrf.mxu3  ;;  %v1711_v52 = vpop.f32.mrf.mxu1 }
 0x1c4   : > { %v2347_v57 = vmax.f32 %v2331_v62, 0.0  ;;  %v2086_v51 = vadd.f32 %v2067_v53, %v1896_v19  ;;  %v1729_v3 = vadd.f32 %v1711_v52, %v3966_v26 }
 0x1c5   : > { %v2243_v22 = vpop.f32.mrf.mxu0 }
 0x1c6   : > { %v3101_v63 = vpack.c.bf16 %v2347_v57, %v2346_v25  ;;  %v2260_v24 = vadd.f32 %v2241_v37, %v2086_v51 }
 0x1c8   : > { %3113 = vst [vmem:[%s3990_s26 + $0x30] sm:$0xff] %v3101_v63   ;;  %v2312_v46 = vmul.f32 %v3972_v55, %v2260_v24 }
 0x1c9   : > { %v1879_v28 = vpop.f32.mrf.mxu2 }
 0x1ca   : > { %v1897_v8 = vadd.f32 %v1879_v28, %v1729_v3  ;;  %v2332_v5 = vadd.f32 %v3979_v39, %v2312_v46 }
 0x1cb   : > { %v2069_v13 = vpop.f32.mrf.mxu3 }
 0x1cc   : > { %v2087_v29 = vadd.f32 %v2069_v13, %v1897_v8  ;;  %v2348_v40 = vmax.f32 %v2332_v5, 0.0 }
 0x1ce   : > { %v2261_v36 = vadd.f32 %v2243_v22, %v2087_v29 }
 0x1d0   : > { %v2313_v49 = vmul.f32 %v3972_v55, %v2261_v36 }
 0x1d2   : > { %v2333_v0 = vadd.f32 %v3979_v39, %v2313_v49 }
 0x1d4   : > { %v2349_v16 = vmax.f32 %v2333_v0, 0.0 }
 0x1d6   : > { %v3106_v60 = vpack.c.bf16 %v2349_v16, %v2348_v40 }
 0x1d8   : > { %3114 = vst [vmem:[%s3990_s26 + $0x38] sm:$0xff] %v3106_v60  }
 0x1d9 PF: > { %s15_s22 = sadd.s32 1, %s3225_s22   ;;  %s4066_s18 = smov %s3217_s20 }
 0x1da   : > { %p12_p8 = scmp.ge.s32.totalorder %s15_s22, 6   ;;  %s4067_s19 = smov %s3221_s21 }
 0x1db   : > { %s4068_s20 = smov %s4071_s23  ;;  %s4069_s21 = smov %s4075_s24 }
 0x1dc   :  { %14 = sbr.rel (!%p12_p8) target bundleno = 3 (0x3), region = 82 }

// kernel: doble_conv.3
= control target key start
LH: loop header
LB: loop body
LE: loop exit
PB: predicated region body
PF: predicated region fallthrough
CT: control target
= control target key end

     0   :  { %s3194_s18 = smov 0   ;;  %s3196_s19 = smov 0   ;;  %s4001_s0 = inlined_call_operand.vmem [shape: bf16[2,16,18,128], index: 0, kind: input, shape index: {}]   ;;  %s4002_s1 = inlined_call_operand.vmem [shape: bf16[2,4,18,128], index: 1, kind: input, shape index: {}]   ;;  %s4003_s2 = inlined_call_operand.vmem [shape: bf16[3,3,128,128], index: 2, kind: input, shape index: {}]   ;;  %s4004_s3 = inlined_call_operand.vmem [shape: f32[1,128], index: 3, kind: input, shape index: {}]   ;;  %s4005_s4 = inlined_call_operand.vmem [shape: f32[1,128], index: 4, kind: input, shape index: {}]   ;;  %s4006_s5 = inlined_call_operand.vmem [shape: f32[2,16,16,128], index: 5, kind: output, shape index: {}]  }
   0x1   :  { %s3198_s20 = smov 0   ;;  %s3200_s21 = smov 0  }
   0x2   :  { %s3202_s22 = smov 0  }
   0x3 LB: > { %s24_s23 = sadd.s32 1, %s3154_s20  ;;  %s27_s24 = sadd.s32 1, %s3158_s21  ;;  %s3162_s22 = sphi %s3202_s22, %s15_s22   ;;  %s3158_s21 = sphi %s3200_s21, %s4014_s21   ;;  %s3154_s20 = sphi %s3198_s20, %s4013_s20   ;;  %s3150_s19 = sphi %s3196_s19, %s4012_s19   ;;  %s3146_s18 = sphi %s3194_s18, %s4011_s18  }
   0x4   : > { %p25_p0 = scmp.ge.s32.totalorder %s24_s23, 2  ;;  %p2490_p1 = scmp.ge.s32.totalorder %s3162_s22, 1 }
   0x5   : > { %p227_p2 = scmp.lt.s32.totalorder %s3162_s22, 5 }
   0x6   : > { %s4016_s23 = smov (%p25_p0, %s24_s23), 0  ;;  %s4018_s24 = smov (!%p25_p0, %s27_s24), %s3158_s21 }
   0x7   : > { %p228_p3 = pnand %p2490_p1, %p227_p2  ;;  %p29_p4 = scmp.ge.s32.totalorder %s4018_s24, 2 }
   0x8   : > { %s2491_s29 = sshll.u32 (!%p228_p3), %s3146_s18, 3  ;;  %p276_p5 = scmp.lt.s32.totalorder (!%p228_p3), %s3150_s19, 1 }
   0x9   : > { %s4020_s24 = smov (%p29_p4, %s4018_s24), 0  ;;  %231 = sbr.rel (%p228_p3) target bundleno = 471 (0x1d7), region = 40 }
   0xa   : > { %s2493_s7 = sshll.u32 (!%p228_p3), %s3146_s18, 1  ;;  %p278_p6 = scmp.lt.s32.totalorder (!%p228_p3), %s2491_s29, 15 }
   0xb   : > { %p289_p7 = scmp.lt.s32.totalorder (!%p228_p3), %s2493_s7, 3 }
   0xe   : > { %v2987_v0 = vld [vmem:[%s4003_s2 + $0x38] sm:$0xff]  ;;  %v2986_v1 = vld [vmem:[%s4003_s2 + $0x30] sm:$0xff]  ;;  %v2985_v2 = vld [vmem:[%s4003_s2 + $0x28] sm:$0xff]  ;;  %s4022_s19 = smov (!%p276_p5, %s3150_s19), 1  ;;  %s4024_s29 = smov (!%p278_p6, %s2491_s29), 15  ;;  %vm961_vm2 = vcmask 1042432  }
   0xf   : > { %3052 = vmatpush.bf16.msra.mxu1 %v2987_v0  ;;  %3053 = vmatpush.bf16.msra.mxu2 %v2987_v0  ;;  %v2984_v3 = vld [vmem:[%s4003_s2 + $0x20] sm:$0xff]  ;;  %s4026_s7 = smov (!%p289_p7, %s2493_s7), 3  ;;  %v2983_v4 = vld [vmem:[%s4003_s2 + $0x18] sm:$0xff]  ;;  %s3077_s12 = smul.u32 48, %s4022_s19  ;;  %v2982_v5 = vld [vmem:[%s4003_s2 + $0x10] sm:$0xff]  ;;  %vm962_vm3 = vcmask 1046532  }
  0x10   : > { %3054 = vmatpush.bf16.msra.mxu3 %v2987_v0  ;;  %483 = vmatpush.bf16.msra.mxu0 %v2987_v0  ;;  %s3076_s13 = smul.u32 3, %s4024_s29  ;;  %v2981_v6 = vld [vmem:[%s4003_s2 + $0x8] sm:$0xff]  ;;  %v2980_v7 = vld [vmem:[%s4003_s2] sm:$0xff]  ;;  %v3003_v8 = vld [vmem:[%s4003_s2 + $0xb8] sm:$0xff]  ;;  %vm564_vm0 = vsmask.f32 3328 }
  0x11   : > { %s3079_s14 = smul.u32 12, %s4022_s19  ;;  %v2995_v9 = vld [vmem:[%s4003_s2 + $0x78] sm:$0xff]  ;;  %v3002_v16 = vld [vmem:[%s4003_s2 + $0xb0] sm:$0xff]  ;;  %v3001_v24 = vld [vmem:[%s4003_s2 + $0xa8] sm:$0xff]  ;;  %vm565_vm1 = vsmask.f32 7440 }
  0x12   : > { %s3078_s15 = smul.u32 3, %s4026_s7  ;;  %s282_s18 = sadd.s32 %s3077_s12, %s3076_s13  ;;  %v3011_v14 = vld [vmem:[%s4003_s2 + $0xf8] sm:$0xff]  ;;  %v2994_v17 = vld [vmem:[%s4003_s2 + $0x70] sm:$0xff]  ;;  %v2993_v25 = vld [vmem:[%s4003_s2 + $0x68] sm:$0xff] }
  0x13   : > { %3055 = vmatpush.bf16.msra.mxu1 %v2986_v1  ;;  %3056 = vmatpush.bf16.msra.mxu2 %v2986_v1  ;;  %s2492_s28 = sshll.u32 %s282_s18, 2  ;;  %v3019_v15 = vld [vmem:[%s4003_s2 + $0x138] sm:$0xff]  ;;  %v3010_v19 = vld [vmem:[%s4003_s2 + $0xf0] sm:$0xff]  ;;  %v3009_v34 = vld [vmem:[%s4003_s2 + $0xe8] sm:$0xff] }
  0x14   : > { %3057 = vmatpush.bf16.msra.mxu3 %v2986_v1  ;;  %484 = vmatpush.bf16.msra.mxu0 %v2986_v1  ;;  %s293_s25 = sadd.s32 %s3079_s14, %s3078_s15  ;;  %s3266_s10 = scalar_lea.vmem %s4001_s0, %s2492_s28  ;;  %v3018_v21 = vld [vmem:[%s4003_s2 + $0x130] sm:$0xff]  ;;  %v3017_v35 = vld [vmem:[%s4003_s2 + $0x128] sm:$0xff]  ;;  %v3000_v36 = vld [vmem:[%s4003_s2 + $0xa0] sm:$0xff] }
  0x15   : > { %s2494_s30 = sshll.u32 %s293_s25, 2  ;;  %v3280_v10 = vld [vmem:[%s3266_s10 + $0xc] sm:$0xff]  ;;  %v3283_v11 = vld [vmem:[%s3266_s10 + $0x24] sm:$0xff]  ;;  %v3286_v12 = vld [vmem:[%s3266_s10 + $0x3c] sm:$0xff] }
  0x16   : > { %s3271_s13 = scalar_lea.vmem %s4002_s1, %s2494_s30  ;;  %v3317_v22 = vld [vmem:[%s3266_s10] sm:$0xf]  ;;  %v3320_v23 = vld [vmem:[%s3266_s10 + $0x4] sm:$0xf]  ;;  %v3362_v49 = vld [vmem:[%s3266_s10 + $0x8] sm:$0x1] }
  0x17   : > { %3058 = vmatpush.bf16.msra.mxu1 %v2985_v2  ;;  %3059 = vmatpush.bf16.msra.mxu2 %v2985_v2  ;;  %v2970_v13 = vld [vmem:[%s3271_s13] sm:$0xff]  ;;  %v592_v30 = vshrl.u32 %v3317_v22, 16  ;;  %v595_v31 = vshll.u32 %v3317_v22, 16  ;;  %v601_v32 = vshll.u32 %v3320_v23, 16  ;;  %v605_v33 = vshrl.u32 %v3320_v23, 16  ;;  %v2999_v50 = vld [vmem:[%s4003_s2 + $0x98] sm:$0xff]  ;;  %vm3409_vm4 = vmor %vm564_vm0, %vm565_vm1 }
  0x18   : > { %3060 = vmatpush.bf16.msra.mxu3 %v2985_v2  ;;  %485 = vmatpush.bf16.msra.mxu0 %v2985_v2  ;;  %v3304_v18 = vld [vmem:[%s3271_s13] sm:$0xf]  ;;  %v3311_v20 = vld [vmem:[%s3271_s13 + $0x4] sm:$0xf]  ;;  %v3351_v42 = vld [vmem:[%s3271_s13 + $0x8] sm:$0x1] }
  0x19   : > { %v568_v26 = vshrl.u32 %v3304_v18, 16  ;;  %v571_v27 = vshll.u32 %v3304_v18, 16  ;;  %v577_v28 = vshll.u32 %v3311_v20, 16  ;;  %v581_v29 = vshrl.u32 %v3311_v20, 16  ;;  %v2992_v37 = vld [vmem:[%s4003_s2 + $0x60] sm:$0xff]  ;;  %v2991_v51 = vld [vmem:[%s4003_s2 + $0x58] sm:$0xff]  ;;  %vm3422_vm5 = vmor %vm961_vm2, %vm962_vm3 }
  0x1a   : > { %v594_v43 = vrot.slane %v592_v30, 4  ;;  %v597_v44 = vrot.slane %v595_v31, 5  ;;  %v3353_v45 = vrot.slane %v601_v32, 5  ;;  %v607_v46 = vrot.slane %v605_v33, 4  ;;  %v3008_v47 = vld [vmem:[%s4003_s2 + $0xe0] sm:$0xff]  ;;  %v3371_v53 = vld [vmem:[%s3266_s10 + $0x18] sm:$0xff] }
  0x1b   : > { %3061 = vmatpush.bf16.msra.mxu1 %v2984_v3  ;;  %3062 = vmatpush.bf16.msra.mxu2 %v2984_v3  ;;  %v570_v38 = vrot.slane %v568_v26, 4  ;;  %v573_v39 = vrot.slane %v571_v27, 5  ;;  %v3348_v40 = vrot.slane %v577_v28, 5  ;;  %v583_v41 = vrot.slane %v581_v29, 4  ;;  %v3016_v48 = vld [vmem:[%s4003_s2 + $0x120] sm:$0xff]  ;;  %v3374_v54 = vld [vmem:[%s3266_s10 + $0x30] sm:$0xff] }
  0x1c   : > { %3063 = vmatpush.bf16.msra.mxu3 %v2984_v3  ;;  %486 = vmatpush.bf16.msra.mxu0 %v2984_v3  ;;  %v587_v56 = vshll.u32 %v3351_v42, 16  ;;  %v966_v57 = vrot.slane %v3311_v20, 5  ;;  %v3380_v58 = vld [vmem:[%s3266_s10 + $0x48] sm:$0xff]  ;;  %v3383_v59 = vld [vmem:[%s3266_s10] sm:$0xff]  ;;  %v598_v60 = vor.u32 %v597_v44, %v594_v43  ;;  %v608_v61 = vor.u32 %v607_v46, %v3353_v45  ;;  %v3007_v63 = vld [vmem:[%s4003_s2 + $0xd8] sm:$0xff] }
  0x1d   : > { %v574_v52 = vor.u32 %v573_v39, %v570_v38  ;;  %v584_v55 = vor.u32 %v583_v41, %v3348_v40  ;;  %v611_v62 = vshll.u32 %v3362_v49, 16  ;;  %v3015_v0 = vld [vmem:[%s4003_s2 + $0x118] sm:$0xff]  ;;  %v2998_v1 = vld [vmem:[%s4003_s2 + $0x90] sm:$0xff]  ;;  %v2989_v20 = vld [vmem:[%s4003_s2 + $0x48] sm:$0xff] }
  0x1e   : > { %v2990_v2 = vld [vmem:[%s4003_s2 + $0x50] sm:$0xff]  ;;  %v3005_v31 = vld [vmem:[%s4003_s2 + $0xc8] sm:$0xff]  ;;  %v2988_v38 = vld [vmem:[%s4003_s2 + $0x40] sm:$0xff] }
  0x1f   : > { %3064 = vmatpush.bf16.msra.mxu1 %v2983_v4  ;;  %3065 = vmatpush.bf16.msra.mxu2 %v2983_v4  ;;  %v575_v3 = vrot.slane %v574_v52, 4  ;;  %v3013_v32 = vld [vmem:[%s4003_s2 + $0x108] sm:$0xff]  ;;  %v3035_v43 = vld [vmem:[%s4003_s2 + $0x1b8] sm:$0xff] }
  0x20   : > { %3066 = vmatpush.bf16.msra.mxu3 %v2983_v4  ;;  %487 = vmatpush.bf16.msra.mxu0 %v2983_v4  ;;  %v585_v4 = vrot.slane %v584_v55, 4  ;;  %v3027_v44 = vld [vmem:[%s4003_s2 + $0x178] sm:$0xff] }
  0x23   : > { %3067 = vmatpush.bf16.msra.mxu1 %v2982_v5  ;;  %3068 = vmatpush.bf16.msra.mxu2 %v2982_v5 }
  0x24   : > { %3069 = vmatpush.bf16.msra.mxu3 %v2982_v5  ;;  %488 = vmatpush.bf16.msra.mxu0 %v2982_v5  ;;  %v589_v5 = vrot.slane %v587_v56, 5  ;;  %v3043_v56 = vld [vmem:[%s4003_s2 + $0x1f8] sm:$0xff] }
  0x26   : > { %v590_v26 = vsel %vm3409_vm4, %v585_v4, %v589_v5  ;;  %v2615_v5 = vrot.slane %v3317_v22, 9 }
  0x27   : > { %3070 = vmatpush.bf16.msra.mxu1 %v2981_v6  ;;  %3071 = vmatpush.bf16.msra.mxu2 %v2981_v6 }
  0x28   : > { %3072 = vmatpush.bf16.msra.mxu3 %v2981_v6  ;;  %489 = vmatpush.bf16.msra.mxu0 %v2981_v6  ;;  %v2614_v6 = vrot.slane %v3304_v18, 9  ;;  %v2997_v18 = vld [vmem:[%s4003_s2 + $0x88] sm:$0xff] }
  0x2a   : > { %v967_v27 = vsel %vm3422_vm5, %v2614_v6, %v966_v57 }
  0x2b   : > { %3073 = vmatpush.bf16.msra.mxu1 %v2980_v7  ;;  %3074 = vmatpush.bf16.msra.mxu2 %v2980_v7  ;;  %v1053_v41 = vunpack.c.l.b16 %v967_v27 }
  0x2c   : > { %3075 = vmatpush.bf16.msra.mxu3 %v2980_v7  ;;  %490 = vmatpush.bf16.msra.mxu0 %v2980_v7  ;;  %v968_v7 = vrot.slane %v966_v57, 4  ;;  %v3051_v57 = vld [vmem:[%s4003_s2 + $0x238] sm:$0xff] }
  0x2e   : > { %501 = vmatmul.bf16.vlgmr.msra.gmra.mxu1 %v3280_v10  ;;  %511 = vmatmul.bf16.vlgmr.msra.gmra.mxu2 %v3283_v11 }
  0x2f   : > { %1133 = vmatpush.bf16.msrb.mxu2 %v3003_v8  ;;  %872 = vmatpush.bf16.msrb.mxu1 %v2995_v9  ;;  %v3006_v8 = vld [vmem:[%s4003_s2 + $0xd0] sm:$0xff] }
  0x30   : > { %521 = vmatmul.bf16.vlgmr.msra.gmra.mxu3 %v3286_v12  ;;  %491 = vmatmul.bf16.vlgmr.msra.gmra.mxu0 %v2970_v13  ;;  %v969_v13 = vrot.slane %v3351_v42, 5 }
  0x31   : > { %1301 = vmatpush.bf16.msrb.mxu3 %v3011_v14  ;;  %1491 = vmatpush.bf16.msrb.mxu0 %v3019_v15  ;;  %v599_v14 = vrot.slane %v598_v60, 4  ;;  %v609_v15 = vrot.slane %v608_v61, 4  ;;  %v973_v60 = vrot.slane %v3320_v23, 5  ;;  %v3485_v61 = vld [vmem:[%s3266_s10 + $0x14] sm:$0x1] }
  0x32   : > { %v970_v28 = vsel %vm3422_vm5, %v968_v7, %v969_v13  ;;  %v635_v4 = vshll.u32 %v3485_v61, 16  ;;  %v3026_v23 = vld [vmem:[%s4003_s2 + $0x170] sm:$0xff]  ;;  %v976_v7 = vrot.slane %v3362_v49, 5 }
  0x33   : > { %1134 = vmatpush.bf16.msrb.mxu2 %v3002_v16  ;;  %873 = vmatpush.bf16.msrb.mxu1 %v2994_v17  ;;  %v613_v16 = vrot.slane %v611_v62, 5  ;;  %v3014_v17 = vld [vmem:[%s4003_s2 + $0x110] sm:$0xff]  ;;  %v604_v29 = vsel %vm3409_vm4, %v599_v14, %v3353_v45  ;;  %v1054_v42 = vunpack.c.l.b16 %v970_v28  ;;  %v975_v6 = vrot.slane %v973_v60, 4  ;;  %v3504_v14 = vld [vmem:[%s3266_s10 + $0x18] sm:$0xf] }
  0x34   : > { %v794_v45 = vunpack.c.l.b16 %v604_v29  ;;  %v3050_v13 = vld [vmem:[%s4003_s2 + $0x230] sm:$0xff]  ;;  %v640_v27 = vshrl.u32 %v3504_v14, 16  ;;  %v643_v28 = vshll.u32 %v3504_v14, 16 }
  0x35   : > { %1302 = vmatpush.bf16.msrb.mxu3 %v3010_v19  ;;  %1492 = vmatpush.bf16.msrb.mxu0 %v3018_v21  ;;  %v3430_v21 = vld [vmem:[%s3266_s10 + $0xc] sm:$0xf]  ;;  %v614_v30 = vsel %vm3409_vm4, %v609_v15, %v613_v16  ;;  %v3507_v15 = vld [vmem:[%s3266_s10 + $0x1c] sm:$0xf]  ;;  %v637_v16 = vrot.slane %v635_v4, 5 }
  0x36   : > { %v616_v33 = vshrl.u32 %v3430_v21, 16  ;;  %v795_v46 = vunpack.c.l.b16 %v614_v30  ;;  %v649_v29 = vshll.u32 %v3507_v15, 16  ;;  %v653_v30 = vshrl.u32 %v3507_v15, 16 }
  0x37   : > { %1135 = vmatpush.bf16.msrb.mxu2 %v3001_v24  ;;  %874 = vmatpush.bf16.msrb.mxu1 %v2993_v25  ;;  %v3433_v24 = vld [vmem:[%s3266_s10 + $0x10] sm:$0xf]  ;;  %v580_v25 = vsel %vm3409_vm4, %v575_v3, %v3348_v40  ;;  %v793_v40 = vunpack.c.l.b16 %v590_v26  ;;  %v3049_v26 = vld [vmem:[%s4003_s2 + $0x228] sm:$0xff] }
  0x38   : > { %v792_v39 = vunpack.c.l.b16 %v580_v25  ;;  %v3041_v25 = vld [vmem:[%s4003_s2 + $0x1e8] sm:$0xff] }
  0x39   : > { %1303 = vmatpush.bf16.msrb.mxu3 %v3009_v34  ;;  %1493 = vmatpush.bf16.msrb.mxu0 %v3017_v35  ;;  %v619_v34 = vshll.u32 %v3430_v21, 16  ;;  %v625_v35 = vshll.u32 %v3433_v24, 16 }
  0x3a   : > { %v808_v62 = vpack.c.b16 %v793_v40, %v792_v39 }
  0x3b   : > { %1136 = vmatpush.bf16.msrb.mxu2 %v3000_v36  ;;  %875 = vmatpush.bf16.msrb.mxu1 %v2992_v37  ;;  %v629_v36 = vshrl.u32 %v3433_v24, 16  ;;  %v2996_v37 = vld [vmem:[%s4003_s2 + $0x80] sm:$0xff]  ;;  %v627_v52 = vrot.slane %v625_v35, 5  ;;  %v642_v35 = vrot.slane %v640_v27, 4 }
  0x3d   : > { %1304 = vmatpush.bf16.msrb.mxu3 %v3008_v47  ;;  %1494 = vmatpush.bf16.msrb.mxu0 %v3016_v48  ;;  %v3004_v47 = vld [vmem:[%s4003_s2 + $0xc0] sm:$0xff]  ;;  %v631_v55 = vrot.slane %v629_v36, 4  ;;  %v645_v36 = vrot.slane %v643_v28, 5 }
  0x3e   : > { %506 = vmatmul.bf16.gmra.mxu1 %v3371_v53  ;;  %516 = vmatmul.bf16.gmra.mxu2 %v3374_v54  ;;  %v3012_v48 = vld [vmem:[%s4003_s2 + $0x100] sm:$0xff] }
  0x3f   : > { %1137 = vmatpush.bf16.msrb.mxu2 %v2999_v50  ;;  %876 = vmatpush.bf16.msrb.mxu1 %v2991_v51  ;;  %v618_v50 = vrot.slane %v616_v33, 4  ;;  %v621_v51 = vrot.slane %v619_v34, 5  ;;  %v632_v3 = vor.u32 %v631_v55, %v627_v52 }
  0x40   : > { %526 = vmatmul.bf16.gmra.mxu3 %v3380_v58  ;;  %496 = vmatmul.bf16.gmra.mxu0 %v3383_v59 }
  0x41   : > { %1305 = vmatpush.bf16.msrb.mxu3 %v3007_v63  ;;  %1495 = vmatpush.bf16.msrb.mxu0 %v3015_v0  ;;  %v1069_v63 = vpack.c.b16 %v1054_v42, %v1053_v41  ;;  %v809_v0 = vpack.c.b16 %v795_v46, %v794_v45  ;;  %v633_v49 = vrot.slane %v632_v3, 4  ;;  %v3534_v41 = vld [vmem:[%s3266_s10 + $0x20] sm:$0x1]  ;;  %v980_v42 = vrot.slane %v3433_v24, 5 }
  0x42   : > { %v659_v46 = vshll.u32 %v3534_v41, 16 }
  0x43   : > { %1138 = vmatpush.bf16.msrb.mxu2 %v2998_v1  ;;  %877 = vmatpush.bf16.msrb.mxu1 %v2990_v2  ;;  %v3034_v1 = vld [vmem:[%s4003_s2 + $0x1b0] sm:$0xff]  ;;  %v622_v2 = vor.u32 %v621_v51, %v618_v50  ;;  %v982_v50 = vrot.slane %v980_v42, 4  ;;  %v983_v51 = vrot.slane %v3485_v61, 5  ;;  %v3560_v61 = vld [vmem:[%s3266_s10 + $0x28] sm:$0xf] }
  0x44   : > { %v661_v55 = vrot.slane %v659_v46, 5 }
  0x45   : > { %1306 = vmatpush.bf16.msrb.mxu3 %v3006_v8  ;;  %1496 = vmatpush.bf16.msrb.mxu0 %v3014_v17  ;;  %v3042_v8 = vld [vmem:[%s4003_s2 + $0x1f0] sm:$0xff]  ;;  %v623_v22 = vrot.slane %v622_v2, 4  ;;  %v3033_v17 = vld [vmem:[%s4003_s2 + $0x1a8] sm:$0xff] }
  0x47   : > { %1139 = vmatpush.bf16.msrb.mxu2 %v2997_v18  ;;  %878 = vmatpush.bf16.msrb.mxu1 %v2989_v20  ;;  %v3025_v18 = vld [vmem:[%s4003_s2 + $0x168] sm:$0xff]  ;;  %v977_v20 = vsel %vm3422_vm5, %v975_v6, %v976_v7 }
  0x48   : > { %v1056_v34 = vunpack.c.l.b16 %v977_v20  ;;  %v987_v20 = vrot.slane %v3507_v15, 5 }
  0x49   : > { %1307 = vmatpush.bf16.msrb.mxu3 %v3005_v31  ;;  %1497 = vmatpush.bf16.msrb.mxu0 %v3013_v32  ;;  %v628_v31 = vsel %vm3409_vm4, %v623_v22, %v627_v52  ;;  %v638_v32 = vsel %vm3409_vm4, %v633_v49, %v637_v16 }
  0x4a   : > { %v796_v39 = vunpack.c.l.b16 %v628_v31  ;;  %v797_v40 = vunpack.c.l.b16 %v638_v32  ;;  %v990_v31 = vrot.slane %v3534_v41, 5 }
  0x4b   : > { %1140 = vmatpush.bf16.msrb.mxu2 %v2996_v37  ;;  %879 = vmatpush.bf16.msrb.mxu1 %v2988_v38  ;;  %v651_v37 = vrot.slane %v649_v29, 5  ;;  %v655_v38 = vrot.slane %v653_v30, 4  ;;  %v2617_v29 = vrot.slane %v3504_v14, 9  ;;  %v989_v30 = vrot.slane %v987_v20, 4  ;;  %v3023_v14 = vld [vmem:[%s4003_s2 + $0x158] sm:$0xff] }
  0x4d   : > { %1308 = vmatpush.bf16.msrb.mxu3 %v3004_v47  ;;  %1498 = vmatpush.bf16.msrb.mxu0 %v3012_v48  ;;  %v656_v45 = vor.u32 %v655_v38, %v651_v37  ;;  %v3540_v47 = vpack.c.b16 %v797_v40, %v796_v39  ;;  %v2616_v48 = vrot.slane %v3430_v21, 9  ;;  %v3040_v21 = vld [vmem:[%s4003_s2 + $0x1e0] sm:$0xff]  ;;  %v3608_v38 = vld [vmem:[%s3266_s10 + $0x34] sm:$0xf]  ;;  %v988_v39 = vsel %vm3422_vm5, %v2617_v29, %v987_v20 }
  0x4e   : > { %880 = vmatmul.bf16.vlgmr.msrb.gmra.mxu1 %v808_v62  ;;  %1141 = vmatmul.bf16.vlgmr.msrb.gmra.mxu2 %v1069_v63  ;;  %v3048_v62 = vld [vmem:[%s4003_s2 + $0x220] sm:$0xff]  ;;  %v991_v40 = vsel %vm3422_vm5, %v989_v30, %v990_v31  ;;  %v697_v46 = vshll.u32 %v3608_v38, 16 }
  0x4f   : > { %1833 = vmatpush.bf16.msra.mxu2 %v3035_v43  ;;  %1665 = vmatpush.bf16.msra.mxu1 %v3027_v44  ;;  %v646_v44 = vor.u32 %v645_v36, %v642_v35  ;;  %v657_v24 = vrot.slane %v656_v45, 4  ;;  %v981_v63 = vsel %vm3422_vm5, %v2616_v48, %v980_v42  ;;  %v3039_v35 = vld [vmem:[%s4003_s2 + $0x1d8] sm:$0xff]  ;;  %v701_v48 = vshrl.u32 %v3608_v38, 16 }
  0x50   : > { %1309 = vmatmul.bf16.vlgmr.msrb.gmra.mxu3 %v3383_v59  ;;  %1499 = vmatmul.bf16.vlgmr.msrb.gmra.mxu0 %v809_v0  ;;  %v974_v59 = vsel %vm3422_vm5, %v2615_v5, %v973_v60  ;;  %v3557_v60 = vld [vmem:[%s3266_s10 + $0x24] sm:$0xf]  ;;  %v677_v5 = vshrl.u32 %v3560_v61, 16  ;;  %v1057_v6 = vunpack.c.l.b16 %v981_v63  ;;  %v3047_v36 = vld [vmem:[%s4003_s2 + $0x218] sm:$0xff] }
  0x51   : > { %2023 = vmatpush.bf16.msra.mxu3 %v3043_v56  ;;  %2197 = vmatpush.bf16.msra.mxu0 %v3051_v57  ;;  %v1055_v33 = vunpack.c.l.b16 %v974_v59  ;;  %v647_v52 = vrot.slane %v646_v44, 4  ;;  %v3032_v56 = vld [vmem:[%s4003_s2 + $0x1a0] sm:$0xff]  ;;  %v662_v2 = vsel %vm3409_vm4, %v657_v24, %v661_v55  ;;  %v664_v3 = vshrl.u32 %v3557_v60, 16  ;;  %v3624_v63 = vld [vmem:[%s3266_s10 + $0x38] sm:$0x1] }
  0x52   : > { %v3024_v57 = vld [vmem:[%s4003_s2 + $0x160] sm:$0xff]  ;;  %v667_v4 = vshll.u32 %v3557_v60, 16 }
  0x53   : > { %1834 = vmatpush.bf16.msra.mxu2 %v3034_v1  ;;  %1666 = vmatpush.bf16.msra.mxu1 %v3026_v23  ;;  %v3537_v43 = vpack.c.b16 %v1056_v34, %v1055_v33  ;;  %v652_v1 = vsel %vm3409_vm4, %v647_v52, %v651_v37  ;;  %v673_v23 = vshll.u32 %v3560_v61, 16  ;;  %v666_v22 = vrot.slane %v664_v3, 4  ;;  %v3031_v34 = vld [vmem:[%s4003_s2 + $0x198] sm:$0xff]  ;;  %v3605_v37 = vld [vmem:[%s3266_s10 + $0x30] sm:$0xf] }
  0x54   : > { %v669_v49 = vrot.slane %v667_v4, 5  ;;  %v688_v44 = vshrl.u32 %v3605_v37, 16  ;;  %v691_v45 = vshll.u32 %v3605_v37, 16  ;;  %v707_v4 = vshll.u32 %v3624_v63, 16 }
  0x55   : > { %2024 = vmatpush.bf16.msra.mxu3 %v3042_v8  ;;  %2198 = vmatpush.bf16.msra.mxu0 %v3050_v13  ;;  %v798_v8 = vunpack.c.l.b16 %v652_v1  ;;  %v799_v13 = vunpack.c.l.b16 %v662_v2  ;;  %v675_v16 = vrot.slane %v673_v23, 5  ;;  %v2618_v23 = vrot.slane %v3557_v60, 9  ;;  %v3038_v60 = vld [vmem:[%s4003_s2 + $0x1d0] sm:$0xff] }
  0x56   : > { %v690_v55 = vrot.slane %v688_v44, 4 }
  0x57   : > { %1835 = vmatpush.bf16.msra.mxu2 %v3033_v17  ;;  %1667 = vmatpush.bf16.msra.mxu1 %v3025_v18  ;;  %v679_v17 = vrot.slane %v677_v5, 4  ;;  %v3578_v18 = vld [vmem:[%s3266_s10 + $0x2c] sm:$0x1] }
  0x58   : > { %v683_v28 = vshll.u32 %v3578_v18, 16 }
  0x59   : > { %2025 = vmatpush.bf16.msra.mxu3 %v3041_v25  ;;  %2199 = vmatpush.bf16.msra.mxu0 %v3049_v26  ;;  %v3583_v25 = vpack.c.b16 %v799_v13, %v798_v8  ;;  %v670_v26 = vor.u32 %v669_v49, %v666_v22  ;;  %v680_v27 = vor.u32 %v679_v17, %v675_v16  ;;  %v3030_v8 = vld [vmem:[%s4003_s2 + $0x190] sm:$0xff] }
  0x5a   : > { %v685_v33 = vrot.slane %v683_v28, 5  ;;  %v3022_v13 = vld [vmem:[%s4003_s2 + $0x150] sm:$0xff] }
  0x5b   : > { %1836 = vmatpush.bf16.msra.mxu2 %v3032_v56  ;;  %1668 = vmatpush.bf16.msra.mxu1 %v3024_v57  ;;  %v671_v15 = vrot.slane %v670_v26, 4  ;;  %v681_v32 = vrot.slane %v680_v27, 4  ;;  %v693_v56 = vrot.slane %v691_v45, 5  ;;  %v703_v57 = vrot.slane %v701_v48, 4 }
  0x5c   : > { %v2619_v48 = vrot.slane %v3605_v37, 9  ;;  %v3037_v37 = vld [vmem:[%s4003_s2 + $0x1c8] sm:$0xff] }
  0x5d   : > { %2026 = vmatpush.bf16.msra.mxu3 %v3040_v21  ;;  %2200 = vmatpush.bf16.msra.mxu0 %v3048_v62  ;;  %v676_v41 = vsel %vm3409_vm4, %v671_v15, %v675_v16  ;;  %v686_v42 = vsel %vm3409_vm4, %v681_v32, %v685_v33  ;;  %v699_v21 = vrot.slane %v697_v46, 5  ;;  %v994_v62 = vrot.slane %v3560_v61, 5  ;;  %v3636_v61 = vld [vmem:[%s3266_s10 + $0x3c] sm:$0xf] }
  0x5e   : > { %885 = vmatmul.bf16.gmra.mxu1 %v809_v0  ;;  %1146 = vmatmul.bf16.gmra.mxu2 %v3537_v43  ;;  %v984_v0 = vsel %vm3422_vm5, %v982_v50, %v983_v51  ;;  %v1059_v50 = vunpack.c.l.b16 %v988_v39  ;;  %v1060_v51 = vunpack.c.l.b16 %v991_v40  ;;  %v800_v52 = vunpack.c.l.b16 %v676_v41  ;;  %v3668_v39 = vld [vmem:[%s3266_s10 + $0x44] sm:$0x1] }
  0x5f   : > { %v1058_v7 = vunpack.c.l.b16 %v984_v0  ;;  %1837 = vmatpush.bf16.msra.mxu2 %v3031_v34  ;;  %1669 = vmatpush.bf16.msra.mxu1 %v3023_v14  ;;  %v801_v24 = vunpack.c.l.b16 %v686_v42  ;;  %v694_v2 = vor.u32 %v693_v56, %v690_v55  ;;  %v704_v3 = vor.u32 %v703_v57, %v699_v21  ;;  %v3029_v55 = vld [vmem:[%s4003_s2 + $0x188] sm:$0xff] }
  0x60   : > { %1314 = vmatmul.bf16.gmra.mxu3 %v3280_v10  ;;  %1504 = vmatmul.bf16.gmra.mxu0 %v3540_v47  ;;  %v3626_v0 = vpack.c.b16 %v1060_v51, %v1059_v50  ;;  %v996_v5 = vrot.slane %v994_v62, 4  ;;  %v709_v16 = vrot.slane %v707_v4, 5  ;;  %v995_v17 = vsel %vm3422_vm5, %v2618_v23, %v994_v62  ;;  %v3689_v56 = vld [vmem:[%s3266_s10 + $0x48] sm:$0xf] }
  0x61   : > { %v3580_v59 = vpack.c.b16 %v1058_v7, %v1057_v6  ;;  %2027 = vmatpush.bf16.msra.mxu3 %v3039_v35  ;;  %2201 = vmatpush.bf16.msra.mxu0 %v3047_v36  ;;  %v3628_v1 = vpack.c.b16 %v801_v24, %v800_v52  ;;  %v997_v6 = vrot.slane %v3578_v18, 5  ;;  %v3639_v7 = vld [vmem:[%s3266_s10 + $0x40] sm:$0xf]  ;;  %v695_v22 = vrot.slane %v694_v2, 4 }
  0x62   : > { %v705_v49 = vrot.slane %v704_v3, 4  ;;  %v712_v20 = vshrl.u32 %v3636_v61, 16  ;;  %v715_v26 = vshll.u32 %v3636_v61, 16  ;;  %v721_v27 = vshll.u32 %v3639_v7, 16  ;;  %v3021_v3 = vld [vmem:[%s4003_s2 + $0x148] sm:$0xff] }
  0x63   : > { %v998_v18 = vsel %vm3422_vm5, %v996_v5, %v997_v6  ;;  %1838 = vmatpush.bf16.msra.mxu2 %v3030_v8  ;;  %v725_v28 = vshrl.u32 %v3639_v7, 16  ;;  %1670 = vmatpush.bf16.msra.mxu1 %v3022_v13  ;;  %v700_v29 = vsel %vm3409_vm4, %v695_v22, %v699_v21  ;;  %v1061_v31 = vunpack.c.l.b16 %v995_v17  ;;  %v3692_v21 = vld [vmem:[%s3266_s10 + $0x4c] sm:$0xf] }
  0x64   : > { %v710_v30 = vsel %vm3409_vm4, %v705_v49, %v709_v16  ;;  %v1062_v15 = vunpack.c.l.b16 %v998_v18  ;;  %v714_v32 = vrot.slane %v712_v20, 4  ;;  %v717_v33 = vrot.slane %v715_v26, 5  ;;  %v3045_v8 = vld [vmem:[%s4003_s2 + $0x208] sm:$0xff]  ;;  %v3713_v20 = vld [vmem:[%s3266_s10 + $0x50] sm:$0x1] }
  0x65   : > { %2028 = vmatpush.bf16.msra.mxu3 %v3038_v60  ;;  %v723_v34 = vrot.slane %v721_v27, 5  ;;  %v727_v35 = vrot.slane %v725_v28, 4  ;;  %v802_v14 = vunpack.c.l.b16 %v700_v29  ;;  %v803_v36 = vunpack.c.l.b16 %v710_v30 }
  0x66   : > { %v1001_v40 = vrot.slane %v3608_v38, 5  ;;  %v3671_v41 = vpack.c.b16 %v1062_v15, %v1061_v31  ;;  %v718_v42 = vor.u32 %v717_v33, %v714_v32  ;;  %v731_v45 = vshll.u32 %v3668_v39, 16 }
  0x67   : > { %v728_v44 = vor.u32 %v727_v35, %v723_v34  ;;  %v3674_v46 = vpack.c.b16 %v803_v36, %v802_v14  ;;  %v1004_v51 = vrot.slane %v3624_v63, 5  ;;  %1839 = vmatpush.bf16.msra.mxu2 %v3029_v55  ;;  %v736_v4 = vshrl.u32 %v3689_v56, 16  ;;  %1671 = vmatpush.bf16.msra.mxu1 %v3021_v3  ;;  %v3028_v14 = vld [vmem:[%s4003_s2 + $0x180] sm:$0xff] }
  0x68   : > { %v1003_v50 = vrot.slane %v1001_v40, 4  ;;  %v719_v38 = vrot.slane %v718_v42, 4  ;;  %v733_v24 = vrot.slane %v731_v45, 5  ;;  %v1002_v57 = vsel %vm3422_vm5, %v2619_v48, %v1001_v40  ;;  %v3036_v36 = vld [vmem:[%s4003_s2 + $0x1c0] sm:$0xff]  ;;  %v3737_v40 = vld [vmem:[%s3266_s10 + $0x58] sm:$0xf] }
  0x69   : > { %v729_v52 = vrot.slane %v728_v44, 4  ;;  %2029 = vmatpush.bf16.msra.mxu3 %v3037_v37  ;;  %v739_v23 = vshll.u32 %v3689_v56, 16  ;;  %v745_v5 = vshll.u32 %v3692_v21, 16  ;;  %v749_v6 = vshrl.u32 %v3692_v21, 16 }
  0x6a   : > { %v1005_v62 = vsel %vm3422_vm5, %v1003_v50, %v1004_v51  ;;  %v724_v63 = vsel %vm3409_vm4, %v719_v38, %v723_v34  ;;  %v1063_v60 = vunpack.c.l.b16 %v1002_v57  ;;  %v738_v16 = vrot.slane %v736_v4, 4  ;;  %v3758_v4 = vld [vmem:[%s3266_s10 + $0x5c] sm:$0x1] }
  0x6b   : > { %v734_v2 = vsel %vm3409_vm4, %v729_v52, %v733_v24  ;;  %v1064_v13 = vunpack.c.l.b16 %v1005_v62  ;;  %v804_v22 = vunpack.c.l.b16 %v724_v63  ;;  %v747_v17 = vrot.slane %v745_v5, 5  ;;  %1840 = vmatpush.bf16.msra.mxu2 %v3028_v14  ;;  %v3044_v52 = vld [vmem:[%s4003_s2 + $0x200] sm:$0xff] }
  0x6c   : > { %v805_v49 = vunpack.c.l.b16 %v734_v2  ;;  %v751_v18 = vrot.slane %v749_v6, 4  ;;  %v1008_v27 = vrot.slane %v3639_v7, 5  ;;  %v755_v31 = vshll.u32 %v3713_v20, 16 }
  0x6d   : > { %v3715_v26 = vpack.c.b16 %v1064_v13, %v1063_v60  ;;  %v2620_v15 = vrot.slane %v3636_v61, 9  ;;  %v1011_v7 = vrot.slane %v3668_v39, 5  ;;  %v3734_v61 = vld [vmem:[%s3266_s10 + $0x54] sm:$0xf]  ;;  %2030 = vmatpush.bf16.msra.mxu3 %v3036_v36  ;;  %v1392_v51 = vshll.u32 %v3737_v40, 16 }
  0x6e   : > { %890 = vmatmul.bf16.gmra.mxu1 %v3540_v47  ;;  %1151 = vmatmul.bf16.gmra.mxu2 %v3580_v59  ;;  %v3718_v28 = vpack.c.b16 %v805_v49, %v804_v22  ;;  %v752_v30 = vor.u32 %v751_v18, %v747_v17  ;;  %v1010_v32 = vrot.slane %v1008_v27, 4  ;;  %v757_v35 = vrot.slane %v755_v31, 5 }
  0x6f   : > { %v1009_v39 = vsel %vm3422_vm5, %v2620_v15, %v1008_v27  ;;  %v1383_v48 = vshrl.u32 %v3734_v61, 16  ;;  %v1386_v50 = vshll.u32 %v3734_v61, 16  ;;  %v1396_v38 = vshrl.u32 %v3737_v40, 16 }
  0x70   : > { %1319 = vmatmul.bf16.gmra.mxu3 %v3371_v53  ;;  %1509 = vmatmul.bf16.gmra.mxu0 %v3583_v25  ;;  %v753_v34 = vrot.slane %v752_v30, 4  ;;  %v1012_v42 = vsel %vm3422_vm5, %v1010_v32, %v1011_v7  ;;  %v1065_v24 = vunpack.c.l.b16 %v1009_v39  ;;  %v1394_v2 = vrot.slane %v1392_v51, 5 }
  0x71   : > { %v1066_v55 = vunpack.c.l.b16 %v1012_v42  ;;  %v1385_v62 = vrot.slane %v1383_v48, 4  ;;  %v1388_v63 = vrot.slane %v1386_v50, 5  ;;  %v1398_v3 = vrot.slane %v1396_v38, 4 }
  0x72   : > { %v758_v45 = vsel %vm3409_vm4, %v753_v34, %v757_v35  ;;  %v1402_v49 = vshll.u32 %v3758_v4, 16 }
  0x73   : > { %v807_v57 = vunpack.c.l.b16 %v758_v45  ;;  %v1389_v13 = vor.u32 %v1388_v63, %v1385_v62  ;;  %v1399_v22 = vor.u32 %v1398_v3, %v1394_v2 }
  0x74   : > { %v1404_v27 = vrot.slane %v1402_v49, 5 }
  0x75   : > { %v1390_v18 = vrot.slane %v1389_v13, 4 }
  0x7e   : > { %895 = vmatmul.bf16.gmra.mxu1 %v3583_v25  ;;  %1156 = vmatmul.bf16.gmra.mxu2 %v3626_v0 }
  0x80   : > { %1324 = vmatmul.bf16.gmra.mxu3 %v3283_v11  ;;  %1514 = vmatmul.bf16.gmra.mxu0 %v3628_v1  ;;  %v3046_v11 = vld [vmem:[%s4003_s2 + $0x210] sm:$0xff] }
  0x81   : > { %2202 = vmatpush.bf16.msra.mxu0 %v3046_v11  ;;  %v741_v11 = vrot.slane %v739_v23, 5  ;;  %v3760_v23 = vpack.c.b16 %v1066_v55, %v1065_v24 }
  0x83   : > { %v742_v29 = vor.u32 %v741_v11, %v738_v16  ;;  %v2621_v16 = vrot.slane %v3689_v56, 9 }
  0x85   : > { %2203 = vmatpush.bf16.msra.mxu0 %v3045_v8  ;;  %v743_v33 = vrot.slane %v742_v29, 4  ;;  %v1015_v8 = vrot.slane %v3692_v21, 5  ;;  %v1400_v21 = vrot.slane %v1399_v22, 4 }
  0x87   : > { %v748_v44 = vsel %vm3409_vm4, %v743_v33, %v747_v17  ;;  %v1017_v11 = vrot.slane %v1015_v8, 4  ;;  %v1018_v17 = vrot.slane %v3713_v20, 5  ;;  %v1016_v15 = vsel %vm3422_vm5, %v2621_v16, %v1015_v8 }
  0x88   : > { %v806_v37 = vunpack.c.l.b16 %v748_v44  ;;  %v1395_v20 = vsel %vm3409_vm4, %v1390_v18, %v1394_v2  ;;  %v1405_v7 = vsel %vm3409_vm4, %v1400_v21, %v1404_v27  ;;  %v1067_v33 = vunpack.c.l.b16 %v1016_v15  ;;  %v3797_v44 = vld [vmem:[%s3266_s10 + $0x54] sm:$0xff] }
  0x89   : > { %2204 = vmatpush.bf16.msra.mxu0 %v3044_v52  ;;  %v1019_v32 = vsel %vm3422_vm5, %v1017_v11, %v1018_v17  ;;  %v1439_v35 = vunpack.c.l.b16 %v1395_v20  ;;  %v1440_v14 = vunpack.c.l.b16 %v1405_v7 }
  0x8a   : > { %v3764_v6 = vpack.c.b16 %v807_v57, %v806_v37  ;;  %v1068_v34 = vunpack.c.l.b16 %v1019_v32 }
  0x8b   : > { %v3799_v45 = vpack.c.b16 %v1440_v14, %v1439_v35 }
  0x8c   : > { %v3792_v39 = vpack.c.b16 %v1068_v34, %v1067_v33 }
  0x8e   : > { %900 = vmatmul.bf16.gmra.mxu1 %v3628_v1  ;;  %1161 = vmatmul.bf16.gmra.mxu2 %v3671_v41 }
  0x90   : > { %1329 = vmatmul.bf16.gmra.mxu3 %v3374_v54  ;;  %1519 = vmatmul.bf16.gmra.mxu0 %v3674_v46 }
  0x9e   : > { %905 = vmatmul.bf16.gmra.mxu1 %v3674_v46  ;;  %1166 = vmatmul.bf16.gmra.mxu2 %v3715_v26 }
  0xa0   : > { %1334 = vmatmul.bf16.gmra.mxu3 %v3286_v12  ;;  %1524 = vmatmul.bf16.gmra.mxu0 %v3718_v28  ;;  %v3020_v12 = vld [vmem:[%s4003_s2 + $0x140] sm:$0xff] }
  0xa1   : > { %1672 = vmatpush.bf16.msra.mxu1 %v3020_v12 }
  0xab   : > { %v3762_v5 = vpop.f32.mrf.mxu1 }
  0xad   : > { %v492_v60 = vpop.f32.mrf.mxu0 }
  0xae   : > { %910 = vmatmul.bf16.gmra.mxu1 %v3718_v28  ;;  %1171 = vmatmul.bf16.gmra.mxu2 %v3760_v23 }
  0xb0   : > { %1339 = vmatmul.bf16.gmra.mxu3 %v3380_v58  ;;  %1529 = vmatmul.bf16.gmra.mxu0 %v3764_v6 }
  0xb1   : > { %v3774_v29 = vpop.f32.mrf.mxu2 }
  0xb3   : > { %v3776_v30 = vpop.f32.mrf.mxu3  ;;  %v3778_v31 = vpop.f32.mrf.mxu1 }
  0xb5   : > { %v494_v56 = vpop.f32.mrf.mxu0 }
  0xb9   : > { %v3788_v36 = vpop.f32.mrf.mxu2 }
  0xbb   : > { %v3790_v12 = vpop.f32.mrf.mxu3  ;;  %v3794_v42 = vpop.f32.mrf.mxu1 }
  0xbd   : > { %v497_v48 = vpop.f32.mrf.mxu0 }
  0xbe   : > { %915 = vmatmul.bf16.gmra.mxu1 %v3764_v6  ;;  %1176 = vmatmul.bf16.gmra.mxu2 %v3792_v39 }
  0xc0   : > { %1344 = vmatmul.bf16.gmra.mxu3 %v3797_v44  ;;  %1534 = vmatmul.bf16.gmra.mxu0 %v3799_v45 }
  0xc1   : > { %v3805_v50 = vpop.f32.mrf.mxu2 }
  0xc3   : > { %v3807_v51 = vpop.f32.mrf.mxu3  ;;  %v3809_v38 = vpop.f32.mrf.mxu1 }
  0xc5   : > { %v499_v52 = vpop.f32.mrf.mxu0 }
  0xc9   : > { %v3811_v24 = vpop.f32.mrf.mxu2 }
  0xcb   : > { %v3813_v55 = vpop.f32.mrf.mxu3  ;;  %v881_v37 = vpop.f32.mrf.mxu1 }
  0xcc   : > { %v921_v57 = vadd.f32 %v881_v37, %v492_v60 }
  0xcd   : > { %v1500_v62 = vpop.f32.mrf.mxu0 }
  0xce   : > { %1673 = vmatmul.bf16.vlgmr.msra.gmra.mxu1 %v3537_v43  ;;  %1841 = vmatmul.bf16.vlgmr.msra.gmra.mxu2 %v3280_v10 }
  0xd0   : > { %2031 = vmatmul.bf16.vlgmr.msra.gmra.mxu3 %v3540_v47  ;;  %2205 = vmatmul.bf16.vlgmr.msra.gmra.mxu0 %v3580_v59 }
  0xd1   : > { %v1142_v63 = vpop.f32.mrf.mxu2 }
  0xd2   : > { %v1182_v2 = vadd.f32 %v1142_v63, %v921_v57  ;;  %v3122_v57 = vld [vmem:[%s3266_s10 + $0x24] sm:$0xff] }
  0xd3   : > { %v1310_v3 = vpop.f32.mrf.mxu3  ;;  %v883_v8 = vpop.f32.mrf.mxu1 }
  0xd4   : > { %v1350_v13 = vadd.f32 %v1310_v3, %v1182_v2  ;;  %v922_v22 = vadd.f32 %v883_v8, %v494_v56 }
  0xd5   : > { %v1502_v49 = vpop.f32.mrf.mxu0 }
  0xd6   : > { %v3819_v16 = vadd.f32 %v1500_v62, %v1350_v13 }
  0xd9   : > { %v1144_v11 = vpop.f32.mrf.mxu2 }
  0xda   : > { %v1183_v60 = vadd.f32 %v1144_v11, %v922_v22 }
  0xdb   : > { %v1312_v17 = vpop.f32.mrf.mxu3  ;;  %v886_v18 = vpop.f32.mrf.mxu1 }
  0xdc   : > { %v1351_v43 = vadd.f32 %v1312_v17, %v1183_v60  ;;  %v923_v21 = vadd.f32 %v886_v18, %v497_v48 }
  0xdd   : > { %v1505_v10 = vpop.f32.mrf.mxu0 }
  0xde   : > { %1678 = vmatmul.bf16.gmra.mxu1 %v3580_v59  ;;  %1846 = vmatmul.bf16.gmra.mxu2 %v3371_v53  ;;  %v3823_v47 = vadd.f32 %v1502_v49, %v1351_v43 }
  0xe0   : > { %2036 = vmatmul.bf16.gmra.mxu3 %v3583_v25  ;;  %2210 = vmatmul.bf16.gmra.mxu0 %v3626_v0 }
  0xe1   : > { %v1147_v27 = vpop.f32.mrf.mxu2 }
  0xe2   : > { %v1184_v15 = vadd.f32 %v1147_v27, %v923_v21 }
  0xe3   : > { %v1315_v32 = vpop.f32.mrf.mxu3  ;;  %v888_v56 = vpop.f32.mrf.mxu1 }
  0xe4   : > { %v1352_v20 = vadd.f32 %v1315_v32, %v1184_v15  ;;  %v924_v7 = vadd.f32 %v888_v56, %v499_v52 }
  0xe5   : > { %v1507_v33 = vpop.f32.mrf.mxu0 }
  0xe6   : > { %v3827_v34 = vadd.f32 %v1505_v10, %v1352_v20 }
  0xe9   : > { %v1149_v35 = vpop.f32.mrf.mxu2 }
  0xea   : > { %v1185_v59 = vadd.f32 %v1149_v35, %v924_v7 }
  0xeb   : > { %v1317_v14 = vpop.f32.mrf.mxu3  ;;  %v891_v53 = vpop.f32.mrf.mxu1 }
  0xec   : > { %v1353_v48 = vadd.f32 %v1317_v14, %v1185_v59  ;;  %v925_v37 = vadd.f32 %v891_v53, %v3762_v5 }
  0xed   : > { %v1510_v25 = vpop.f32.mrf.mxu0 }
  0xee   : > { %1683 = vmatmul.bf16.gmra.mxu1 %v3626_v0  ;;  %1851 = vmatmul.bf16.gmra.mxu2 %v3122_v57  ;;  %v3832_v62 = vadd.f32 %v1507_v33, %v1353_v48 }
  0xf0   : > { %2041 = vmatmul.bf16.gmra.mxu3 %v3628_v1  ;;  %2215 = vmatmul.bf16.gmra.mxu0 %v3671_v41 }
  0xf1   : > { %v1152_v52 = vpop.f32.mrf.mxu2 }
  0xf2   : > { %v1186_v63 = vadd.f32 %v1152_v52, %v925_v37 }
  0xf3   : > { %v1320_v2 = vpop.f32.mrf.mxu3  ;;  %v893_v3 = vpop.f32.mrf.mxu1 }
  0xf4   : > { %v1354_v8 = vadd.f32 %v1320_v2, %v1186_v63  ;;  %v926_v13 = vadd.f32 %v893_v3, %v3778_v31 }
  0xf5   : > { %v1512_v22 = vpop.f32.mrf.mxu0 }
  0xf6   : > { %v3837_v5 = vadd.f32 %v1510_v25, %v1354_v8 }
  0xf9   : > { %v1154_v49 = vpop.f32.mrf.mxu2 }
  0xfa   : > { %v1187_v0 = vadd.f32 %v1154_v49, %v926_v13 }
  0xfb   : > { %v1322_v11 = vpop.f32.mrf.mxu3  ;;  %v896_v60 = vpop.f32.mrf.mxu1 }
  0xfc   : > { %v1355_v17 = vadd.f32 %v1322_v11, %v1187_v0  ;;  %v927_v18 = vadd.f32 %v896_v60, %v3794_v42  ;;  %v1578_v0 = vrot.slane %v3758_v4, 5  ;;  %v2499_v11 = vld [vmem:[%s3271_s13 + $0xc] sm:$0xf]  ;;  %v2500_v60 = vld [vmem:[%s3271_s13 + $0x10] sm:$0xf] }
  0xfd   : > { %v1515_v1 = vpop.f32.mrf.mxu0 }
  0xfe   : > { %1688 = vmatmul.bf16.gmra.mxu1 %v3671_v41  ;;  %1856 = vmatmul.bf16.gmra.mxu2 %v3374_v54  ;;  %v3842_v43 = vadd.f32 %v1512_v22, %v1355_v17  ;;  %v2770_v22 = vrot.slane %v3734_v61, 9 }
 0x100   : > { %2046 = vmatmul.bf16.gmra.mxu3 %v3674_v46  ;;  %2220 = vmatmul.bf16.gmra.mxu0 %v3715_v26  ;;  %v3123_v46 = vld [vmem:[%s3266_s10 + $0x3c] sm:$0xff]  ;;  %s2496_s10 = sshll.u32 %s4024_s29, 1 }
 0x101   : > { %v1157_v31 = vpop.f32.mrf.mxu2 }
 0x102   : > { %v1188_v21 = vadd.f32 %v1157_v31, %v927_v18  ;;  %v1918_v31 = vshll.u32 %v2499_v11, 16 }
 0x103   : > { %v1325_v10 = vpop.f32.mrf.mxu3  ;;  %v898_v27 = vpop.f32.mrf.mxu1 }
 0x104   : > { %v1356_v15 = vadd.f32 %v1325_v10, %v1188_v21  ;;  %v928_v32 = vadd.f32 %v898_v27, %v3809_v38  ;;  %v1928_v21 = vshrl.u32 %v2500_v60, 16 }
 0x105   : > { %v1517_v42 = vpop.f32.mrf.mxu0 }
 0x106   : > { %v3847_v56 = vadd.f32 %v1515_v1, %v1356_v15  ;;  %v1915_v1 = vshrl.u32 %v2499_v11, 16 }
 0x109   : > { %v1159_v41 = vpop.f32.mrf.mxu2 }
 0x10a   : > { %v1189_v20 = vadd.f32 %v1159_v41, %v928_v32  ;;  %v1920_v41 = vrot.slane %v1918_v31, 5 }
 0x10b   : > { %v1327_v54 = vpop.f32.mrf.mxu3  ;;  %v901_v7 = vpop.f32.mrf.mxu1 }
 0x10c   : > { %v1357_v33 = vadd.f32 %v1327_v54, %v1189_v20  ;;  %v929_v38 = vadd.f32 %v901_v7, %v3774_v29  ;;  %v1930_v54 = vrot.slane %v1928_v21, 4 }
 0x10d   : > { %v1520_v35 = vpop.f32.mrf.mxu0 }
 0x10e   : > { %1693 = vmatmul.bf16.gmra.mxu1 %v3715_v26  ;;  %1861 = vmatmul.bf16.gmra.mxu2 %v3123_v46  ;;  %v3851_v59 = vadd.f32 %v1517_v42, %v1357_v33  ;;  %v1917_v42 = vrot.slane %v1915_v1, 4  ;;  %v2501_v33 = vld [vmem:[%s3271_s13 + $0x14] sm:$0x1] }
 0x110   : > { %2051 = vmatmul.bf16.gmra.mxu3 %v3718_v28  ;;  %2225 = vmatmul.bf16.gmra.mxu0 %v3760_v23  ;;  %v1575_v28 = vrot.slane %v3737_v40, 5 }
 0x111   : > { %v1162_v14 = vpop.f32.mrf.mxu2 }
 0x112   : > { %v1190_v53 = vadd.f32 %v1162_v14, %v929_v38  ;;  %v1577_v49 = vrot.slane %v1575_v28, 4 }
 0x113   : > { %v1330_v48 = vpop.f32.mrf.mxu3  ;;  %v903_v37 = vpop.f32.mrf.mxu1 }
 0x114   : > { %v1358_v25 = vadd.f32 %v1330_v48, %v1190_v53  ;;  %v930_v26 = vadd.f32 %v903_v37, %v3788_v36  ;;  %v1579_v61 = vsel %vm3422_vm5, %v1577_v49, %v1578_v0  ;;  %v1921_v48 = vor.u32 %v1920_v41, %v1917_v42 }
 0x115   : > { %v1522_v57 = vpop.f32.mrf.mxu0  ;;  %v1614_v15 = vunpack.c.l.b16 %v1579_v61 }
 0x116   : > { %v3856_v52 = vadd.f32 %v1520_v35, %v1358_v25  ;;  %v1934_v25 = vshll.u32 %v2501_v33, 16 }
 0x119   : > { %v1164_v63 = vpop.f32.mrf.mxu2 }
 0x11a   : > { %v1191_v2 = vadd.f32 %v1164_v63, %v930_v26  ;;  %v2107_v63 = vrot.slane %v2500_v60, 5 }
 0x11b   : > { %v1332_v3 = vpop.f32.mrf.mxu3  ;;  %v906_v8 = vpop.f32.mrf.mxu1 }
 0x11c   : > { %v1359_v13 = vadd.f32 %v1332_v3, %v1191_v2  ;;  %v931_v40 = vadd.f32 %v906_v8, %v3805_v50 }
 0x11d   : > { %v1525_v29 = vpop.f32.mrf.mxu0 }
 0x11e   : > { %1698 = vmatmul.bf16.gmra.mxu1 %v3760_v23  ;;  %1866 = vmatmul.bf16.gmra.mxu2 %v3380_v58  ;;  %v3864_v36 = vadd.f32 %v1522_v57, %v1359_v13  ;;  %v1576_v58 = vsel %vm3422_vm5, %v2770_v22, %v1575_v28  ;;  %v1936_v28 = vrot.slane %v1934_v25, 5  ;;  %v2919_v13 = vrot.slane %v2499_v11, 9 }
 0x11f   : > { %v1613_v50 = vunpack.c.l.b16 %v1576_v58  ;;  %v2110_v22 = vrot.slane %v2501_v33, 5 }
 0x120   : > { %2056 = vmatmul.bf16.gmra.mxu3 %v3764_v6  ;;  %2230 = vmatmul.bf16.gmra.mxu0 %v3792_v39  ;;  %v1924_v6 = vshll.u32 %v2500_v60, 16 }
 0x121   : > { %v1167_v17 = vpop.f32.mrf.mxu2  ;;  %v1615_v53 = vpack.c.b16 %v1614_v15, %v1613_v50 }
 0x122   : > { %v1192_v18 = vadd.f32 %v1167_v17, %v931_v40  ;;  %v1926_v20 = vrot.slane %v1924_v6, 5 }
 0x123   : > { %v1335_v23 = vpop.f32.mrf.mxu3  ;;  %v908_v4 = vpop.f32.mrf.mxu1 }
 0x124   : > { %v1360_v10 = vadd.f32 %v1335_v23, %v1192_v18  ;;  %v932_v7 = vadd.f32 %v908_v4, %v3811_v24  ;;  %v1931_v37 = vor.u32 %v1930_v54, %v1926_v20  ;;  %v1922_v24 = vrot.slane %v1921_v48, 4 }
 0x125   : > { %v1527_v27 = vpop.f32.mrf.mxu0  ;;  %v2108_v18 = vsel %vm3422_vm5, %v2919_v13, %v2107_v63 }
 0x126   : > { %v3875_v32 = vadd.f32 %v1525_v29, %v1360_v10  ;;  %v1932_v3 = vrot.slane %v1931_v37, 4  ;;  %v2109_v29 = vrot.slane %v2107_v63, 4  ;;  %v2145_v61 = vunpack.c.l.b16 %v2108_v18  ;;  %v2979_v10 = vld [vmem:[%s3271_s13 + $0xc] sm:$0xff]  ;;  %s2497_s13 = sshll.u32 %s4022_s19, 5 }
 0x127   : > { %s304_s16 = sadd.s32 %s2497_s13, %s2496_s10 }
 0x128   : > { %s2498_s25 = sshll.u32 %s304_s16, 3 }
 0x129   : > { %v1169_v35 = vpop.f32.mrf.mxu2  ;;  %s3924_s26 = scalar_lea.vmem %s4006_s5, %s2498_s25 }
 0x12a   : > { %v1193_v46 = vadd.f32 %v1169_v35, %v932_v7 }
 0x12b   : > { %v1337_v38 = vpop.f32.mrf.mxu3  ;;  %v911_v14 = vpop.f32.mrf.mxu1 }
 0x12c   : > { %v1361_v57 = vadd.f32 %v1337_v38, %v1193_v46  ;;  %v933_v8 = vadd.f32 %v911_v14, %v3776_v30  ;;  %v2111_v30 = vsel %vm3422_vm5, %v2109_v29, %v2110_v22  ;;  %v3916_v22 = vld [vmem:[%s4005_s4] ss:$0 sm:$0xff] }
 0x12d   : > { %v1530_v26 = vpop.f32.mrf.mxu0  ;;  %v2146_v4 = vunpack.c.l.b16 %v2111_v30 }
 0x12e   : > { %1703 = vmatmul.bf16.gmra.mxu1 %v3792_v39  ;;  %1871 = vmatmul.bf16.gmra.mxu2 %v3797_v44  ;;  %v3881_v2 = vadd.f32 %v1527_v27, %v1361_v57  ;;  %v1927_v39 = vsel %vm3409_vm4, %v1922_v24, %v1926_v20 }
 0x12f   : > { %v1971_v23 = vunpack.c.l.b16 %v1927_v39  ;;  %v2147_v50 = vpack.c.b16 %v2146_v4, %v2145_v61 }
 0x130   : > { %2061 = vmatmul.bf16.gmra.mxu3 %v3799_v45  ;;  %2235 = vmatmul.bf16.gmra.mxu0 %v1615_v53  ;;  %v1937_v45 = vsel %vm3409_vm4, %v1932_v3, %v1936_v28 }
 0x131   : > { %v1172_v49 = vpop.f32.mrf.mxu2  ;;  %v1972_v58 = vunpack.c.l.b16 %v1937_v45 }
 0x132   : > { %v1194_v0 = vadd.f32 %v1172_v49, %v933_v8 }
 0x133   : > { %v1340_v40 = vpop.f32.mrf.mxu3  ;;  %v913_v60 = vpop.f32.mrf.mxu1  ;;  %v1973_v27 = vpack.c.b16 %v1972_v58, %v1971_v23 }
 0x134   : > { %v1362_v44 = vadd.f32 %v1340_v40, %v1194_v0  ;;  %v934_v1 = vadd.f32 %v913_v60, %v3790_v12 }
 0x135   : > { %v1532_v17 = vpop.f32.mrf.mxu0 }
 0x136   : > { %v3893_v11 = vadd.f32 %v1530_v26, %v1362_v44 }
 0x139   : > { %v1174_v31 = vpop.f32.mrf.mxu2 }
 0x13a   : > { %v1195_v6 = vadd.f32 %v1174_v31, %v934_v1 }
 0x13b   : > { %v1342_v21 = vpop.f32.mrf.mxu3  ;;  %v916_v9 = vpop.f32.mrf.mxu1 }
 0x13c   : > { %v1363_v15 = vadd.f32 %v1342_v21, %v1195_v6  ;;  %v935_v41 = vadd.f32 %v916_v9, %v3807_v51 }
 0x13d   : > { %v1535_v42 = vpop.f32.mrf.mxu0 }
 0x13e   : > { %1708 = vmatmul.bf16.gmra.mxu1 %v1615_v53  ;;  %1876 = vmatmul.bf16.gmra.mxu2 %v2979_v10  ;;  %v3897_v19 = vadd.f32 %v1532_v17, %v1363_v15 }
 0x140   : > { %2066 = vmatmul.bf16.gmra.mxu3 %v1973_v27  ;;  %2240 = vmatmul.bf16.gmra.mxu0 %v2147_v50 }
 0x141   : > { %v1177_v20 = vpop.f32.mrf.mxu2 }
 0x142   : > { %v1196_v54 = vadd.f32 %v1177_v20, %v935_v41 }
 0x143   : > { %v1345_v12 = vpop.f32.mrf.mxu3  ;;  %v918_v7 = vpop.f32.mrf.mxu1 }
 0x144   : > { %v1364_v33 = vadd.f32 %v1345_v12, %v1196_v54  ;;  %v936_v38 = vadd.f32 %v918_v7, %v3813_v55  ;;  %v3911_v55 = vld [vmem:[%s4004_s3] ss:$0 sm:$0xff] }
 0x145   : > { %v1537_v35 = vpop.f32.mrf.mxu0 }
 0x146   : > { %v3900_v46 = vadd.f32 %v1535_v42, %v1364_v33 }
 0x149   : > { %v1179_v14 = vpop.f32.mrf.mxu2 }
 0x14a   : > { %v1197_v53 = vadd.f32 %v1179_v14, %v936_v38 }
 0x14b   : > { %v1347_v48 = vpop.f32.mrf.mxu3  ;;  %v1674_v37 = vpop.f32.mrf.mxu1 }
 0x14c   : > { %v1365_v25 = vadd.f32 %v1347_v48, %v1197_v53  ;;  %v1714_v51 = vadd.f32 %v1674_v37, %v3819_v16 }
 0x14d   : > { %v2206_v57 = vpop.f32.mrf.mxu0 }
 0x14e   : > { %v3903_v26 = vadd.f32 %v1537_v35, %v1365_v25 }
 0x151   : > { %v1842_v63 = vpop.f32.mrf.mxu2 }
 0x152   : > { %v1882_v24 = vadd.f32 %v1842_v63, %v1714_v51 }
 0x153   : > { %v2032_v3 = vpop.f32.mrf.mxu3  ;;  %v1676_v28 = vpop.f32.mrf.mxu1 }
 0x154   : > { %v2072_v8 = vadd.f32 %v2032_v3, %v1882_v24  ;;  %v1715_v49 = vadd.f32 %v1676_v28, %v3823_v47 }
 0x155   : > { %v2208_v13 = vpop.f32.mrf.mxu0 }
 0x156   : > { %v2246_v29 = vadd.f32 %v2206_v57, %v2072_v8 }
 0x158   : > { %v2298_v16 = vmul.f32 %v3911_v55, %v2246_v29 }
 0x159   : > { %v1844_v0 = vpop.f32.mrf.mxu2 }
 0x15a   : > { %v2318_v40 = vadd.f32 %v3916_v22, %v2298_v16  ;;  %v1883_v60 = vadd.f32 %v1844_v0, %v1715_v49 }
 0x15b   : > { %v2034_v39 = vpop.f32.mrf.mxu3  ;;  %v1679_v44 = vpop.f32.mrf.mxu1 }
 0x15c   : > { %v2334_v17 = vmax.f32 %v2318_v40, 0.0  ;;  %v2073_v45 = vadd.f32 %v2034_v39, %v1883_v60  ;;  %v1716_v23 = vadd.f32 %v1679_v44, %v3827_v34 }
 0x15d   : > { %v2211_v18 = vpop.f32.mrf.mxu0 }
 0x15e   : > { %2350 = vst [vmem:[%s3924_s26] sm:$0xff] %v2334_v17  ;;  %v2247_v30 = vadd.f32 %v2208_v13, %v2073_v45 }
 0x160   : > { %v2299_v47 = vmul.f32 %v3911_v55, %v2247_v30 }
 0x161   : > { %v1847_v58 = vpop.f32.mrf.mxu2 }
 0x162   : > { %v2319_v61 = vadd.f32 %v3916_v22, %v2299_v47  ;;  %v1884_v4 = vadd.f32 %v1847_v58, %v1716_v23 }
 0x163   : > { %v2037_v1 = vpop.f32.mrf.mxu3  ;;  %v1681_v31 = vpop.f32.mrf.mxu1 }
 0x164   : > { %v2335_v6 = vmax.f32 %v2319_v61, 0.0  ;;  %v2074_v21 = vadd.f32 %v2037_v1, %v1884_v4  ;;  %v1717_v50 = vadd.f32 %v1681_v31, %v3832_v62 }
 0x165   : > { %v2213_v10 = vpop.f32.mrf.mxu0 }
 0x166   : > { %2351 = vst [vmem:[%s3924_s26 + $0x8] sm:$0xff] %v2335_v6  ;;  %v2248_v9 = vadd.f32 %v2211_v18, %v2074_v21 }
 0x168   : > { %v2300_v27 = vmul.f32 %v3911_v55, %v2248_v9 }
 0x169   : > { %v1849_v15 = vpop.f32.mrf.mxu2 }
 0x16a   : > { %v2320_v42 = vadd.f32 %v3916_v22, %v2300_v27  ;;  %v1885_v34 = vadd.f32 %v1849_v15, %v1717_v50 }
 0x16b   : > { %v2039_v41 = vpop.f32.mrf.mxu3  ;;  %v1684_v20 = vpop.f32.mrf.mxu1 }
 0x16c   : > { %v2336_v54 = vmax.f32 %v2320_v42, 0.0  ;;  %v2075_v12 = vadd.f32 %v2039_v41, %v1885_v34  ;;  %v1718_v38 = vadd.f32 %v1684_v20, %v3837_v5 }
 0x16d   : > { %v2216_v7 = vpop.f32.mrf.mxu0 }
 0x16e   : > { %2352 = vst [vmem:[%s3924_s26 + $0x10] sm:$0xff] %v2336_v54  ;;  %v2249_v33 = vadd.f32 %v2213_v10, %v2075_v12 }
 0x170   : > { %v2301_v35 = vmul.f32 %v3911_v55, %v2249_v33 }
 0x171   : > { %v1852_v14 = vpop.f32.mrf.mxu2 }
 0x172   : > { %v2321_v53 = vadd.f32 %v3916_v22, %v2301_v35  ;;  %v1886_v62 = vadd.f32 %v1852_v14, %v1718_v38 }
 0x173   : > { %v2042_v48 = vpop.f32.mrf.mxu3  ;;  %v1686_v37 = vpop.f32.mrf.mxu1 }
 0x174   : > { %v2337_v25 = vmax.f32 %v2321_v53, 0.0  ;;  %v2076_v57 = vadd.f32 %v2042_v48, %v1886_v62  ;;  %v1719_v3 = vadd.f32 %v1686_v37, %v3842_v43 }
 0x175   : > { %v2218_v51 = vpop.f32.mrf.mxu0 }
 0x176   : > { %2353 = vst [vmem:[%s3924_s26 + $0x18] sm:$0xff] %v2337_v25  ;;  %v2250_v63 = vadd.f32 %v2216_v7, %v2076_v57 }
 0x178   : > { %v2302_v24 = vmul.f32 %v3911_v55, %v2250_v63 }
 0x179   : > { %v1854_v28 = vpop.f32.mrf.mxu2 }
 0x17a   : > { %v2322_v8 = vadd.f32 %v3916_v22, %v2302_v24  ;;  %v1887_v5 = vadd.f32 %v1854_v28, %v1719_v3 }
 0x17b   : > { %v2044_v13 = vpop.f32.mrf.mxu3  ;;  %v1689_v29 = vpop.f32.mrf.mxu1 }
 0x17c   : > { %v2338_v16 = vmax.f32 %v2322_v8, 0.0  ;;  %v2077_v49 = vadd.f32 %v2044_v13, %v1887_v5  ;;  %v1720_v39 = vadd.f32 %v1689_v29, %v3847_v56 }
 0x17d   : > { %v2221_v0 = vpop.f32.mrf.mxu0 }
 0x17e   : > { %2354 = vst [vmem:[%s3924_s26 + $0x20] sm:$0xff] %v2338_v16  ;;  %v2251_v40 = vadd.f32 %v2218_v51, %v2077_v49 }
 0x180   : > { %v2303_v60 = vmul.f32 %v3911_v55, %v2251_v40 }
 0x181   : > { %v1857_v44 = vpop.f32.mrf.mxu2 }
 0x182   : > { %v2323_v17 = vadd.f32 %v3916_v22, %v2303_v60  ;;  %v1888_v43 = vadd.f32 %v1857_v44, %v1720_v39 }
 0x183   : > { %v2047_v45 = vpop.f32.mrf.mxu3  ;;  %v1691_v18 = vpop.f32.mrf.mxu1 }
 0x184   : > { %v2339_v30 = vmax.f32 %v2323_v17, 0.0  ;;  %v2078_v47 = vadd.f32 %v2047_v45, %v1888_v43  ;;  %v1721_v4 = vadd.f32 %v1691_v18, %v3851_v59 }
 0x185   : > { %v2223_v23 = vpop.f32.mrf.mxu0 }
 0x186   : > { %2355 = vst [vmem:[%s3924_s26 + $0x28] sm:$0xff] %v2339_v30  ;;  %v2252_v58 = vadd.f32 %v2221_v0, %v2078_v47 }
 0x188   : > { %v2304_v61 = vmul.f32 %v3911_v55, %v2252_v58 }
 0x189   : > { %v1859_v1 = vpop.f32.mrf.mxu2 }
 0x18a   : > { %v2324_v31 = vadd.f32 %v3916_v22, %v2304_v61  ;;  %v1889_v56 = vadd.f32 %v1859_v1, %v1721_v4 }
 0x18b   : > { %v2049_v6 = vpop.f32.mrf.mxu3  ;;  %v1694_v21 = vpop.f32.mrf.mxu1 }
 0x18c   : > { %v2340_v10 = vmax.f32 %v2324_v31, 0.0  ;;  %v2079_v9 = vadd.f32 %v2049_v6, %v1889_v56  ;;  %v1722_v42 = vadd.f32 %v1694_v21, %v3856_v52 }
 0x18d   : > { %v2226_v27 = vpop.f32.mrf.mxu0 }
 0x18e   : > { %2356 = vst [vmem:[%s3924_s26 + $0x30] sm:$0xff] %v2340_v10  ;;  %v2253_v50 = vadd.f32 %v2223_v23, %v2079_v9 }
 0x190   : > { %v2305_v15 = vmul.f32 %v3911_v55, %v2253_v50 }
 0x191   : > { %v1862_v34 = vpop.f32.mrf.mxu2 }
 0x192   : > { %v2325_v41 = vadd.f32 %v3916_v22, %v2305_v15  ;;  %v1890_v59 = vadd.f32 %v1862_v34, %v1722_v42 }
 0x193   : > { %v2052_v20 = vpop.f32.mrf.mxu3  ;;  %v1696_v54 = vpop.f32.mrf.mxu1 }
 0x194   : > { %v2341_v12 = vmax.f32 %v2325_v41, 0.0  ;;  %v2080_v7 = vadd.f32 %v2052_v20, %v1890_v59  ;;  %v1723_v14 = vadd.f32 %v1696_v54, %v3864_v36 }
 0x195   : > { %v2228_v33 = vpop.f32.mrf.mxu0 }
 0x196   : > { %2357 = vst [vmem:[%s3924_s26 + $0x38] sm:$0xff] %v2341_v12  ;;  %v2254_v35 = vadd.f32 %v2226_v27, %v2080_v7 }
 0x198   : > { %v2306_v38 = vmul.f32 %v3911_v55, %v2254_v35 }
 0x199   : > { %v1864_v53 = vpop.f32.mrf.mxu2 }
 0x19a   : > { %v2326_v62 = vadd.f32 %v3916_v22, %v2306_v38  ;;  %v1891_v52 = vadd.f32 %v1864_v53, %v1723_v14 }
 0x19b   : > { %v2054_v48 = vpop.f32.mrf.mxu3  ;;  %v1699_v37 = vpop.f32.mrf.mxu1 }
 0x19c   : > { %v2342_v25 = vmax.f32 %v2326_v62, 0.0  ;;  %v2081_v57 = vadd.f32 %v2054_v48, %v1891_v52  ;;  %v1724_v3 = vadd.f32 %v1699_v37, %v3875_v32 }
 0x19d   : > { %v2231_v51 = vpop.f32.mrf.mxu0 }
 0x19e   : > { %2358 = vst [vmem:[%s3924_s26 + $0x40] sm:$0xff] %v2342_v25  ;;  %v2255_v63 = vadd.f32 %v2228_v33, %v2081_v57 }
 0x1a0   : > { %v2307_v24 = vmul.f32 %v3911_v55, %v2255_v63 }
 0x1a1   : > { %v1867_v28 = vpop.f32.mrf.mxu2 }
 0x1a2   : > { %v2327_v8 = vadd.f32 %v3916_v22, %v2307_v24  ;;  %v1892_v36 = vadd.f32 %v1867_v28, %v1724_v3 }
 0x1a3   : > { %v2057_v5 = vpop.f32.mrf.mxu3  ;;  %v1701_v13 = vpop.f32.mrf.mxu1 }
 0x1a4   : > { %v2343_v29 = vmax.f32 %v2327_v8, 0.0  ;;  %v2082_v16 = vadd.f32 %v2057_v5, %v1892_v36  ;;  %v1725_v60 = vadd.f32 %v1701_v13, %v3881_v2 }
 0x1a5   : > { %v2233_v49 = vpop.f32.mrf.mxu0 }
 0x1a6   : > { %2359 = vst [vmem:[%s3924_s26 + $0x48] sm:$0xff] %v2343_v29  ;;  %v2256_v0 = vadd.f32 %v2231_v51, %v2082_v16 }
 0x1a8   : > { %v2308_v40 = vmul.f32 %v3911_v55, %v2256_v0 }
 0x1a9   : > { %v1869_v39 = vpop.f32.mrf.mxu2 }
 0x1aa   : > { %v2328_v44 = vadd.f32 %v3916_v22, %v2308_v40  ;;  %v1893_v32 = vadd.f32 %v1869_v39, %v1725_v60 }
 0x1ab   : > { %v2059_v17 = vpop.f32.mrf.mxu3  ;;  %v1704_v43 = vpop.f32.mrf.mxu1 }
 0x1ac   : > { %v2344_v45 = vmax.f32 %v2328_v44, 0.0  ;;  %v2083_v18 = vadd.f32 %v2059_v17, %v1893_v32  ;;  %v1726_v58 = vadd.f32 %v1704_v43, %v3893_v11 }
 0x1ad   : > { %v2236_v47 = vpop.f32.mrf.mxu0 }
 0x1ae   : > { %2360 = vst [vmem:[%s3924_s26 + $0x50] sm:$0xff] %v2344_v45  ;;  %v2257_v30 = vadd.f32 %v2233_v49, %v2083_v18 }
 0x1b0   : > { %v2309_v23 = vmul.f32 %v3911_v55, %v2257_v30 }
 0x1b1   : > { %v1872_v61 = vpop.f32.mrf.mxu2 }
 0x1b2   : > { %v2329_v4 = vadd.f32 %v3916_v22, %v2309_v23  ;;  %v1894_v2 = vadd.f32 %v1872_v61, %v1726_v58 }
 0x1b3   : > { %v2062_v1 = vpop.f32.mrf.mxu3  ;;  %v1706_v31 = vpop.f32.mrf.mxu1 }
 0x1b4   : > { %v2345_v56 = vmax.f32 %v2329_v4, 0.0  ;;  %v2084_v6 = vadd.f32 %v2062_v1, %v1894_v2  ;;  %v1727_v9 = vadd.f32 %v1706_v31, %v3897_v19 }
 0x1b5   : > { %v2238_v27 = vpop.f32.mrf.mxu0 }
 0x1b6   : > { %2361 = vst [vmem:[%s3924_s26 + $0x58] sm:$0xff] %v2345_v56  ;;  %v2258_v21 = vadd.f32 %v2236_v47, %v2084_v6 }
 0x1b8   : > { %v2310_v10 = vmul.f32 %v3911_v55, %v2258_v21 }
 0x1b9   : > { %v1874_v50 = vpop.f32.mrf.mxu2 }
 0x1ba   : > { %v2330_v15 = vadd.f32 %v3916_v22, %v2310_v10  ;;  %v1895_v11 = vadd.f32 %v1874_v50, %v1727_v9 }
 0x1bb   : > { %v2064_v42 = vpop.f32.mrf.mxu3  ;;  %v1709_v34 = vpop.f32.mrf.mxu1 }
 0x1bc   : > { %v2346_v41 = vmax.f32 %v2330_v15, 0.0  ;;  %v2085_v59 = vadd.f32 %v2064_v42, %v1895_v11  ;;  %v1728_v12 = vadd.f32 %v1709_v34, %v3900_v46 }
 0x1bd   : > { %v2241_v38 = vpop.f32.mrf.mxu0 }
 0x1be   : > { %2362 = vst [vmem:[%s3924_s26 + $0x60] sm:$0xff] %v2346_v41  ;;  %v2259_v20 = vadd.f32 %v2238_v27, %v2085_v59 }
 0x1c0   : > { %v2311_v54 = vmul.f32 %v3911_v55, %v2259_v20 }
 0x1c1   : > { %v1877_v7 = vpop.f32.mrf.mxu2 }
 0x1c2   : > { %v2331_v33 = vadd.f32 %v3916_v22, %v2311_v54  ;;  %v1896_v19 = vadd.f32 %v1877_v7, %v1728_v12 }
 0x1c3   : > { %v2067_v35 = vpop.f32.mrf.mxu3  ;;  %v1711_v62 = vpop.f32.mrf.mxu1 }
 0x1c4   : > { %v2347_v14 = vmax.f32 %v2331_v33, 0.0  ;;  %v2086_v53 = vadd.f32 %v2067_v35, %v1896_v19  ;;  %v1729_v37 = vadd.f32 %v1711_v62, %v3903_v26 }
 0x1c5   : > { %v2243_v3 = vpop.f32.mrf.mxu0 }
 0x1c6   : > { %2363 = vst [vmem:[%s3924_s26 + $0x68] sm:$0xff] %v2347_v14  ;;  %v2260_v52 = vadd.f32 %v2241_v38, %v2086_v53 }
 0x1c8   : > { %v2312_v48 = vmul.f32 %v3911_v55, %v2260_v52 }
 0x1c9   : > { %v1879_v25 = vpop.f32.mrf.mxu2 }
 0x1ca   : > { %v2332_v46 = vadd.f32 %v3916_v22, %v2312_v48  ;;  %v1897_v57 = vadd.f32 %v1879_v25, %v1729_v37 }
 0x1cb   : > { %v2069_v51 = vpop.f32.mrf.mxu3 }
 0x1cc   : > { %v2348_v63 = vmax.f32 %v2332_v46, 0.0  ;;  %v2087_v24 = vadd.f32 %v2069_v51, %v1897_v57 }
 0x1ce   : > { %2364 = vst [vmem:[%s3924_s26 + $0x70] sm:$0xff] %v2348_v63  ;;  %v2261_v28 = vadd.f32 %v2243_v3, %v2087_v24 }
 0x1d0   : > { %v2313_v8 = vmul.f32 %v3911_v55, %v2261_v28 }
 0x1d2   : > { %v2333_v36 = vadd.f32 %v3916_v22, %v2313_v8 }
 0x1d4   : > { %v2349_v5 = vmax.f32 %v2333_v36, 0.0 }
 0x1d6   : > { %2365 = vst [vmem:[%s3924_s26 + $0x78] sm:$0xff] %v2349_v5 }
 0x1d7 PF: > { %s15_s22 = sadd.s32 1, %s3162_s22   ;;  %s4011_s18 = smov %s3154_s20 }
 0x1d8   : > { %p12_p8 = scmp.ge.s32.totalorder %s15_s22, 6   ;;  %s4012_s19 = smov %s3158_s21 }
 0x1d9   : > { %s4013_s20 = smov %s4016_s23  ;;  %s4014_s21 = smov %s4020_s24 }
 0x1da   :  { %14 = sbr.rel (!%p12_p8) target bundleno = 3 (0x3), region = 82 }

</bundles_post_ra>
